<compile_context>
chip_gen: v6e
topology: v6e:2x2x1
jax: 0.10.0
libtpu: 0.0.40
codegen_flags: <defaults>
</compile_context>

<pallas_src>
import math

import jax
import jax.numpy as jnp
from jax import lax
from jax.experimental import pallas as pl
from jax.experimental.pallas import tpu as pltpu

BN_EPS = 1e-5
PAD = 1   # every conv stage in the PyTorch module uses padding=1


# ----------------------------------------------------------------------------
# In-kernel building blocks
# ----------------------------------------------------------------------------
def _conv_bn_relu(x, w_ref, shift_ref, n_batch):
    """Conv1d(stride=1, pad=1, bias=False) + folded BN + ReLU, full resolution.

    x:         (n_batch * L, Cin) f32 value, batch elements stacked on sublanes.
    w_ref:     (K, Cin, Cout)     bf16 conv taps, BN scale pre-folded.
    shift_ref: (1, Cout)          f32 folded BN shift.
    Returns z: (n_batch * L, Cout) f32.  Rows i >= L + 2*PAD - K + 1 within a
    batch element (only possible when K > 3) are don't-care and must not be
    consumed downstream.
    """
    rows = x.shape[0]
    seg = rows // n_batch                    # per-batch-element length L
    ksize = w_ref.shape[0]

    # Local (within-element) row index; used to zero rows whose shifted source
    # falls outside the element: conv zero-padding + batch isolation in one go.
    iota = lax.broadcasted_iota(jnp.int32, (rows, 1), 0)
    if seg & (seg - 1) == 0:                 # seg is a power of two here
        local = jnp.bitwise_and(iota, seg - 1)
    else:
        local = iota % seg

    z = None
    for k in range(ksize):
        off = k - PAD                        # source-row offset of tap k
        if off == 0:
            t = x
        else:
            t = pltpu.roll(x, shift=(-off) % rows, axis=0)   # t[r] = x[r + off]
            valid = jnp.logical_and(local + off >= 0, local + off < seg)
            t = jnp.where(valid, t, 0.0)
        part = jnp.dot(t.astype(jnp.bfloat16), w_ref[k],
                       preferred_element_type=jnp.float32)
        z = part if z is None else z + part
    return jnp.maximum(z + shift_ref[...], 0.0)


def _pair_max(z):
    """m[r] = max(z[r], z[r+1]): MaxPool1d(2,2) before the stride-2 row pick."""
    zn = pltpu.roll(z, shift=z.shape[0] - 1, axis=0)         # zn[r] = z[r + 1]
    return jnp.maximum(z, zn)


def _make_kernel(n_batch, l_last, c_last):
    """Builds the fused whole-network kernel (5 conv stages + fc head)."""

    def kernel(x_ref, w1, w2, w3, w4, w5, s1, s2, s3, s4, s5,
               w0, b0, wf1, bf1, wf2, bf2, o_ref, scr):

        def stage(x, w_ref, shift_ref):
            """conv+bn+relu then MaxPool1d(2,2); keeps the stacked row layout."""
            m = _pair_max(_conv_bn_relu(x, w_ref, shift_ref, n_batch))
            rows, cout = m.shape
            scr[pl.ds(0, rows), pl.ds(0, cout)] = m
            # Even conv rows == pooled outputs, already in stacked-batch order.
            return scr[pl.ds(0, rows // 2, 2), pl.ds(0, cout)]

        y = stage(x_ref[...], w1, s1)        # (B*64, 16)
        y = stage(y, w2, s2)                 # (B*32, 32)
        y = stage(y, w3, s3)                 # (B*16, 32)
        y = stage(y, w4, s4)                 # (B* 8, 64)

        # Stage 5 (K=5): conv length 6 < 8, pooled length l_last = 3.  Pool and
        # gather the per-position pooled rows straight out of the scratch.
        m = _pair_max(_conv_bn_relu(y, w5, s5, n_batch))     # (B*8, 64)
        rows = m.shape[0]
        seg = rows // n_batch                                # 8
        scr[pl.ds(0, rows), pl.ds(0, c_last)] = m

        # fc0 with PyTorch's channel-major flatten folded into w0's layout:
        # h[b] = sum_l pooled[b, l, :] @ w0[l]  (w0[l, c, :] = fc0_w[c*3 + l, :])
        h = None
        for l in range(l_last):
            feat_l = scr[pl.ds(2 * l, n_batch, seg), pl.ds(0, c_last)]  # (B, 64)
            part = jnp.dot(feat_l.astype(jnp.bfloat16), w0[l],
                           preferred_element_type=jnp.float32)
            h = part if h is None else h + part
        h = jnp.maximum(h + b0[...], 0.0)                    # relu(fc0(x))
        h = jnp.dot(h.astype(jnp.bfloat16), wf1[...],
                    preferred_element_type=jnp.float32) + bf1[...]
        h = jnp.maximum(h, 0.0)                              # relu(fc1(x)); icarl=False
        o_ref[...] = jnp.dot(h.astype(jnp.bfloat16), wf2[...],
                             preferred_element_type=jnp.float32) + bf2[...]

    return kernel


# ----------------------------------------------------------------------------
# Host wrapper: single fused pallas_call, whole batch in one grid step
# ----------------------------------------------------------------------------
def _const_index_map(ndim):
    block_index = (0,) * ndim
    return lambda i: block_index


def net_forward(x_ncl, p):
    """Forward of `Net` (icarl=False, cosine_liner=False, is_feature_input=False)."""
    n, c_in, length = x_ncl.shape
    # NCL -> (N*L, C): batch stacked along sublanes, channels on lanes.
    x_rows = jnp.transpose(x_ncl, (0, 2, 1)).reshape(n * length, c_in)
    x_rows = x_rows.astype(jnp.float32)

    # Host-side weight prep (no activation traffic): fold BN scale into the
    # conv taps, keep the per-channel shift for the in-kernel epilogue, and
    # store every matmul operand as bf16 (MXU input dtype, f32 accumulate).
    conv_ws, shifts = [], []
    for (w, scale, shift) in p["convs"]:
        conv_ws.append((w * scale[None, None, :]).astype(jnp.bfloat16))
        shifts.append(shift.reshape(1, -1).astype(jnp.float32))
    c_widest = max(w.shape[2] for (w, _, _) in p["convs"])

    # Fold PyTorch's channel-major flatten (feature index = c*L_last + l) into
    # fc0's weight layout: (192, 64) -> (L_last=3, C_last=64, 64).
    c_last = p["convs"][-1][0].shape[2]
    l_last = p["fc0_w"].shape[0] // c_last
    w0 = (p["fc0_w"].reshape(c_last, l_last, -1)
          .transpose(1, 0, 2)).astype(jnp.bfloat16)

    head = [w0, p["fc0_b"].reshape(1, -1).astype(jnp.float32),
            p["fc1_w"].astype(jnp.bfloat16),
            p["fc1_b"].reshape(1, -1).astype(jnp.float32),
            p["fc_w"].astype(jnp.bfloat16),
            p["fc_b"].reshape(1, -1).astype(jnp.float32)]
    n_classes = p["fc_w"].shape[1]

    operands = [x_rows, *conv_ws, *shifts, *head]
    in_specs = [pl.BlockSpec(a.shape, _const_index_map(a.ndim)) for a in operands]

    # Whole batch = one grid step: full-array VMEM blocks (total footprint is
    # a few hundred KB, far below any VMEM limit), one fixed pipeline overhead
    # and one batched output store instead of one per batch element.
    # TODO(synk): for large batches, tile the batch over the grid (block
    #   (B_TILE*length, Cin)) and mark that axis CORE_PARALLEL on v7x.
    out = pl.pallas_call(
        _make_kernel(n, l_last, c_last),
        out_shape=jax.ShapeDtypeStruct((n, n_classes), jnp.float32),
        grid_spec=pltpu.PrefetchScalarGridSpec(
            num_scalar_prefetch=0,
            grid=(1,),
            in_specs=in_specs,
            out_specs=pl.BlockSpec((n, n_classes), _const_index_map(2)),
            scratch_shapes=[pltpu.VMEM((n * length, c_widest), jnp.float32)],
        ),
        compiler_params=pltpu.CompilerParams(
            dimension_semantics=("arbitrary",)),
    )(*operands)
    return out


# ----------------------------------------------------------------------------
# Deterministic parameter init (synthetic; no checkpoint load)
# ----------------------------------------------------------------------------
def _fold_bn(gamma, beta, mean, var):
    scale = gamma / jnp.sqrt(var + BN_EPS)
    shift = beta - mean * scale
    return scale, shift


def init_params(key, n_classes):
    conv_cfg = [(3, 6, 16), (3, 16, 32), (3, 32, 32), (3, 32, 64), (5, 64, 64)]
    convs = []
    for (kk, cin, cout) in conv_cfg:
        key, kw, kg, kb, km, kv = jax.random.split(key, 6)
        bound = 1.0 / math.sqrt(cin * kk)
        w = jax.random.uniform(kw, (kk, cin, cout), jnp.float32, -bound, bound)
        gamma = jax.random.uniform(kg, (cout,), jnp.float32, 0.8, 1.2)
        beta = 0.05 * jax.random.normal(kb, (cout,), jnp.float32)
        mean = 0.05 * jax.random.normal(km, (cout,), jnp.float32)
        var = jax.random.uniform(kv, (cout,), jnp.float32, 0.5, 1.5)
        scale, shift = _fold_bn(gamma, beta, mean, var)
        convs.append((w, scale, shift))

    def linear(k, fin, fout):
        kw, kb = jax.random.split(k)
        bound = 1.0 / math.sqrt(fin)
        w = jax.random.uniform(kw, (fin, fout), jnp.float32, -bound, bound)
        b = jax.random.uniform(kb, (fout,), jnp.float32, -bound, bound)
        return w, b

    key, k0, k1, k2 = jax.random.split(key, 4)
    fc0_w, fc0_b = linear(k0, 192, 64)
    fc1_w, fc1_b = linear(k1, 64, 32)
    fc_w, fc_b = linear(k2, 32, n_classes)
    return dict(convs=convs, fc0_w=fc0_w, fc0_b=fc0_b,
                fc1_w=fc1_w, fc1_b=fc1_b, fc_w=fc_w, fc_b=fc_b)


# ----------------------------------------------------------------------------
# Pure-JAX reference with the same bf16 operand rounding as the kernel
# ----------------------------------------------------------------------------
def reference_forward(x_ncl, p):
    y = x_ncl.astype(jnp.float32)
    for (w, scale, shift) in p["convs"]:
        w_fold = (w * scale[None, None, :]).astype(jnp.bfloat16)  # (K, Cin, Cout)
        w_oiw = jnp.transpose(w_fold, (2, 1, 0))                  # (Cout, Cin, K)
        y = lax.conv_general_dilated(
            y.astype(jnp.bfloat16), w_oiw, window_strides=(1,),
            padding=[(PAD, PAD)], dimension_numbers=("NCH", "OIH", "NCH"),
            preferred_element_type=jnp.float32)
        y = jnp.maximum(y + shift[None, :, None], 0.0)
        lc = (y.shape[2] // 2) * 2                                # floor, as F.max_pool1d
        y = y[:, :, :lc].reshape(y.shape[0], y.shape[1], lc // 2, 2).max(axis=-1)
    feat = y.reshape(y.shape[0], -1)                              # channel-major flatten

    def lin(v, w, b):
        return jnp.dot(v.astype(jnp.bfloat16), w.astype(jnp.bfloat16),
                       preferred_element_type=jnp.float32) + b

    h = jnp.maximum(lin(feat, p["fc0_w"], p["fc0_b"]), 0.0)
    h = jnp.maximum(lin(h, p["fc1_w"], p["fc1_b"]), 0.0)          # icarl=False
    return lin(h, p["fc_w"], p["fc_b"])


if __name__ == "__main__":
    n_classes = 10
    key = jax.random.PRNGKey(0)
    key, kx, kp = jax.random.split(key, 3)

    # Input length 128 so that after 5 conv+pool stages the flatten size is
    # 64 channels * 3 positions = 192, matching nn.Linear(192, 64).
    x = jax.random.normal(kx, (2, 6, 128), jnp.float32)  # NCL, like PyTorch
    params = init_params(kp, n_classes)

    out = jax.jit(net_forward)(x, params)
    out = jax.block_until_ready(out)

    ref = reference_forward(x, params)
    assert out.shape == (2, n_classes)
    # Kernel and reference use identical bf16 operand rounding (f32 accumulate),
    # so only summation-order differences remain -> tight tolerance.
    if not jnp.allclose(out, ref, rtol=2e-3, atol=2e-3):
        raise AssertionError(
            "Pallas output mismatch vs reference, max abs diff = "
            f"{float(jnp.max(jnp.abs(out - ref)))}")
    print("KERNEL_OK")
</pallas_src>

<mosaic_0001>
module attributes {stable_mosaic.version = 11 : i64} {
  func.func @kernel(%arg0: i32, %arg1: memref<256x6xf32, #tpu.memory_space<vmem>>, %arg2: memref<3x6x16xbf16, #tpu.memory_space<vmem>>, %arg3: memref<3x16x32xbf16, #tpu.memory_space<vmem>>, %arg4: memref<3x32x32xbf16, #tpu.memory_space<vmem>>, %arg5: memref<3x32x64xbf16, #tpu.memory_space<vmem>>, %arg6: memref<5x64x64xbf16, #tpu.memory_space<vmem>>, %arg7: memref<1x16xf32, #tpu.memory_space<vmem>>, %arg8: memref<1x32xf32, #tpu.memory_space<vmem>>, %arg9: memref<1x32xf32, #tpu.memory_space<vmem>>, %arg10: memref<1x64xf32, #tpu.memory_space<vmem>>, %arg11: memref<1x64xf32, #tpu.memory_space<vmem>>, %arg12: memref<3x64x64xbf16, #tpu.memory_space<vmem>>, %arg13: memref<1x64xf32, #tpu.memory_space<vmem>>, %arg14: memref<64x32xbf16, #tpu.memory_space<vmem>>, %arg15: memref<1x32xf32, #tpu.memory_space<vmem>>, %arg16: memref<32x10xbf16, #tpu.memory_space<vmem>>, %arg17: memref<1x10xf32, #tpu.memory_space<vmem>>, %arg18: memref<2x10xf32, #tpu.memory_space<vmem>>, %arg19: memref<256x64xf32, #tpu.memory_space<vmem>>) attributes {dimension_semantics = [#tpu.dimension_semantics<arbitrary>], iteration_bounds = array<i64: 1>, scalar_prefetch = 0 : i64, scratch_operands = 1 : i64, tpu.core_type = #tpu.core_type<tc>, window_params = [{pipeline_mode = #tpu.pipeline_mode<synchronous>, transform_indices = @transform_0, window_bounds = array<i64: 256, 6>}, {pipeline_mode = #tpu.pipeline_mode<synchronous>, transform_indices = @transform_1, window_bounds = array<i64: 3, 6, 16>}, {pipeline_mode = #tpu.pipeline_mode<synchronous>, transform_indices = @transform_2, window_bounds = array<i64: 3, 16, 32>}, {pipeline_mode = #tpu.pipeline_mode<synchronous>, transform_indices = @transform_3, window_bounds = array<i64: 3, 32, 32>}, {pipeline_mode = #tpu.pipeline_mode<synchronous>, transform_indices = @transform_4, window_bounds = array<i64: 3, 32, 64>}, {pipeline_mode = #tpu.pipeline_mode<synchronous>, transform_indices = @transform_5, window_bounds = array<i64: 5, 64, 64>}, {pipeline_mode = #tpu.pipeline_mode<synchronous>, transform_indices = @transform_6, window_bounds = array<i64: 1, 16>}, {pipeline_mode = #tpu.pipeline_mode<synchronous>, transform_indices = @transform_7, window_bounds = array<i64: 1, 32>}, {pipeline_mode = #tpu.pipeline_mode<synchronous>, transform_indices = @transform_8, window_bounds = array<i64: 1, 32>}, {pipeline_mode = #tpu.pipeline_mode<synchronous>, transform_indices = @transform_9, window_bounds = array<i64: 1, 64>}, {pipeline_mode = #tpu.pipeline_mode<synchronous>, transform_indices = @transform_10, window_bounds = array<i64: 1, 64>}, {pipeline_mode = #tpu.pipeline_mode<synchronous>, transform_indices = @transform_11, window_bounds = array<i64: 3, 64, 64>}, {pipeline_mode = #tpu.pipeline_mode<synchronous>, transform_indices = @transform_12, window_bounds = array<i64: 1, 64>}, {pipeline_mode = #tpu.pipeline_mode<synchronous>, transform_indices = @transform_13, window_bounds = array<i64: 64, 32>}, {pipeline_mode = #tpu.pipeline_mode<synchronous>, transform_indices = @transform_14, window_bounds = array<i64: 1, 32>}, {pipeline_mode = #tpu.pipeline_mode<synchronous>, transform_indices = @transform_15, window_bounds = array<i64: 32, 10>}, {pipeline_mode = #tpu.pipeline_mode<synchronous>, transform_indices = @transform_16, window_bounds = array<i64: 1, 10>}, {pipeline_mode = #tpu.pipeline_mode<synchronous>, transform_indices = @transform_17, window_bounds = array<i64: 2, 10>}]} {
    %c0 = arith.constant 0 : index
    %c0_0 = arith.constant 0 : index
    %0 = vector.load %arg1[%c0, %c0_0] : memref<256x6xf32, #tpu.memory_space<vmem>>, vector<256x6xf32>
    %1 = tpu.iota {dimensions = array<i32: 0>} : vector<256x1xi32>
    %c127_i32 = arith.constant 127 : i32
    %2 = vector.broadcast %c127_i32 : i32 to vector<256x1xi32>
    %3 = arith.andi %1, %2 : vector<256x1xi32>
    %c1_i32 = arith.constant 1 : i32
    %4 = tpu.dynamic_rotate %0 by %c1_i32 dim 0 : vector<256x6xf32>, i32 -> vector<256x6xf32>
    %c-1_i32 = arith.constant -1 : i32
    %5 = vector.broadcast %c-1_i32 : i32 to vector<256x1xi32>
    %6 = arith.addi %3, %5 : vector<256x1xi32>
    %c0_i32 = arith.constant 0 : i32
    %7 = vector.broadcast %c0_i32 : i32 to vector<256x1xi32>
    %8 = arith.cmpi sge, %6, %7 : vector<256x1xi32>
    %c-1_i32_1 = arith.constant -1 : i32
    %9 = vector.broadcast %c-1_i32_1 : i32 to vector<256x1xi32>
    %10 = arith.addi %3, %9 : vector<256x1xi32>
    %c128_i32 = arith.constant 128 : i32
    %11 = vector.broadcast %c128_i32 : i32 to vector<256x1xi32>
    %12 = arith.cmpi slt, %10, %11 : vector<256x1xi32>
    %13 = arith.andi %8, %12 : vector<256x1xi1>
    %cst = arith.constant 0.000000e+00 : f32
    %14 = vector.shape_cast %13 : vector<256x1xi1> to vector<256x1xi1>
    %15 = vector.broadcast %14 : vector<256x1xi1> to vector<256x6xi1>
    %16 = vector.broadcast %cst : f32 to vector<256x6xf32>
    %17 = arith.select %15, %4, %16 : vector<256x6xi1>, vector<256x6xf32>
    %18 = arith.truncf %17 : vector<256x6xf32> to vector<256x6xbf16>
    %c0_2 = arith.constant 0 : index
    %c0_3 = arith.constant 0 : index
    %c0_4 = arith.constant 0 : index
    %19 = vector.load %arg2[%c0_2, %c0_3, %c0_4] : memref<3x6x16xbf16, #tpu.memory_space<vmem>>, vector<1x6x16xbf16>
    %20 = vector.shape_cast %19 : vector<1x6x16xbf16> to vector<6x16xbf16>
    %cst_5 = arith.constant dense<0.000000e+00> : vector<256x16xf32>
    %21 = tpu.matmul %18, %20, %cst_5 {dimension_numbers = #tpu.dot_dimension_numbers<[1], [0], [0], [1], [0, 0, 1, 1], [], []>} : vector<256x6xbf16>, vector<6x16xbf16>, vector<256x16xf32> -> vector<256x16xf32>
    %22 = arith.truncf %0 : vector<256x6xf32> to vector<256x6xbf16>
    %c1 = arith.constant 1 : index
    %c0_6 = arith.constant 0 : index
    %c0_7 = arith.constant 0 : index
    %23 = vector.load %arg2[%c1, %c0_6, %c0_7] : memref<3x6x16xbf16, #tpu.memory_space<vmem>>, vector<1x6x16xbf16>
    %24 = vector.shape_cast %23 : vector<1x6x16xbf16> to vector<6x16xbf16>
    %cst_8 = arith.constant dense<0.000000e+00> : vector<256x16xf32>
    %25 = tpu.matmul %22, %24, %cst_8 {dimension_numbers = #tpu.dot_dimension_numbers<[1], [0], [0], [1], [0, 0, 1, 1], [], []>} : vector<256x6xbf16>, vector<6x16xbf16>, vector<256x16xf32> -> vector<256x16xf32>
    %26 = arith.addf %21, %25 : vector<256x16xf32>
    %c255_i32 = arith.constant 255 : i32
    %27 = tpu.dynamic_rotate %0 by %c255_i32 dim 0 : vector<256x6xf32>, i32 -> vector<256x6xf32>
    %c1_i32_9 = arith.constant 1 : i32
    %28 = vector.broadcast %c1_i32_9 : i32 to vector<256x1xi32>
    %29 = arith.addi %3, %28 : vector<256x1xi32>
    %c0_i32_10 = arith.constant 0 : i32
    %30 = vector.broadcast %c0_i32_10 : i32 to vector<256x1xi32>
    %31 = arith.cmpi sge, %29, %30 : vector<256x1xi32>
    %c1_i32_11 = arith.constant 1 : i32
    %32 = vector.broadcast %c1_i32_11 : i32 to vector<256x1xi32>
    %33 = arith.addi %3, %32 : vector<256x1xi32>
    %c128_i32_12 = arith.constant 128 : i32
    %34 = vector.broadcast %c128_i32_12 : i32 to vector<256x1xi32>
    %35 = arith.cmpi slt, %33, %34 : vector<256x1xi32>
    %36 = arith.andi %31, %35 : vector<256x1xi1>
    %cst_13 = arith.constant 0.000000e+00 : f32
    %37 = vector.shape_cast %36 : vector<256x1xi1> to vector<256x1xi1>
    %38 = vector.broadcast %37 : vector<256x1xi1> to vector<256x6xi1>
    %39 = vector.broadcast %cst_13 : f32 to vector<256x6xf32>
    %40 = arith.select %38, %27, %39 : vector<256x6xi1>, vector<256x6xf32>
    %41 = arith.truncf %40 : vector<256x6xf32> to vector<256x6xbf16>
    %c2 = arith.constant 2 : index
    %c0_14 = arith.constant 0 : index
    %c0_15 = arith.constant 0 : index
    %42 = vector.load %arg2[%c2, %c0_14, %c0_15] : memref<3x6x16xbf16, #tpu.memory_space<vmem>>, vector<1x6x16xbf16>
    %43 = vector.shape_cast %42 : vector<1x6x16xbf16> to vector<6x16xbf16>
    %cst_16 = arith.constant dense<0.000000e+00> : vector<256x16xf32>
    %44 = tpu.matmul %41, %43, %cst_16 {dimension_numbers = #tpu.dot_dimension_numbers<[1], [0], [0], [1], [0, 0, 1, 1], [], []>} : vector<256x6xbf16>, vector<6x16xbf16>, vector<256x16xf32> -> vector<256x16xf32>
    %45 = arith.addf %26, %44 : vector<256x16xf32>
    %c0_17 = arith.constant 0 : index
    %c0_18 = arith.constant 0 : index
    %46 = vector.load %arg7[%c0_17, %c0_18] : memref<1x16xf32, #tpu.memory_space<vmem>>, vector<1x16xf32>
    %47 = vector.broadcast %46 : vector<1x16xf32> to vector<256x16xf32>
    %48 = arith.addf %45, %47 : vector<256x16xf32>
    %cst_19 = arith.constant 0.000000e+00 : f32
    %49 = vector.broadcast %cst_19 : f32 to vector<256x16xf32>
    %50 = arith.maximumf %48, %49 : vector<256x16xf32>
    %c255_i32_20 = arith.constant 255 : i32
    %51 = tpu.dynamic_rotate %50 by %c255_i32_20 dim 0 : vector<256x16xf32>, i32 -> vector<256x16xf32>
    %52 = arith.maximumf %50, %51 : vector<256x16xf32>
    %c0_21 = arith.constant 0 : index
    %c0_22 = arith.constant 0 : index
    %53 = vector.load %arg19[%c0_21, %c0_22] : memref<256x64xf32, #tpu.memory_space<vmem>>, vector<256x16xf32>
    tpu.vector_store %arg19[%c0_21, %c0_22], %52 {strides = array<i32>} : memref<256x64xf32, #tpu.memory_space<vmem>>, vector<256x16xf32>,
    %c0_23 = arith.constant 0 : index
    %c0_24 = arith.constant 0 : index
    %54 = tpu.strided_load %arg19[%c0_23, %c0_24] {strides = array<i32: 2, 1>} : memref<256x64xf32, #tpu.memory_space<vmem>>, vector<128x16xf32>
    %55 = tpu.iota {dimensions = array<i32: 0>} : vector<128x1xi32>
    %c63_i32 = arith.constant 63 : i32
    %56 = vector.broadcast %c63_i32 : i32 to vector<128x1xi32>
    %57 = arith.andi %55, %56 : vector<128x1xi32>
    %c1_i32_25 = arith.constant 1 : i32
    %58 = tpu.dynamic_rotate %54 by %c1_i32_25 dim 0 : vector<128x16xf32>, i32 -> vector<128x16xf32>
    %c-1_i32_26 = arith.constant -1 : i32
    %59 = vector.broadcast %c-1_i32_26 : i32 to vector<128x1xi32>
    %60 = arith.addi %57, %59 : vector<128x1xi32>
    %c0_i32_27 = arith.constant 0 : i32
    %61 = vector.broadcast %c0_i32_27 : i32 to vector<128x1xi32>
    %62 = arith.cmpi sge, %60, %61 : vector<128x1xi32>
    %c-1_i32_28 = arith.constant -1 : i32
    %63 = vector.broadcast %c-1_i32_28 : i32 to vector<128x1xi32>
    %64 = arith.addi %57, %63 : vector<128x1xi32>
    %c64_i32 = arith.constant 64 : i32
    %65 = vector.broadcast %c64_i32 : i32 to vector<128x1xi32>
    %66 = arith.cmpi slt, %64, %65 : vector<128x1xi32>
    %67 = arith.andi %62, %66 : vector<128x1xi1>
    %cst_29 = arith.constant 0.000000e+00 : f32
    %68 = vector.shape_cast %67 : vector<128x1xi1> to vector<128x1xi1>
    %69 = vector.broadcast %68 : vector<128x1xi1> to vector<128x16xi1>
    %70 = vector.broadcast %cst_29 : f32 to vector<128x16xf32>
    %71 = arith.select %69, %58, %70 : vector<128x16xi1>, vector<128x16xf32>
    %72 = arith.truncf %71 : vector<128x16xf32> to vector<128x16xbf16>
    %c0_30 = arith.constant 0 : index
    %c0_31 = arith.constant 0 : index
    %c0_32 = arith.constant 0 : index
    %73 = vector.load %arg3[%c0_30, %c0_31, %c0_32] : memref<3x16x32xbf16, #tpu.memory_space<vmem>>, vector<1x16x32xbf16>
    %74 = vector.shape_cast %73 : vector<1x16x32xbf16> to vector<16x32xbf16>
    %cst_33 = arith.constant dense<0.000000e+00> : vector<128x32xf32>
    %75 = tpu.matmul %72, %74, %cst_33 {dimension_numbers = #tpu.dot_dimension_numbers<[1], [0], [0], [1], [0, 0, 1, 1], [], []>} : vector<128x16xbf16>, vector<16x32xbf16>, vector<128x32xf32> -> vector<128x32xf32>
    %76 = arith.truncf %54 : vector<128x16xf32> to vector<128x16xbf16>
    %c1_34 = arith.constant 1 : index
    %c0_35 = arith.constant 0 : index
    %c0_36 = arith.constant 0 : index
    %77 = vector.load %arg3[%c1_34, %c0_35, %c0_36] : memref<3x16x32xbf16, #tpu.memory_space<vmem>>, vector<1x16x32xbf16>
    %78 = vector.shape_cast %77 : vector<1x16x32xbf16> to vector<16x32xbf16>
    %cst_37 = arith.constant dense<0.000000e+00> : vector<128x32xf32>
    %79 = tpu.matmul %76, %78, %cst_37 {dimension_numbers = #tpu.dot_dimension_numbers<[1], [0], [0], [1], [0, 0, 1, 1], [], []>} : vector<128x16xbf16>, vector<16x32xbf16>, vector<128x32xf32> -> vector<128x32xf32>
    %80 = arith.addf %75, %79 : vector<128x32xf32>
    %c127_i32_38 = arith.constant 127 : i32
    %81 = tpu.dynamic_rotate %54 by %c127_i32_38 dim 0 : vector<128x16xf32>, i32 -> vector<128x16xf32>
    %c1_i32_39 = arith.constant 1 : i32
    %82 = vector.broadcast %c1_i32_39 : i32 to vector<128x1xi32>
    %83 = arith.addi %57, %82 : vector<128x1xi32>
    %c0_i32_40 = arith.constant 0 : i32
    %84 = vector.broadcast %c0_i32_40 : i32 to vector<128x1xi32>
    %85 = arith.cmpi sge, %83, %84 : vector<128x1xi32>
    %c1_i32_41 = arith.constant 1 : i32
    %86 = vector.broadcast %c1_i32_41 : i32 to vector<128x1xi32>
    %87 = arith.addi %57, %86 : vector<128x1xi32>
    %c64_i32_42 = arith.constant 64 : i32
    %88 = vector.broadcast %c64_i32_42 : i32 to vector<128x1xi32>
    %89 = arith.cmpi slt, %87, %88 : vector<128x1xi32>
    %90 = arith.andi %85, %89 : vector<128x1xi1>
    %cst_43 = arith.constant 0.000000e+00 : f32
    %91 = vector.shape_cast %90 : vector<128x1xi1> to vector<128x1xi1>
    %92 = vector.broadcast %91 : vector<128x1xi1> to vector<128x16xi1>
    %93 = vector.broadcast %cst_43 : f32 to vector<128x16xf32>
    %94 = arith.select %92, %81, %93 : vector<128x16xi1>, vector<128x16xf32>
    %95 = arith.truncf %94 : vector<128x16xf32> to vector<128x16xbf16>
    %c2_44 = arith.constant 2 : index
    %c0_45 = arith.constant 0 : index
    %c0_46 = arith.constant 0 : index
    %96 = vector.load %arg3[%c2_44, %c0_45, %c0_46] : memref<3x16x32xbf16, #tpu.memory_space<vmem>>, vector<1x16x32xbf16>
    %97 = vector.shape_cast %96 : vector<1x16x32xbf16> to vector<16x32xbf16>
    %cst_47 = arith.constant dense<0.000000e+00> : vector<128x32xf32>
    %98 = tpu.matmul %95, %97, %cst_47 {dimension_numbers = #tpu.dot_dimension_numbers<[1], [0], [0], [1], [0, 0, 1, 1], [], []>} : vector<128x16xbf16>, vector<16x32xbf16>, vector<128x32xf32> -> vector<128x32xf32>
    %99 = arith.addf %80, %98 : vector<128x32xf32>
    %c0_48 = arith.constant 0 : index
    %c0_49 = arith.constant 0 : index
    %100 = vector.load %arg8[%c0_48, %c0_49] : memref<1x32xf32, #tpu.memory_space<vmem>>, vector<1x32xf32>
    %101 = vector.broadcast %100 : vector<1x32xf32> to vector<128x32xf32>
    %102 = arith.addf %99, %101 : vector<128x32xf32>
    %cst_50 = arith.constant 0.000000e+00 : f32
    %103 = vector.broadcast %cst_50 : f32 to vector<128x32xf32>
    %104 = arith.maximumf %102, %103 : vector<128x32xf32>
    %c127_i32_51 = arith.constant 127 : i32
    %105 = tpu.dynamic_rotate %104 by %c127_i32_51 dim 0 : vector<128x32xf32>, i32 -> vector<128x32xf32>
    %106 = arith.maximumf %104, %105 : vector<128x32xf32>
    %c0_52 = arith.constant 0 : index
    %c0_53 = arith.constant 0 : index
    %107 = vector.load %arg19[%c0_52, %c0_53] : memref<256x64xf32, #tpu.memory_space<vmem>>, vector<128x32xf32>
    tpu.vector_store %arg19[%c0_52, %c0_53], %106 {strides = array<i32>} : memref<256x64xf32, #tpu.memory_space<vmem>>, vector<128x32xf32>,
    %c0_54 = arith.constant 0 : index
    %c0_55 = arith.constant 0 : index
    %108 = tpu.strided_load %arg19[%c0_54, %c0_55] {strides = array<i32: 2, 1>} : memref<256x64xf32, #tpu.memory_space<vmem>>, vector<64x32xf32>
    %109 = tpu.iota {dimensions = array<i32: 0>} : vector<64x1xi32>
    %c31_i32 = arith.constant 31 : i32
    %110 = vector.broadcast %c31_i32 : i32 to vector<64x1xi32>
    %111 = arith.andi %109, %110 : vector<64x1xi32>
    %c1_i32_56 = arith.constant 1 : i32
    %112 = tpu.dynamic_rotate %108 by %c1_i32_56 dim 0 : vector<64x32xf32>, i32 -> vector<64x32xf32>
    %c-1_i32_57 = arith.constant -1 : i32
    %113 = vector.broadcast %c-1_i32_57 : i32 to vector<64x1xi32>
    %114 = arith.addi %111, %113 : vector<64x1xi32>
    %c0_i32_58 = arith.constant 0 : i32
    %115 = vector.broadcast %c0_i32_58 : i32 to vector<64x1xi32>
    %116 = arith.cmpi sge, %114, %115 : vector<64x1xi32>
    %c-1_i32_59 = arith.constant -1 : i32
    %117 = vector.broadcast %c-1_i32_59 : i32 to vector<64x1xi32>
    %118 = arith.addi %111, %117 : vector<64x1xi32>
    %c32_i32 = arith.constant 32 : i32
    %119 = vector.broadcast %c32_i32 : i32 to vector<64x1xi32>
    %120 = arith.cmpi slt, %118, %119 : vector<64x1xi32>
    %121 = arith.andi %116, %120 : vector<64x1xi1>
    %cst_60 = arith.constant 0.000000e+00 : f32
    %122 = vector.shape_cast %121 : vector<64x1xi1> to vector<64x1xi1>
    %123 = vector.broadcast %122 : vector<64x1xi1> to vector<64x32xi1>
    %124 = vector.broadcast %cst_60 : f32 to vector<64x32xf32>
    %125 = arith.select %123, %112, %124 : vector<64x32xi1>, vector<64x32xf32>
    %126 = arith.truncf %125 : vector<64x32xf32> to vector<64x32xbf16>
    %c0_61 = arith.constant 0 : index
    %c0_62 = arith.constant 0 : index
    %c0_63 = arith.constant 0 : index
    %127 = vector.load %arg4[%c0_61, %c0_62, %c0_63] : memref<3x32x32xbf16, #tpu.memory_space<vmem>>, vector<1x32x32xbf16>
    %128 = vector.shape_cast %127 : vector<1x32x32xbf16> to vector<32x32xbf16>
    %cst_64 = arith.constant dense<0.000000e+00> : vector<64x32xf32>
    %129 = tpu.matmul %126, %128, %cst_64 {dimension_numbers = #tpu.dot_dimension_numbers<[1], [0], [0], [1], [0, 0, 1, 1], [], []>} : vector<64x32xbf16>, vector<32x32xbf16>, vector<64x32xf32> -> vector<64x32xf32>
    %130 = arith.truncf %108 : vector<64x32xf32> to vector<64x32xbf16>
    %c1_65 = arith.constant 1 : index
    %c0_66 = arith.constant 0 : index
    %c0_67 = arith.constant 0 : index
    %131 = vector.load %arg4[%c1_65, %c0_66, %c0_67] : memref<3x32x32xbf16, #tpu.memory_space<vmem>>, vector<1x32x32xbf16>
    %132 = vector.shape_cast %131 : vector<1x32x32xbf16> to vector<32x32xbf16>
    %cst_68 = arith.constant dense<0.000000e+00> : vector<64x32xf32>
    %133 = tpu.matmul %130, %132, %cst_68 {dimension_numbers = #tpu.dot_dimension_numbers<[1], [0], [0], [1], [0, 0, 1, 1], [], []>} : vector<64x32xbf16>, vector<32x32xbf16>, vector<64x32xf32> -> vector<64x32xf32>
    %134 = arith.addf %129, %133 : vector<64x32xf32>
    %c63_i32_69 = arith.constant 63 : i32
    %135 = tpu.dynamic_rotate %108 by %c63_i32_69 dim 0 : vector<64x32xf32>, i32 -> vector<64x32xf32>
    %c1_i32_70 = arith.constant 1 : i32
    %136 = vector.broadcast %c1_i32_70 : i32 to vector<64x1xi32>
    %137 = arith.addi %111, %136 : vector<64x1xi32>
    %c0_i32_71 = arith.constant 0 : i32
    %138 = vector.broadcast %c0_i32_71 : i32 to vector<64x1xi32>
    %139 = arith.cmpi sge, %137, %138 : vector<64x1xi32>
    %c1_i32_72 = arith.constant 1 : i32
    %140 = vector.broadcast %c1_i32_72 : i32 to vector<64x1xi32>
    %141 = arith.addi %111, %140 : vector<64x1xi32>
    %c32_i32_73 = arith.constant 32 : i32
    %142 = vector.broadcast %c32_i32_73 : i32 to vector<64x1xi32>
    %143 = arith.cmpi slt, %141, %142 : vector<64x1xi32>
    %144 = arith.andi %139, %143 : vector<64x1xi1>
    %cst_74 = arith.constant 0.000000e+00 : f32
    %145 = vector.shape_cast %144 : vector<64x1xi1> to vector<64x1xi1>
    %146 = vector.broadcast %145 : vector<64x1xi1> to vector<64x32xi1>
    %147 = vector.broadcast %cst_74 : f32 to vector<64x32xf32>
    %148 = arith.select %146, %135, %147 : vector<64x32xi1>, vector<64x32xf32>
    %149 = arith.truncf %148 : vector<64x32xf32> to vector<64x32xbf16>
    %c2_75 = arith.constant 2 : index
    %c0_76 = arith.constant 0 : index
    %c0_77 = arith.constant 0 : index
    %150 = vector.load %arg4[%c2_75, %c0_76, %c0_77] : memref<3x32x32xbf16, #tpu.memory_space<vmem>>, vector<1x32x32xbf16>
    %151 = vector.shape_cast %150 : vector<1x32x32xbf16> to vector<32x32xbf16>
    %cst_78 = arith.constant dense<0.000000e+00> : vector<64x32xf32>
    %152 = tpu.matmul %149, %151, %cst_78 {dimension_numbers = #tpu.dot_dimension_numbers<[1], [0], [0], [1], [0, 0, 1, 1], [], []>} : vector<64x32xbf16>, vector<32x32xbf16>, vector<64x32xf32> -> vector<64x32xf32>
    %153 = arith.addf %134, %152 : vector<64x32xf32>
    %c0_79 = arith.constant 0 : index
    %c0_80 = arith.constant 0 : index
    %154 = vector.load %arg9[%c0_79, %c0_80] : memref<1x32xf32, #tpu.memory_space<vmem>>, vector<1x32xf32>
    %155 = vector.broadcast %154 : vector<1x32xf32> to vector<64x32xf32>
    %156 = arith.addf %153, %155 : vector<64x32xf32>
    %cst_81 = arith.constant 0.000000e+00 : f32
    %157 = vector.broadcast %cst_81 : f32 to vector<64x32xf32>
    %158 = arith.maximumf %156, %157 : vector<64x32xf32>
    %c63_i32_82 = arith.constant 63 : i32
    %159 = tpu.dynamic_rotate %158 by %c63_i32_82 dim 0 : vector<64x32xf32>, i32 -> vector<64x32xf32>
    %160 = arith.maximumf %158, %159 : vector<64x32xf32>
    %c0_83 = arith.constant 0 : index
    %c0_84 = arith.constant 0 : index
    %161 = vector.load %arg19[%c0_83, %c0_84] : memref<256x64xf32, #tpu.memory_space<vmem>>, vector<64x32xf32>
    tpu.vector_store %arg19[%c0_83, %c0_84], %160 {strides = array<i32>} : memref<256x64xf32, #tpu.memory_space<vmem>>, vector<64x32xf32>,
    %c0_85 = arith.constant 0 : index
    %c0_86 = arith.constant 0 : index
    %162 = tpu.strided_load %arg19[%c0_85, %c0_86] {strides = array<i32: 2, 1>} : memref<256x64xf32, #tpu.memory_space<vmem>>, vector<32x32xf32>
    %163 = tpu.iota {dimensions = array<i32: 0>} : vector<32x1xi32>
    %c15_i32 = arith.constant 15 : i32
    %164 = vector.broadcast %c15_i32 : i32 to vector<32x1xi32>
    %165 = arith.andi %163, %164 : vector<32x1xi32>
    %c1_i32_87 = arith.constant 1 : i32
    %166 = tpu.dynamic_rotate %162 by %c1_i32_87 dim 0 : vector<32x32xf32>, i32 -> vector<32x32xf32>
    %c-1_i32_88 = arith.constant -1 : i32
    %167 = vector.broadcast %c-1_i32_88 : i32 to vector<32x1xi32>
    %168 = arith.addi %165, %167 : vector<32x1xi32>
    %c0_i32_89 = arith.constant 0 : i32
    %169 = vector.broadcast %c0_i32_89 : i32 to vector<32x1xi32>
    %170 = arith.cmpi sge, %168, %169 : vector<32x1xi32>
    %c-1_i32_90 = arith.constant -1 : i32
    %171 = vector.broadcast %c-1_i32_90 : i32 to vector<32x1xi32>
    %172 = arith.addi %165, %171 : vector<32x1xi32>
    %c16_i32 = arith.constant 16 : i32
    %173 = vector.broadcast %c16_i32 : i32 to vector<32x1xi32>
    %174 = arith.cmpi slt, %172, %173 : vector<32x1xi32>
    %175 = arith.andi %170, %174 : vector<32x1xi1>
    %cst_91 = arith.constant 0.000000e+00 : f32
    %176 = vector.shape_cast %175 : vector<32x1xi1> to vector<32x1xi1>
    %177 = vector.broadcast %176 : vector<32x1xi1> to vector<32x32xi1>
    %178 = vector.broadcast %cst_91 : f32 to vector<32x32xf32>
    %179 = arith.select %177, %166, %178 : vector<32x32xi1>, vector<32x32xf32>
    %180 = arith.truncf %179 : vector<32x32xf32> to vector<32x32xbf16>
    %c0_92 = arith.constant 0 : index
    %c0_93 = arith.constant 0 : index
    %c0_94 = arith.constant 0 : index
    %181 = vector.load %arg5[%c0_92, %c0_93, %c0_94] : memref<3x32x64xbf16, #tpu.memory_space<vmem>>, vector<1x32x64xbf16>
    %182 = vector.shape_cast %181 : vector<1x32x64xbf16> to vector<32x64xbf16>
    %cst_95 = arith.constant dense<0.000000e+00> : vector<32x64xf32>
    %183 = tpu.matmul %180, %182, %cst_95 {dimension_numbers = #tpu.dot_dimension_numbers<[1], [0], [0], [1], [0, 0, 1, 1], [], []>} : vector<32x32xbf16>, vector<32x64xbf16>, vector<32x64xf32> -> vector<32x64xf32>
    %184 = arith.truncf %162 : vector<32x32xf32> to vector<32x32xbf16>
    %c1_96 = arith.constant 1 : index
    %c0_97 = arith.constant 0 : index
    %c0_98 = arith.constant 0 : index
    %185 = vector.load %arg5[%c1_96, %c0_97, %c0_98] : memref<3x32x64xbf16, #tpu.memory_space<vmem>>, vector<1x32x64xbf16>
    %186 = vector.shape_cast %185 : vector<1x32x64xbf16> to vector<32x64xbf16>
    %cst_99 = arith.constant dense<0.000000e+00> : vector<32x64xf32>
    %187 = tpu.matmul %184, %186, %cst_99 {dimension_numbers = #tpu.dot_dimension_numbers<[1], [0], [0], [1], [0, 0, 1, 1], [], []>} : vector<32x32xbf16>, vector<32x64xbf16>, vector<32x64xf32> -> vector<32x64xf32>
    %188 = arith.addf %183, %187 : vector<32x64xf32>
    %c31_i32_100 = arith.constant 31 : i32
    %189 = tpu.dynamic_rotate %162 by %c31_i32_100 dim 0 : vector<32x32xf32>, i32 -> vector<32x32xf32>
    %c1_i32_101 = arith.constant 1 : i32
    %190 = vector.broadcast %c1_i32_101 : i32 to vector<32x1xi32>
    %191 = arith.addi %165, %190 : vector<32x1xi32>
    %c0_i32_102 = arith.constant 0 : i32
    %192 = vector.broadcast %c0_i32_102 : i32 to vector<32x1xi32>
    %193 = arith.cmpi sge, %191, %192 : vector<32x1xi32>
    %c1_i32_103 = arith.constant 1 : i32
    %194 = vector.broadcast %c1_i32_103 : i32 to vector<32x1xi32>
    %195 = arith.addi %165, %194 : vector<32x1xi32>
    %c16_i32_104 = arith.constant 16 : i32
    %196 = vector.broadcast %c16_i32_104 : i32 to vector<32x1xi32>
    %197 = arith.cmpi slt, %195, %196 : vector<32x1xi32>
    %198 = arith.andi %193, %197 : vector<32x1xi1>
    %cst_105 = arith.constant 0.000000e+00 : f32
    %199 = vector.shape_cast %198 : vector<32x1xi1> to vector<32x1xi1>
    %200 = vector.broadcast %199 : vector<32x1xi1> to vector<32x32xi1>
    %201 = vector.broadcast %cst_105 : f32 to vector<32x32xf32>
    %202 = arith.select %200, %189, %201 : vector<32x32xi1>, vector<32x32xf32>
    %203 = arith.truncf %202 : vector<32x32xf32> to vector<32x32xbf16>
    %c2_106 = arith.constant 2 : index
    %c0_107 = arith.constant 0 : index
    %c0_108 = arith.constant 0 : index
    %204 = vector.load %arg5[%c2_106, %c0_107, %c0_108] : memref<3x32x64xbf16, #tpu.memory_space<vmem>>, vector<1x32x64xbf16>
    %205 = vector.shape_cast %204 : vector<1x32x64xbf16> to vector<32x64xbf16>
    %cst_109 = arith.constant dense<0.000000e+00> : vector<32x64xf32>
    %206 = tpu.matmul %203, %205, %cst_109 {dimension_numbers = #tpu.dot_dimension_numbers<[1], [0], [0], [1], [0, 0, 1, 1], [], []>} : vector<32x32xbf16>, vector<32x64xbf16>, vector<32x64xf32> -> vector<32x64xf32>
    %207 = arith.addf %188, %206 : vector<32x64xf32>
    %c0_110 = arith.constant 0 : index
    %c0_111 = arith.constant 0 : index
    %208 = vector.load %arg10[%c0_110, %c0_111] : memref<1x64xf32, #tpu.memory_space<vmem>>, vector<1x64xf32>
    %209 = vector.broadcast %208 : vector<1x64xf32> to vector<32x64xf32>
    %210 = arith.addf %207, %209 : vector<32x64xf32>
    %cst_112 = arith.constant 0.000000e+00 : f32
    %211 = vector.broadcast %cst_112 : f32 to vector<32x64xf32>
    %212 = arith.maximumf %210, %211 : vector<32x64xf32>
    %c31_i32_113 = arith.constant 31 : i32
    %213 = tpu.dynamic_rotate %212 by %c31_i32_113 dim 0 : vector<32x64xf32>, i32 -> vector<32x64xf32>
    %214 = arith.maximumf %212, %213 : vector<32x64xf32>
    %c0_114 = arith.constant 0 : index
    %c0_115 = arith.constant 0 : index
    %215 = vector.load %arg19[%c0_114, %c0_115] : memref<256x64xf32, #tpu.memory_space<vmem>>, vector<32x64xf32>
    tpu.vector_store %arg19[%c0_114, %c0_115], %214 {strides = array<i32>} : memref<256x64xf32, #tpu.memory_space<vmem>>, vector<32x64xf32>,
    %c0_116 = arith.constant 0 : index
    %c0_117 = arith.constant 0 : index
    %216 = tpu.strided_load %arg19[%c0_116, %c0_117] {strides = array<i32: 2, 1>} : memref<256x64xf32, #tpu.memory_space<vmem>>, vector<16x64xf32>
    %217 = tpu.iota {dimensions = array<i32: 0>} : vector<16x1xi32>
    %c7_i32 = arith.constant 7 : i32
    %218 = vector.broadcast %c7_i32 : i32 to vector<16x1xi32>
    %219 = arith.andi %217, %218 : vector<16x1xi32>
    %c1_i32_118 = arith.constant 1 : i32
    %220 = tpu.dynamic_rotate %216 by %c1_i32_118 dim 0 : vector<16x64xf32>, i32 -> vector<16x64xf32>
    %c-1_i32_119 = arith.constant -1 : i32
    %221 = vector.broadcast %c-1_i32_119 : i32 to vector<16x1xi32>
    %222 = arith.addi %219, %221 : vector<16x1xi32>
    %c0_i32_120 = arith.constant 0 : i32
    %223 = vector.broadcast %c0_i32_120 : i32 to vector<16x1xi32>
    %224 = arith.cmpi sge, %222, %223 : vector<16x1xi32>
    %c-1_i32_121 = arith.constant -1 : i32
    %225 = vector.broadcast %c-1_i32_121 : i32 to vector<16x1xi32>
    %226 = arith.addi %219, %225 : vector<16x1xi32>
    %c8_i32 = arith.constant 8 : i32
    %227 = vector.broadcast %c8_i32 : i32 to vector<16x1xi32>
    %228 = arith.cmpi slt, %226, %227 : vector<16x1xi32>
    %229 = arith.andi %224, %228 : vector<16x1xi1>
    %cst_122 = arith.constant 0.000000e+00 : f32
    %230 = vector.shape_cast %229 : vector<16x1xi1> to vector<16x1xi1>
    %231 = vector.broadcast %230 : vector<16x1xi1> to vector<16x64xi1>
    %232 = vector.broadcast %cst_122 : f32 to vector<16x64xf32>
    %233 = arith.select %231, %220, %232 : vector<16x64xi1>, vector<16x64xf32>
    %234 = arith.truncf %233 : vector<16x64xf32> to vector<16x64xbf16>
    %c0_123 = arith.constant 0 : index
    %c0_124 = arith.constant 0 : index
    %c0_125 = arith.constant 0 : index
    %235 = vector.load %arg6[%c0_123, %c0_124, %c0_125] : memref<5x64x64xbf16, #tpu.memory_space<vmem>>, vector<1x64x64xbf16>
    %236 = vector.shape_cast %235 : vector<1x64x64xbf16> to vector<64x64xbf16>
    %cst_126 = arith.constant dense<0.000000e+00> : vector<16x64xf32>
    %237 = tpu.matmul %234, %236, %cst_126 {dimension_numbers = #tpu.dot_dimension_numbers<[1], [0], [0], [1], [0, 0, 1, 1], [], []>} : vector<16x64xbf16>, vector<64x64xbf16>, vector<16x64xf32> -> vector<16x64xf32>
    %238 = arith.truncf %216 : vector<16x64xf32> to vector<16x64xbf16>
    %c1_127 = arith.constant 1 : index
    %c0_128 = arith.constant 0 : index
    %c0_129 = arith.constant 0 : index
    %239 = vector.load %arg6[%c1_127, %c0_128, %c0_129] : memref<5x64x64xbf16, #tpu.memory_space<vmem>>, vector<1x64x64xbf16>
    %240 = vector.shape_cast %239 : vector<1x64x64xbf16> to vector<64x64xbf16>
    %cst_130 = arith.constant dense<0.000000e+00> : vector<16x64xf32>
    %241 = tpu.matmul %238, %240, %cst_130 {dimension_numbers = #tpu.dot_dimension_numbers<[1], [0], [0], [1], [0, 0, 1, 1], [], []>} : vector<16x64xbf16>, vector<64x64xbf16>, vector<16x64xf32> -> vector<16x64xf32>
    %242 = arith.addf %237, %241 : vector<16x64xf32>
    %c15_i32_131 = arith.constant 15 : i32
    %243 = tpu.dynamic_rotate %216 by %c15_i32_131 dim 0 : vector<16x64xf32>, i32 -> vector<16x64xf32>
    %c1_i32_132 = arith.constant 1 : i32
    %244 = vector.broadcast %c1_i32_132 : i32 to vector<16x1xi32>
    %245 = arith.addi %219, %244 : vector<16x1xi32>
    %c0_i32_133 = arith.constant 0 : i32
    %246 = vector.broadcast %c0_i32_133 : i32 to vector<16x1xi32>
    %247 = arith.cmpi sge, %245, %246 : vector<16x1xi32>
    %c1_i32_134 = arith.constant 1 : i32
    %248 = vector.broadcast %c1_i32_134 : i32 to vector<16x1xi32>
    %249 = arith.addi %219, %248 : vector<16x1xi32>
    %c8_i32_135 = arith.constant 8 : i32
    %250 = vector.broadcast %c8_i32_135 : i32 to vector<16x1xi32>
    %251 = arith.cmpi slt, %249, %250 : vector<16x1xi32>
    %252 = arith.andi %247, %251 : vector<16x1xi1>
    %cst_136 = arith.constant 0.000000e+00 : f32
    %253 = vector.shape_cast %252 : vector<16x1xi1> to vector<16x1xi1>
    %254 = vector.broadcast %253 : vector<16x1xi1> to vector<16x64xi1>
    %255 = vector.broadcast %cst_136 : f32 to vector<16x64xf32>
    %256 = arith.select %254, %243, %255 : vector<16x64xi1>, vector<16x64xf32>
    %257 = arith.truncf %256 : vector<16x64xf32> to vector<16x64xbf16>
    %c2_137 = arith.constant 2 : index
    %c0_138 = arith.constant 0 : index
    %c0_139 = arith.constant 0 : index
    %258 = vector.load %arg6[%c2_137, %c0_138, %c0_139] : memref<5x64x64xbf16, #tpu.memory_space<vmem>>, vector<1x64x64xbf16>
    %259 = vector.shape_cast %258 : vector<1x64x64xbf16> to vector<64x64xbf16>
    %cst_140 = arith.constant dense<0.000000e+00> : vector<16x64xf32>
    %260 = tpu.matmul %257, %259, %cst_140 {dimension_numbers = #tpu.dot_dimension_numbers<[1], [0], [0], [1], [0, 0, 1, 1], [], []>} : vector<16x64xbf16>, vector<64x64xbf16>, vector<16x64xf32> -> vector<16x64xf32>
    %261 = arith.addf %242, %260 : vector<16x64xf32>
    %c14_i32 = arith.constant 14 : i32
    %262 = tpu.dynamic_rotate %216 by %c14_i32 dim 0 : vector<16x64xf32>, i32 -> vector<16x64xf32>
    %c2_i32 = arith.constant 2 : i32
    %263 = vector.broadcast %c2_i32 : i32 to vector<16x1xi32>
    %264 = arith.addi %219, %263 : vector<16x1xi32>
    %c0_i32_141 = arith.constant 0 : i32
    %265 = vector.broadcast %c0_i32_141 : i32 to vector<16x1xi32>
    %266 = arith.cmpi sge, %264, %265 : vector<16x1xi32>
    %c2_i32_142 = arith.constant 2 : i32
    %267 = vector.broadcast %c2_i32_142 : i32 to vector<16x1xi32>
    %268 = arith.addi %219, %267 : vector<16x1xi32>
    %c8_i32_143 = arith.constant 8 : i32
    %269 = vector.broadcast %c8_i32_143 : i32 to vector<16x1xi32>
    %270 = arith.cmpi slt, %268, %269 : vector<16x1xi32>
    %271 = arith.andi %266, %270 : vector<16x1xi1>
    %cst_144 = arith.constant 0.000000e+00 : f32
    %272 = vector.shape_cast %271 : vector<16x1xi1> to vector<16x1xi1>
    %273 = vector.broadcast %272 : vector<16x1xi1> to vector<16x64xi1>
    %274 = vector.broadcast %cst_144 : f32 to vector<16x64xf32>
    %275 = arith.select %273, %262, %274 : vector<16x64xi1>, vector<16x64xf32>
    %276 = arith.truncf %275 : vector<16x64xf32> to vector<16x64xbf16>
    %c3 = arith.constant 3 : index
    %c0_145 = arith.constant 0 : index
    %c0_146 = arith.constant 0 : index
    %277 = vector.load %arg6[%c3, %c0_145, %c0_146] : memref<5x64x64xbf16, #tpu.memory_space<vmem>>, vector<1x64x64xbf16>
    %278 = vector.shape_cast %277 : vector<1x64x64xbf16> to vector<64x64xbf16>
    %cst_147 = arith.constant dense<0.000000e+00> : vector<16x64xf32>
    %279 = tpu.matmul %276, %278, %cst_147 {dimension_numbers = #tpu.dot_dimension_numbers<[1], [0], [0], [1], [0, 0, 1, 1], [], []>} : vector<16x64xbf16>, vector<64x64xbf16>, vector<16x64xf32> -> vector<16x64xf32>
    %280 = arith.addf %261, %279 : vector<16x64xf32>
    %c13_i32 = arith.constant 13 : i32
    %281 = tpu.dynamic_rotate %216 by %c13_i32 dim 0 : vector<16x64xf32>, i32 -> vector<16x64xf32>
    %c3_i32 = arith.constant 3 : i32
    %282 = vector.broadcast %c3_i32 : i32 to vector<16x1xi32>
    %283 = arith.addi %219, %282 : vector<16x1xi32>
    %c0_i32_148 = arith.constant 0 : i32
    %284 = vector.broadcast %c0_i32_148 : i32 to vector<16x1xi32>
    %285 = arith.cmpi sge, %283, %284 : vector<16x1xi32>
    %c3_i32_149 = arith.constant 3 : i32
    %286 = vector.broadcast %c3_i32_149 : i32 to vector<16x1xi32>
    %287 = arith.addi %219, %286 : vector<16x1xi32>
    %c8_i32_150 = arith.constant 8 : i32
    %288 = vector.broadcast %c8_i32_150 : i32 to vector<16x1xi32>
    %289 = arith.cmpi slt, %287, %288 : vector<16x1xi32>
    %290 = arith.andi %285, %289 : vector<16x1xi1>
    %cst_151 = arith.constant 0.000000e+00 : f32
    %291 = vector.shape_cast %290 : vector<16x1xi1> to vector<16x1xi1>
    %292 = vector.broadcast %291 : vector<16x1xi1> to vector<16x64xi1>
    %293 = vector.broadcast %cst_151 : f32 to vector<16x64xf32>
    %294 = arith.select %292, %281, %293 : vector<16x64xi1>, vector<16x64xf32>
    %295 = arith.truncf %294 : vector<16x64xf32> to vector<16x64xbf16>
    %c4 = arith.constant 4 : index
    %c0_152 = arith.constant 0 : index
    %c0_153 = arith.constant 0 : index
    %296 = vector.load %arg6[%c4, %c0_152, %c0_153] : memref<5x64x64xbf16, #tpu.memory_space<vmem>>, vector<1x64x64xbf16>
    %297 = vector.shape_cast %296 : vector<1x64x64xbf16> to vector<64x64xbf16>
    %cst_154 = arith.constant dense<0.000000e+00> : vector<16x64xf32>
    %298 = tpu.matmul %295, %297, %cst_154 {dimension_numbers = #tpu.dot_dimension_numbers<[1], [0], [0], [1], [0, 0, 1, 1], [], []>} : vector<16x64xbf16>, vector<64x64xbf16>, vector<16x64xf32> -> vector<16x64xf32>
    %299 = arith.addf %280, %298 : vector<16x64xf32>
    %c0_155 = arith.constant 0 : index
    %c0_156 = arith.constant 0 : index
    %300 = vector.load %arg11[%c0_155, %c0_156] : memref<1x64xf32, #tpu.memory_space<vmem>>, vector<1x64xf32>
    %301 = vector.broadcast %300 : vector<1x64xf32> to vector<16x64xf32>
    %302 = arith.addf %299, %301 : vector<16x64xf32>
    %cst_157 = arith.constant 0.000000e+00 : f32
    %303 = vector.broadcast %cst_157 : f32 to vector<16x64xf32>
    %304 = arith.maximumf %302, %303 : vector<16x64xf32>
    %c15_i32_158 = arith.constant 15 : i32
    %305 = tpu.dynamic_rotate %304 by %c15_i32_158 dim 0 : vector<16x64xf32>, i32 -> vector<16x64xf32>
    %306 = arith.maximumf %304, %305 : vector<16x64xf32>
    %c0_159 = arith.constant 0 : index
    %c0_160 = arith.constant 0 : index
    %307 = vector.load %arg19[%c0_159, %c0_160] : memref<256x64xf32, #tpu.memory_space<vmem>>, vector<16x64xf32>
    tpu.vector_store %arg19[%c0_159, %c0_160], %306 {strides = array<i32>} : memref<256x64xf32, #tpu.memory_space<vmem>>, vector<16x64xf32>,
    %c0_161 = arith.constant 0 : index
    %c0_162 = arith.constant 0 : index
    %308 = tpu.strided_load %arg19[%c0_161, %c0_162] {strides = array<i32: 8, 1>} : memref<256x64xf32, #tpu.memory_space<vmem>>, vector<2x64xf32>
    %309 = arith.truncf %308 : vector<2x64xf32> to vector<2x64xbf16>
    %c0_163 = arith.constant 0 : index
    %c0_164 = arith.constant 0 : index
    %c0_165 = arith.constant 0 : index
    %310 = vector.load %arg12[%c0_163, %c0_164, %c0_165] : memref<3x64x64xbf16, #tpu.memory_space<vmem>>, vector<1x64x64xbf16>
    %311 = vector.shape_cast %310 : vector<1x64x64xbf16> to vector<64x64xbf16>
    %cst_166 = arith.constant dense<0.000000e+00> : vector<2x64xf32>
    %312 = tpu.matmul %309, %311, %cst_166 {dimension_numbers = #tpu.dot_dimension_numbers<[1], [0], [0], [1], [0, 0, 1, 1], [], []>} : vector<2x64xbf16>, vector<64x64xbf16>, vector<2x64xf32> -> vector<2x64xf32>
    %c2_167 = arith.constant 2 : index
    %c0_168 = arith.constant 0 : index
    %313 = tpu.strided_load %arg19[%c2_167, %c0_168] {strides = array<i32: 8, 1>} : memref<256x64xf32, #tpu.memory_space<vmem>>, vector<2x64xf32>
    %314 = arith.truncf %313 : vector<2x64xf32> to vector<2x64xbf16>
    %c1_169 = arith.constant 1 : index
    %c0_170 = arith.constant 0 : index
    %c0_171 = arith.constant 0 : index
    %315 = vector.load %arg12[%c1_169, %c0_170, %c0_171] : memref<3x64x64xbf16, #tpu.memory_space<vmem>>, vector<1x64x64xbf16>
    %316 = vector.shape_cast %315 : vector<1x64x64xbf16> to vector<64x64xbf16>
    %cst_172 = arith.constant dense<0.000000e+00> : vector<2x64xf32>
    %317 = tpu.matmul %314, %316, %cst_172 {dimension_numbers = #tpu.dot_dimension_numbers<[1], [0], [0], [1], [0, 0, 1, 1], [], []>} : vector<2x64xbf16>, vector<64x64xbf16>, vector<2x64xf32> -> vector<2x64xf32>
    %318 = arith.addf %312, %317 : vector<2x64xf32>
    %c4_173 = arith.constant 4 : index
    %c0_174 = arith.constant 0 : index
    %319 = tpu.strided_load %arg19[%c4_173, %c0_174] {strides = array<i32: 8, 1>} : memref<256x64xf32, #tpu.memory_space<vmem>>, vector<2x64xf32>
    %320 = arith.truncf %319 : vector<2x64xf32> to vector<2x64xbf16>
    %c2_175 = arith.constant 2 : index
    %c0_176 = arith.constant 0 : index
    %c0_177 = arith.constant 0 : index
    %321 = vector.load %arg12[%c2_175, %c0_176, %c0_177] : memref<3x64x64xbf16, #tpu.memory_space<vmem>>, vector<1x64x64xbf16>
    %322 = vector.shape_cast %321 : vector<1x64x64xbf16> to vector<64x64xbf16>
    %cst_178 = arith.constant dense<0.000000e+00> : vector<2x64xf32>
    %323 = tpu.matmul %320, %322, %cst_178 {dimension_numbers = #tpu.dot_dimension_numbers<[1], [0], [0], [1], [0, 0, 1, 1], [], []>} : vector<2x64xbf16>, vector<64x64xbf16>, vector<2x64xf32> -> vector<2x64xf32>
    %324 = arith.addf %318, %323 : vector<2x64xf32>
    %c0_179 = arith.constant 0 : index
    %c0_180 = arith.constant 0 : index
    %325 = vector.load %arg13[%c0_179, %c0_180] : memref<1x64xf32, #tpu.memory_space<vmem>>, vector<1x64xf32>
    %326 = vector.broadcast %325 : vector<1x64xf32> to vector<2x64xf32>
    %327 = arith.addf %324, %326 : vector<2x64xf32>
    %cst_181 = arith.constant 0.000000e+00 : f32
    %328 = vector.broadcast %cst_181 : f32 to vector<2x64xf32>
    %329 = arith.maximumf %327, %328 : vector<2x64xf32>
    %330 = arith.truncf %329 : vector<2x64xf32> to vector<2x64xbf16>
    %c0_182 = arith.constant 0 : index
    %c0_183 = arith.constant 0 : index
    %331 = vector.load %arg14[%c0_182, %c0_183] : memref<64x32xbf16, #tpu.memory_space<vmem>>, vector<64x32xbf16>
    %cst_184 = arith.constant dense<0.000000e+00> : vector<2x32xf32>
    %332 = tpu.matmul %330, %331, %cst_184 {dimension_numbers = #tpu.dot_dimension_numbers<[1], [0], [0], [1], [0, 0, 1, 1], [], []>} : vector<2x64xbf16>, vector<64x32xbf16>, vector<2x32xf32> -> vector<2x32xf32>
    %c0_185 = arith.constant 0 : index
    %c0_186 = arith.constant 0 : index
    %333 = vector.load %arg15[%c0_185, %c0_186] : memref<1x32xf32, #tpu.memory_space<vmem>>, vector<1x32xf32>
    %334 = vector.broadcast %333 : vector<1x32xf32> to vector<2x32xf32>
    %335 = arith.addf %332, %334 : vector<2x32xf32>
    %cst_187 = arith.constant 0.000000e+00 : f32
    %336 = vector.broadcast %cst_187 : f32 to vector<2x32xf32>
    %337 = arith.maximumf %335, %336 : vector<2x32xf32>
    %338 = arith.truncf %337 : vector<2x32xf32> to vector<2x32xbf16>
    %c0_188 = arith.constant 0 : index
    %c0_189 = arith.constant 0 : index
    %339 = vector.load %arg16[%c0_188, %c0_189] : memref<32x10xbf16, #tpu.memory_space<vmem>>, vector<32x10xbf16>
    %cst_190 = arith.constant dense<0.000000e+00> : vector<2x10xf32>
    %340 = tpu.matmul %338, %339, %cst_190 {dimension_numbers = #tpu.dot_dimension_numbers<[1], [0], [0], [1], [0, 0, 1, 1], [], []>} : vector<2x32xbf16>, vector<32x10xbf16>, vector<2x10xf32> -> vector<2x10xf32>
    %c0_191 = arith.constant 0 : index
    %c0_192 = arith.constant 0 : index
    %341 = vector.load %arg17[%c0_191, %c0_192] : memref<1x10xf32, #tpu.memory_space<vmem>>, vector<1x10xf32>
    %342 = vector.broadcast %341 : vector<1x10xf32> to vector<2x10xf32>
    %343 = arith.addf %340, %342 : vector<2x10xf32>
    %c0_193 = arith.constant 0 : index
    %c0_194 = arith.constant 0 : index
    %344 = vector.load %arg18[%c0_193, %c0_194] : memref<2x10xf32, #tpu.memory_space<vmem>>, vector<2x10xf32>
    tpu.vector_store %arg18[%c0_193, %c0_194], %343 {strides = array<i32>} : memref<2x10xf32, #tpu.memory_space<vmem>>, vector<2x10xf32>,
    return
  }
  func.func @transform_0(%arg0: i32) -> (i32, i32) {
    %c0_i32 = arith.constant 0 : i32
    %c0_i32_0 = arith.constant 0 : i32
    %c0_i32_1 = arith.constant 0 : i32
    return %c0_i32, %c0_i32_0 : i32, i32
  }
  func.func @transform_1(%arg0: i32) -> (i32, i32, i32) {
    %c0_i32 = arith.constant 0 : i32
    %c0_i32_0 = arith.constant 0 : i32
    %c0_i32_1 = arith.constant 0 : i32
    %c0_i32_2 = arith.constant 0 : i32
    return %c0_i32, %c0_i32_0, %c0_i32_1 : i32, i32, i32
  }
  func.func @transform_2(%arg0: i32) -> (i32, i32, i32) {
    %c0_i32 = arith.constant 0 : i32
    %c0_i32_0 = arith.constant 0 : i32
    %c0_i32_1 = arith.constant 0 : i32
    %c0_i32_2 = arith.constant 0 : i32
    return %c0_i32, %c0_i32_0, %c0_i32_1 : i32, i32, i32
  }
  func.func @transform_3(%arg0: i32) -> (i32, i32, i32) {
    %c0_i32 = arith.constant 0 : i32
    %c0_i32_0 = arith.constant 0 : i32
    %c0_i32_1 = arith.constant 0 : i32
    %c0_i32_2 = arith.constant 0 : i32
    return %c0_i32, %c0_i32_0, %c0_i32_1 : i32, i32, i32
  }
  func.func @transform_4(%arg0: i32) -> (i32, i32, i32) {
    %c0_i32 = arith.constant 0 : i32
    %c0_i32_0 = arith.constant 0 : i32
    %c0_i32_1 = arith.constant 0 : i32
    %c0_i32_2 = arith.constant 0 : i32
    return %c0_i32, %c0_i32_0, %c0_i32_1 : i32, i32, i32
  }
  func.func @transform_5(%arg0: i32) -> (i32, i32, i32) {
    %c0_i32 = arith.constant 0 : i32
    %c0_i32_0 = arith.constant 0 : i32
    %c0_i32_1 = arith.constant 0 : i32
    %c0_i32_2 = arith.constant 0 : i32
    return %c0_i32, %c0_i32_0, %c0_i32_1 : i32, i32, i32
  }
  func.func @transform_6(%arg0: i32) -> (i32, i32) {
    %c0_i32 = arith.constant 0 : i32
    %c0_i32_0 = arith.constant 0 : i32
    %c0_i32_1 = arith.constant 0 : i32
    return %c0_i32, %c0_i32_0 : i32, i32
  }
  func.func @transform_7(%arg0: i32) -> (i32, i32) {
    %c0_i32 = arith.constant 0 : i32
    %c0_i32_0 = arith.constant 0 : i32
    %c0_i32_1 = arith.constant 0 : i32
    return %c0_i32, %c0_i32_0 : i32, i32
  }
  func.func @transform_8(%arg0: i32) -> (i32, i32) {
    %c0_i32 = arith.constant 0 : i32
    %c0_i32_0 = arith.constant 0 : i32
    %c0_i32_1 = arith.constant 0 : i32
    return %c0_i32, %c0_i32_0 : i32, i32
  }
  func.func @transform_9(%arg0: i32) -> (i32, i32) {
    %c0_i32 = arith.constant 0 : i32
    %c0_i32_0 = arith.constant 0 : i32
    %c0_i32_1 = arith.constant 0 : i32
    return %c0_i32, %c0_i32_0 : i32, i32
  }
  func.func @transform_10(%arg0: i32) -> (i32, i32) {
    %c0_i32 = arith.constant 0 : i32
    %c0_i32_0 = arith.constant 0 : i32
    %c0_i32_1 = arith.constant 0 : i32
    return %c0_i32, %c0_i32_0 : i32, i32
  }
  func.func @transform_11(%arg0: i32) -> (i32, i32, i32) {
    %c0_i32 = arith.constant 0 : i32
    %c0_i32_0 = arith.constant 0 : i32
    %c0_i32_1 = arith.constant 0 : i32
    %c0_i32_2 = arith.constant 0 : i32
    return %c0_i32, %c0_i32_0, %c0_i32_1 : i32, i32, i32
  }
  func.func @transform_12(%arg0: i32) -> (i32, i32) {
    %c0_i32 = arith.constant 0 : i32
    %c0_i32_0 = arith.constant 0 : i32
    %c0_i32_1 = arith.constant 0 : i32
    return %c0_i32, %c0_i32_0 : i32, i32
  }
  func.func @transform_13(%arg0: i32) -> (i32, i32) {
    %c0_i32 = arith.constant 0 : i32
    %c0_i32_0 = arith.constant 0 : i32
    %c0_i32_1 = arith.constant 0 : i32
    return %c0_i32, %c0_i32_0 : i32, i32
  }
  func.func @transform_14(%arg0: i32) -> (i32, i32) {
    %c0_i32 = arith.constant 0 : i32
    %c0_i32_0 = arith.constant 0 : i32
    %c0_i32_1 = arith.constant 0 : i32
    return %c0_i32, %c0_i32_0 : i32, i32
  }
  func.func @transform_15(%arg0: i32) -> (i32, i32) {
    %c0_i32 = arith.constant 0 : i32
    %c0_i32_0 = arith.constant 0 : i32
    %c0_i32_1 = arith.constant 0 : i32
    return %c0_i32, %c0_i32_0 : i32, i32
  }
  func.func @transform_16(%arg0: i32) -> (i32, i32) {
    %c0_i32 = arith.constant 0 : i32
    %c0_i32_0 = arith.constant 0 : i32
    %c0_i32_1 = arith.constant 0 : i32
    return %c0_i32, %c0_i32_0 : i32, i32
  }
  func.func @transform_17(%arg0: i32) -> (i32, i32) {
    %c0_i32 = arith.constant 0 : i32
    %c0_i32_0 = arith.constant 0 : i32
    %c0_i32_1 = arith.constant 0 : i32
    return %c0_i32, %c0_i32_0 : i32, i32
  }
}

</mosaic_0001>

<bundles_post_ra>
// kernel: net_forward.1
= control target key start
LH: loop header
LB: loop body
LE: loop exit
PB: predicated region body
PF: predicated region fallthrough
CT: control target
= control target key end

     0   :  { %s6708_s0 = inlined_call_operand.vmem [shape: f32[256,6], index: 0, kind: input, shape index: {}]   ;;  %s6709_s1 = inlined_call_operand.vmem [shape: bf16[3,6,16], index: 1, kind: input, shape index: {}]   ;;  %s6710_s2 = inlined_call_operand.vmem [shape: bf16[3,16,32], index: 2, kind: input, shape index: {}]   ;;  %s6711_s3 = inlined_call_operand.vmem [shape: bf16[3,32,32], index: 3, kind: input, shape index: {}]   ;;  %s6712_s4 = inlined_call_operand.vmem [shape: bf16[3,32,64], index: 4, kind: input, shape index: {}]   ;;  %s6713_s5 = inlined_call_operand.vmem [shape: bf16[5,64,64], index: 5, kind: input, shape index: {}]   ;;  %s6714_s6 = inlined_call_operand.vmem [shape: f32[1,16], index: 6, kind: input, shape index: {}]   ;;  %s6715_s7 = inlined_call_operand.vmem [shape: f32[1,32], index: 7, kind: input, shape index: {}]   ;;  %s6716_s8 = inlined_call_operand.vmem [shape: f32[1,32], index: 8, kind: input, shape index: {}]   ;;  %s6717_s9 = inlined_call_operand.vmem [shape: f32[1,64], index: 9, kind: input, shape index: {}]   ;;  %s6718_s10 = inlined_call_operand.vmem [shape: f32[1,64], index: 10, kind: input, shape index: {}]   ;;  %s6719_s11 = inlined_call_operand.vmem [shape: bf16[3,64,64], index: 11, kind: input, shape index: {}]   ;;  %s6720_s12 = inlined_call_operand.vmem [shape: f32[1,64], index: 12, kind: input, shape index: {}]   ;;  %s6721_s13 = inlined_call_operand.vmem [shape: bf16[64,32], index: 13, kind: input, shape index: {}]   ;;  %s6722_s14 = inlined_call_operand.vmem [shape: f32[1,32], index: 14, kind: input, shape index: {}]   ;;  %s6723_s15 = inlined_call_operand.vmem [shape: bf16[32,10], index: 15, kind: input, shape index: {}]   ;;  %s6724_s16 = inlined_call_operand.vmem [shape: f32[1,10], index: 16, kind: input, shape index: {}]   ;;  %s6725_s17 = inlined_call_operand.hbm [shape: f32[2,10], index: 17, kind: output, shape index: {}]  }
   0x1   :  { %6729 = sst [smem:[#allocation10_spill]] %s6708_s0 }
   0x2   :  { %6730 = sst [smem:[#allocation11_spill]] %s6709_s1 }
   0x3   :  { %s6731_s26 = sld [smem:[#allocation11_spill]]  ;;  %vm528_vm0 = vcmask 1042432   ;;  %vm479_vm1 = vcmask 48128   ;;  %v90_v3 = vlaneseq }
   0x4   :  { %s6732_s29 = sld [smem:[#allocation10_spill]] }
   0x5   :  { %v5201_v8 = vshrl.u32 %v90_v3, 7 }
   0x7   :  { %v123_v22 = vand.u32 127, %v5201_v8  ;;  %vm187_vm2 = vcmp.lt.s32.totalorder %v5201_v8, 1  ;;  %vm937_vm5 = vcmp.lt.s32.totalorder %v5201_v8, 7 }
   0x9   :  { %v4281_v0 = vld [vmem:[%s6731_s26 + $0x4] sm:$0x7]  ;;  %v4314_v9 = vld [vmem:[%s6731_s26 + $0x8] sm:$0x7]  ;;  %v460_v12 = vld [vmem:[%s6731_s26] sm:$0x7] }
   0xa   :  { %v5180_v1 = vld [vmem:[%s6732_s29] sm:$0xff]  ;;  %v5185_v2 = vld [vmem:[%s6732_s29 + $0x8] sm:$0xff]  ;;  %5000 = vmatprep.subr.msk.bf16.mxu0 %vm528_vm0, %v4281_v0  ;;  %v530_v4 = vsel %vm528_vm0, %v4281_v0, 0  ;;  %v5194_v6 = vld [vmem:[%s6732_s29 + $0x10] sm:$0xff]  ;;  %v1261_v15 = vsel %vm528_vm0, %v4314_v9, 0  ;;  %5001 = vmatprep.subr.msk.bf16.mxu1 %vm528_vm0, %v460_v12  ;;  %v742_v16 = vsel %vm528_vm0, %v460_v12, 0 }
   0xb   :  { %v461_v5 = vpack.c.bf16 %v5185_v2, %v5180_v1  ;;  %v5199_v7 = vld [vmem:[%s6732_s29 + $0x18] sm:$0xff]  ;;  %4669 = vmatpush3.bf16.msra.mxu0 %v530_v4  ;;  %v5209_v10 = vld [vmem:[%s6732_s29 + $0x20] sm:$0xff]  ;;  %v5221_v13 = vld [vmem:[%s6732_s29 + $0x28] sm:$0xff]  ;;  %v155_v14 = vrot.slane %v5180_v1, 7  ;;  %v156_v18 = vrot.slane %v5185_v2, 7  ;;  %v157_v19 = vrot.slane %v5194_v6, 7  ;;  %4703 = vmatpush3.bf16.msra.mxu1 %v742_v16 }
   0xc   :  { %v462_v11 = vpack.c.bf16 %v5199_v7, %v5194_v6  ;;  %5002 = vmatprep.subr.msk.bf16.mxu0 %vm528_vm0, %v4314_v9  ;;  %v5230_v17 = vld [vmem:[%s6732_s29 + $0xf8] sm:$0xff]  ;;  %v158_v20 = vrot.slane %v5199_v7, 7  ;;  %v463_v21 = vpack.c.bf16 %v5221_v13, %v5209_v10  ;;  %v5244_v24 = vld [vmem:[%s6732_s29 + $0x30] sm:$0xff]  ;;  %v159_v26 = vrot.slane %v5209_v10, 7  ;;  %v5261_v30 = vld [vmem:[%s6732_s29 + $0x40] sm:$0xff] }
   0xd   :  { %4670 = vmatprep.mubr.msk.bf16.mxu0 %vm479_vm1, %v461_v5  ;;  %v186_v23 = vrot.slane %v5230_v17, 7  ;;  %v5249_v25 = vld [vmem:[%s6732_s29 + $0x38] sm:$0xff]  ;;  %v160_v27 = vrot.slane %v5221_v13, 7  ;;  %v220_v29 = vadd.s32 4294967295, %v123_v22  ;;  %v5266_v31 = vld [vmem:[%s6732_s29 + $0x48] sm:$0xff]  ;;  %v218_v32 = vsel %vm187_vm2, %v155_v14, %v156_v18  ;;  %v5290_v47 = vld [vmem:[%s6732_s29 + $0x50] sm:$0xff] }
   0xe   :  { %4671 = vmatmul.mubr.msk.bf16.vlgmr.msra.gmra.mxu0 %vm479_vm1, %v462_v11  ;;  %v464_v33 = vpack.c.bf16 %v5249_v25, %v5244_v24  ;;  %v216_v34 = vsel %vm187_vm2, %v157_v19, %v158_v20  ;;  %v217_v35 = vsel %vm187_vm2, %v156_v18, %v157_v19  ;;  %v161_v37 = vrot.slane %v5244_v24, 7  ;;  %v5295_v48 = vld [vmem:[%s6732_s29 + $0x58] sm:$0xff]  ;;  %v5302_v49 = vld [vmem:[%s6732_s29 + $0x60] sm:$0xff]  ;;  %v5308_v50 = vld [vmem:[%s6732_s29 + $0x68] sm:$0xff] }
   0xf   :  { %4737 = vmatpush3.bf16.msra.mxu0 %v1261_v15  ;;  %4674 = vmatprep.mubr.msk.bf16.mxu0 %vm479_vm1, %v463_v21  ;;  %v219_v28 = vsel %vm187_vm2, %v186_v23, %v155_v14  ;;  %vm252_vm3 = vcmp.ge.s32.totalorder %v220_v29, 0  ;;  %v445_v38 = vpack.c.bf16 %v216_v34, %v217_v35  ;;  %v465_v39 = vpack.c.bf16 %v5266_v31, %v5261_v30  ;;  %v5328_v61 = vld [vmem:[%s6732_s29 + $0x70] sm:$0xff]  ;;  %v5333_v62 = vld [vmem:[%s6732_s29 + $0x78] sm:$0xff]  ;;  %v5342_v3 = vld [vmem:[%s6732_s29 + $0x80] sm:$0xff] }
  0x10   :  { %v412_v36 = vsel %vm252_vm3, %v219_v28, 0.0  ;;  %v162_v41 = vrot.slane %v5249_v25, 7  ;;  %v214_v42 = vsel %vm187_vm2, %v159_v26, %v160_v27  ;;  %v215_v43 = vsel %vm187_vm2, %v158_v20, %v159_v26  ;;  %v5348_v4 = vld [vmem:[%s6732_s29 + $0x88] sm:$0xff]  ;;  %v5372_v29 = vld [vmem:[%s6732_s29 + $0x90] sm:$0xff] }
  0x11   :  { %v444_v40 = vpack.c.bf16 %v218_v32, %v412_v36  ;;  %v163_v44 = vrot.slane %v5261_v30, 7  ;;  %v164_v45 = vrot.slane %v5266_v31, 7  ;;  %v446_v46 = vpack.c.bf16 %v214_v42, %v215_v43  ;;  %v5378_v32 = vld [vmem:[%s6732_s29 + $0x98] sm:$0xff]  ;;  %v5391_v35 = vld [vmem:[%s6732_s29 + $0xa8] sm:$0xff] }
  0x12   :  { %v212_v51 = vsel %vm187_vm2, %v161_v37, %v162_v41  ;;  %v213_v52 = vsel %vm187_vm2, %v160_v27, %v161_v37  ;;  %v466_v53 = vpack.c.bf16 %v5295_v48, %v5290_v47  ;;  %v467_v56 = vpack.c.bf16 %v5308_v50, %v5302_v49 }
  0x13   :  { %4704 = vmatprep.mubr.msk.bf16.mxu1 %vm479_vm1, %v444_v40  ;;  %v210_v54 = vsel %vm187_vm2, %v163_v44, %v164_v45  ;;  %v211_v55 = vsel %vm187_vm2, %v162_v41, %v163_v44  ;;  %v447_v57 = vpack.c.bf16 %v212_v51, %v213_v52  ;;  %v165_v58 = vrot.slane %v5290_v47, 7 }
  0x14   :  { %4705 = vmatmul.mubr.msk.bf16.vlgmr.msra.gmra.mxu1 %vm479_vm1, %v445_v38  ;;  %v166_v59 = vrot.slane %v5295_v48, 7  ;;  %v448_v60 = vpack.c.bf16 %v210_v54, %v211_v55  ;;  %v167_v63 = vrot.slane %v5302_v49, 7  ;;  %v168_v0 = vrot.slane %v5308_v50, 7  ;;  %v5417_v54 = vld [vmem:[%s6732_s29 + $0xb8] sm:$0xff]  ;;  %v5423_v55 = vld [vmem:[%s6732_s29 + $0xc0] sm:$0xff] }
  0x15   :  { %4708 = vmatprep.mubr.msk.bf16.mxu1 %vm479_vm1, %v446_v46  ;;  %v209_v9 = vsel %vm187_vm2, %v164_v45, %v165_v58  ;;  %v107_v11 = vadd.s32 128, %v5201_v8  ;;  %v468_v12 = vpack.c.bf16 %v5333_v62, %v5328_v61  ;;  %v171_v16 = vrot.slane %v5342_v3, 7 }
  0x16   :  { %4675 = vmatmul.mubr.msk.bf16.gmra.mxu0 %vm479_vm1, %v464_v33  ;;  %v208_v5 = vsel %vm187_vm2, %v165_v58, %v166_v59  ;;  %v206_v14 = vsel %vm187_vm2, %v167_v63, %v168_v0  ;;  %v207_v15 = vsel %vm187_vm2, %v166_v59, %v167_v63  ;;  %v469_v18 = vpack.c.bf16 %v5348_v4, %v5342_v3  ;;  %v5383_v33 = vld [vmem:[%s6732_s29 + $0xa0] sm:$0xff] }
  0x17   :  { %4678 = vmatprep.mubr.msk.bf16.mxu0 %vm479_vm1, %v465_v39  ;;  %v139_v19 = vand.u32 127, %v107_v11  ;;  %v449_v20 = vpack.c.bf16 %v208_v5, %v209_v9  ;;  %v169_v21 = vrot.slane %v5328_v61, 7  ;;  %v170_v22 = vrot.slane %v5333_v62, 7 }
  0x18   :  { %v450_v26 = vpack.c.bf16 %v206_v14, %v207_v15  ;;  %v172_v28 = vrot.slane %v5348_v4, 7  ;;  %v905_v36 = vrot.slane %v5180_v1, 1  ;;  %v173_v37 = vrot.slane %v5372_v29, 7  ;;  %v5456_v15 = vld [vmem:[%s6732_s29 + $0xd8] sm:$0xff] }
  0x19   :  { %v236_v27 = vadd.s32 4294967295, %v139_v19  ;;  %v203_v34 = vsel %vm187_vm2, %v170_v22, %v171_v16  ;;  %v204_v38 = vsel %vm187_vm2, %v169_v21, %v170_v22  ;;  %v205_v39 = vsel %vm187_vm2, %v168_v0, %v169_v21  ;;  %v5464_v19 = vld [vmem:[%s6732_s29 + $0xe0] sm:$0xff]  ;;  %v5472_v21 = vld [vmem:[%s6732_s29 + $0xe8] sm:$0xff] }
  0x1a   :  { %v174_v40 = vrot.slane %v5378_v32, 7  ;;  %v470_v41 = vpack.c.bf16 %v5378_v32, %v5372_v29  ;;  %v202_v42 = vsel %vm187_vm2, %v171_v16, %v172_v28  ;;  %v175_v44 = vrot.slane %v5383_v33, 7 }
  0x1b   :  { %vm268_vm4 = vcmp.ge.s32.totalorder %v236_v27, 0  ;;  %v176_v45 = vrot.slane %v5391_v35, 7  ;;  %v471_v46 = vpack.c.bf16 %v5391_v35, %v5383_v33  ;;  %v451_v51 = vpack.c.bf16 %v204_v38, %v205_v39 }
  0x1c   :  { %4709 = vmatmul.mubr.msk.bf16.gmra.mxu1 %vm479_vm1, %v447_v57  ;;  %v428_v43 = vsel %vm268_vm4, %v203_v34, 0.0  ;;  %v200_v57 = vsel %vm187_vm2, %v173_v37, %v174_v40  ;;  %v201_v58 = vsel %vm187_vm2, %v172_v28, %v173_v37  ;;  %v906_v59 = vrot.slane %v5185_v2, 1  ;;  %v5451_v2 = vld [vmem:[%s6732_s29 + $0xd0] sm:$0xff] }
  0x1d   :  { %4712 = vmatprep.mubr.msk.bf16.mxu1 %vm479_vm1, %v448_v60  ;;  %v452_v52 = vpack.c.bf16 %v202_v42, %v428_v43  ;;  %v198_v63 = vsel %vm187_vm2, %v175_v44, %v176_v45  ;;  %v199_v0 = vsel %vm187_vm2, %v174_v40, %v175_v44  ;;  %v178_v11 = vrot.slane %v5417_v54, 7  ;;  %v5499_v44 = vld [vmem:[%s6732_s29 + $0xf0] sm:$0xff] }
  0x1e   :  { %4679 = vmatmul.mubr.msk.bf16.gmra.mxu0 %vm479_vm1, %v466_v53  ;;  %v5412_v53 = vld [vmem:[%s6732_s29 + $0xb0] sm:$0xff]  ;;  %v454_v14 = vpack.c.bf16 %v198_v63, %v199_v0  ;;  %v179_v16 = vrot.slane %v5423_v55, 7  ;;  %v908_v22 = vrot.slane %v5199_v7, 1  ;;  %v181_v7 = vrot.slane %v5451_v2, 7 }
  0x1f   :  { %4682 = vmatprep.mubr.msk.bf16.mxu0 %vm479_vm1, %v467_v56  ;;  %v5428_v56 = vld [vmem:[%s6732_s29 + $0xc8] sm:$0xff]  ;;  %v472_v60 = vpack.c.bf16 %v5417_v54, %v5412_v53  ;;  %v177_v9 = vrot.slane %v5412_v53, 7  ;;  %v182_v37 = vrot.slane %v5456_v15, 7  ;;  %v475_v38 = vpack.c.bf16 %v5472_v21, %v5464_v19 }
  0x20   :  { %v473_v5 = vpack.c.bf16 %v5428_v56, %v5423_v55  ;;  %v195_v34 = vsel %vm187_vm2, %v178_v11, %v179_v16  ;;  %v183_v40 = vrot.slane %v5464_v19, 7  ;;  %v909_v43 = vrot.slane %v5209_v10, 1 }
  0x21   :  { %v197_v27 = vsel %vm187_vm2, %v176_v45, %v177_v9  ;;  %v910_v45 = vrot.slane %v5221_v13, 1  ;;  %v968_v10 = vsel %vm937_vm5, %v905_v36, %v906_v59 }
  0x24   :  { %4713 = vmatmul.mubr.msk.bf16.gmra.mxu1 %vm479_vm1, %v449_v20  ;;  %v907_v20 = vrot.slane %v5194_v6, 1  ;;  %v474_v6 = vpack.c.bf16 %v5456_v15, %v5451_v2 }
  0x25   :  { %4716 = vmatprep.mubr.msk.bf16.mxu1 %vm479_vm1, %v450_v26  ;;  %v196_v26 = vsel %vm187_vm2, %v177_v9, %v178_v11 }
  0x26   :  { %4683 = vmatmul.mubr.msk.bf16.gmra.mxu0 %vm479_vm1, %v468_v12  ;;  %v453_v12 = vpack.c.bf16 %v200_v57, %v201_v58  ;;  %v455_v39 = vpack.c.bf16 %v196_v26, %v197_v27  ;;  %v191_v58 = vsel %vm187_vm2, %v182_v37, %v183_v40 }
  0x27   :  { %4686 = vmatprep.mubr.msk.bf16.mxu0 %vm479_vm1, %v469_v18  ;;  %v180_v18 = vrot.slane %v5428_v56, 7 }
  0x29   :  { %v194_v28 = vsel %vm187_vm2, %v179_v16, %v180_v18  ;;  %v193_v13 = vsel %vm187_vm2, %v180_v18, %v181_v7 }
  0x2a   :  { %v456_v42 = vpack.c.bf16 %v194_v28, %v195_v34 }
  0x2c   :  { %4717 = vmatmul.mubr.msk.bf16.gmra.mxu1 %vm479_vm1, %v451_v51  ;;  %v967_v51 = vsel %vm937_vm5, %v906_v59, %v907_v20  ;;  %v185_v59 = vrot.slane %v5499_v44, 7 }
  0x2d   :  { %4720 = vmatprep.mubr.msk.bf16.mxu1 %vm479_vm1, %v452_v52  ;;  %v192_v52 = vsel %vm187_vm2, %v181_v7, %v182_v37 }
  0x2e   :  { %4687 = vmatmul.mubr.msk.bf16.gmra.mxu0 %vm479_vm1, %v470_v41  ;;  %v184_v41 = vrot.slane %v5472_v21, 7  ;;  %v457_v63 = vpack.c.bf16 %v192_v52, %v193_v13 }
  0x2f   :  { %4690 = vmatprep.mubr.msk.bf16.mxu0 %vm479_vm1, %v471_v46  ;;  %v911_v46 = vrot.slane %v5244_v24, 1  ;;  %v476_v24 = vpack.c.bf16 %v5230_v17, %v5499_v44 }
  0x30   :  { %v190_v57 = vsel %vm187_vm2, %v183_v40, %v184_v41 }
  0x31   :  { %v458_v0 = vpack.c.bf16 %v190_v57, %v191_v58 }
  0x34   :  { %4721 = vmatmul.mubr.msk.bf16.gmra.mxu1 %vm479_vm1, %v453_v12 }
  0x35   :  { %4724 = vmatprep.mubr.msk.bf16.mxu1 %vm479_vm1, %v454_v14 }
  0x36   :  { %4691 = vmatmul.mubr.msk.bf16.gmra.mxu0 %vm479_vm1, %v472_v60  ;;  %v1194_v60 = vpack.c.bf16 %v967_v51, %v968_v10 }
  0x37   :  { %4694 = vmatprep.mubr.msk.bf16.mxu0 %vm479_vm1, %v473_v5 }
  0x3c   :  { %4725 = vmatmul.mubr.msk.bf16.gmra.mxu1 %vm479_vm1, %v455_v39 }
  0x3d   :  { %4728 = vmatprep.mubr.msk.bf16.mxu1 %vm479_vm1, %v456_v42 }
  0x3e   :  { %4695 = vmatmul.mubr.msk.bf16.gmra.mxu0 %vm479_vm1, %v474_v6 }
  0x3f   :  { %4698 = vmatprep.mubr.msk.bf16.mxu0 %vm479_vm1, %v475_v38 }
  0x40   :  { %22 = vsyncpa [#allocation4], 0  ;;  %v966_v5 = vsel %vm937_vm5, %v907_v20, %v908_v22  ;;  %v965_v9 = vsel %vm937_vm5, %v908_v22, %v909_v43  ;;  %v963_v11 = vsel %vm937_vm5, %v910_v45, %v911_v46  ;;  %v964_v12 = vsel %vm937_vm5, %v909_v43, %v910_v45  ;;  %v5007_v1 = vld [vmem:[%s6710_s2 + $0x10] sm:$0xff]  }
  0x41   :  { %v188_v14 = vsel %vm187_vm2, %v185_v59, %v186_v23  ;;  %v189_v16 = vsel %vm187_vm2, %v184_v41, %v185_v59  ;;  %v1195_v18 = vpack.c.bf16 %v965_v9, %v966_v5  ;;  %v912_v20 = vrot.slane %v5249_v25, 1  ;;  %4806 = vmatprep.subr.bf16.mxu0 %v5007_v1 }
  0x42   :  { %v913_v22 = vrot.slane %v5261_v30, 1  ;;  %v1196_v26 = vpack.c.bf16 %v963_v11, %v964_v12  ;;  %v914_v27 = vrot.slane %v5266_v31, 1  ;;  %v915_v6 = vrot.slane %v5290_v47, 1 }
  0x43   :  { %v459_v28 = vpack.c.bf16 %v188_v14, %v189_v16  ;;  %v962_v34 = vsel %vm937_vm5, %v911_v46, %v912_v20  ;;  %v5556_v31 = vadd.s32 120, %v5201_v8  ;;  %v916_v7 = vrot.slane %v5295_v48, 1 }
  0x44   :  { %4729 = vmatmul.mubr.msk.bf16.gmra.mxu1 %vm479_vm1, %v457_v63  ;;  %v961_v23 = vsel %vm937_vm5, %v912_v20, %v913_v22  ;;  %v959_v25 = vsel %vm937_vm5, %v914_v27, %v915_v6  ;;  %v960_v30 = vsel %vm937_vm5, %v913_v22, %v914_v27  ;;  %v917_v37 = vrot.slane %v5302_v49, 1 }
  0x45   :  { %4732 = vmatprep.mubr.msk.bf16.mxu1 %vm479_vm1, %v458_v0  ;;  %6733 = vst [vmem:[#allocation6_spill] sm:$0xff] %v5556_v31  ;;  %v1197_v47 = vpack.c.bf16 %v961_v23, %v962_v34  ;;  %v1198_v38 = vpack.c.bf16 %v959_v25, %v960_v30  ;;  %v918_v39 = vrot.slane %v5308_v50, 1  ;;  %v919_v40 = vrot.slane %v5328_v61, 1 }
  0x46   :  { %4699 = vmatmul.mubr.msk.bf16.gmra.mxu0 %vm479_vm1, %v476_v24  ;;  %v138_v41 = vand.u32 127, %v5556_v31  ;;  %v920_v42 = vrot.slane %v5333_v62, 1  ;;  %v957_v43 = vsel %vm937_vm5, %v916_v7, %v917_v37  ;;  %v958_v48 = vsel %vm937_vm5, %v915_v6, %v916_v7 }
  0x47   :  { %4738 = vmatprep.mubr.msk.bf16.mxu0 %vm479_vm1, %v1194_v60  ;;  %v921_v49 = vrot.slane %v5342_v3, 1  ;;  %v955_v50 = vsel %vm937_vm5, %v918_v39, %v919_v40  ;;  %v956_v61 = vsel %vm937_vm5, %v917_v37, %v918_v39  ;;  %v1199_v46 = vpack.c.bf16 %v957_v43, %v958_v48  ;;  %v5651_v43 = vld [vmem:[%s6710_s2] sm:$0xff]  }
  0x48   :  { %v985_v45 = vadd.s32 1, %v138_v41  ;;  %v1200_v51 = vpack.c.bf16 %v955_v50, %v956_v61  ;;  %v922_v62 = vrot.slane %v5348_v4, 1  ;;  %v923_v10 = vrot.slane %v5372_v29, 1 }
  0x49   :  { %v953_v52 = vsel %vm937_vm5, %v920_v42, %v921_v49  ;;  %v954_v3 = vsel %vm937_vm5, %v919_v40, %v920_v42  ;;  %v924_v29 = vrot.slane %v5378_v32, 1  ;;  %v925_v58 = vrot.slane %v5383_v33, 1 }
  0x4a   :  { %vm1049_vm6 = vcmp.lt.s32.totalorder %v985_v45, 128  ;;  %v951_v24 = vsel %vm937_vm5, %v922_v62, %v923_v10  ;;  %v952_v4 = vsel %vm937_vm5, %v921_v49, %v922_v62  ;;  %v926_v63 = vrot.slane %v5391_v35, 1 }
  0x4b   :  { %v1177_v13 = vsel %vm1049_vm6, %v953_v52, 0.0  ;;  %v1202_v60 = vpack.c.bf16 %v951_v24, %v952_v4  ;;  %v927_v59 = vrot.slane %v5412_v53, 1  ;;  %v949_v0 = vsel %vm937_vm5, %v924_v29, %v925_v58 }
  0x4c   :  { %4733 = vmatmul.mubr.msk.bf16.gmra.mxu1 %vm479_vm1, %v459_v28  ;;  %v1201_v57 = vpack.c.bf16 %v1177_v13, %v954_v3  ;;  %v950_v5 = vsel %vm937_vm5, %v923_v10, %v924_v29  ;;  %v948_v33 = vsel %vm937_vm5, %v925_v58, %v926_v63  ;;  %v928_v35 = vrot.slane %v5417_v54, 1 }
  0x4d   :  { %v947_v32 = vsel %vm937_vm5, %v926_v63, %v927_v59  ;;  %v1203_v9 = vpack.c.bf16 %v949_v0, %v950_v5  ;;  %v929_v53 = vrot.slane %v5423_v55, 1  ;;  %v930_v12 = vrot.slane %v5428_v56, 1 }
  0x4e   :  { %4739 = vmatmul.mubr.msk.bf16.vlgmr.msra.gmra.mxu0 %vm479_vm1, %v1195_v18  ;;  %v1204_v11 = vpack.c.bf16 %v947_v32, %v948_v33  ;;  %v931_v14 = vrot.slane %v5451_v2, 1  ;;  %v946_v18 = vsel %vm937_vm5, %v927_v59, %v928_v35  ;;  %v122_v56 = vadd.s32 248, %v5201_v8 }
  0x4f   :  { %4742 = vmatprep.mubr.msk.bf16.mxu0 %vm479_vm1, %v1196_v26  ;;  %v945_v16 = vsel %vm937_vm5, %v928_v35, %v929_v53  ;;  %v944_v55 = vsel %vm937_vm5, %v929_v53, %v930_v12  ;;  %v932_v2 = vrot.slane %v5456_v15, 1  ;;  %v933_v22 = vrot.slane %v5464_v19, 1  ;;  %4807 = vmatpush3.bf16.msra.mxu0 %v5007_v1 }
  0x50   :  { %v943_v54 = vsel %vm937_vm5, %v930_v12, %v931_v14  ;;  %v1205_v20 = vpack.c.bf16 %v945_v16, %v946_v18  ;;  %v934_v27 = vrot.slane %v5472_v21, 1  ;;  %v935_v6 = vrot.slane %v5499_v44, 1 }
  0x51   :  { %v1206_v26 = vpack.c.bf16 %v943_v54, %v944_v55  ;;  %v154_v28 = vand.u32 127, %v122_v56  ;;  %v941_v23 = vsel %vm937_vm5, %v932_v2, %v933_v22  ;;  %v942_v34 = vsel %vm937_vm5, %v931_v14, %v932_v2 }
  0x52   :  { %v936_v15 = vrot.slane %v5230_v17, 1  ;;  %v939_v19 = vsel %vm937_vm5, %v934_v27, %v935_v6  ;;  %v940_v21 = vsel %vm937_vm5, %v933_v22, %v934_v27  ;;  %v1207_v25 = vpack.c.bf16 %v941_v23, %v942_v34 }
  0x53   :  { %v1001_v44 = vadd.s32 1, %v154_v28  ;;  %v1208_v30 = vpack.c.bf16 %v939_v19, %v940_v21  ;;  %v5731_v21 = vld [vmem:[%s6714_s6] ss:$0 sm:$0xff]  ;;  %vm1623_vm8 = vcmask 130048   ;;  %vm2507_vm13 = vcmask 261120  }
  0x54   :  { %v938_v17 = vsel %vm937_vm5, %v935_v6, %v936_v15 }
  0x55   :  { %vm1065_vm7 = vcmp.lt.s32.totalorder %v1001_v44, 128 }
  0x56   :  { %4743 = vmatmul.mubr.msk.bf16.gmra.mxu0 %vm479_vm1, %v1197_v47  ;;  %v969_v47 = vsel %vm937_vm5, %v936_v15, %v905_v36 }
  0x57   :  { %4746 = vmatprep.mubr.msk.bf16.mxu0 %vm479_vm1, %v1198_v38  ;;  %v1193_v7 = vsel %vm1065_vm7, %v969_v47, 0.0  ;;  %v5006_v38 = vld [vmem:[%s6710_s2 + $0x8] sm:$0xff]  }
  0x58   :  { %v1209_v37 = vpack.c.bf16 %v1193_v7, %v938_v17  ;;  %4770 = vmatprep.subr.bf16.mxu1 %v5006_v38 }
  0x59   :  { %4771 = vmatpush3.bf16.msra.mxu1 %v5006_v38 }
  0x5a   :  { %4788 = vmatprep.subr.bf16.mxu1 %v5651_v43 }
  0x5e   :  { %4747 = vmatmul.mubr.msk.bf16.gmra.mxu0 %vm479_vm1, %v1199_v46 }
  0x5f   :  { %4750 = vmatprep.mubr.msk.bf16.mxu0 %vm479_vm1, %v1200_v51 }
  0x66   :  { %4751 = vmatmul.mubr.msk.bf16.gmra.mxu0 %vm479_vm1, %v1201_v57 }
  0x67   :  { %4754 = vmatprep.mubr.msk.bf16.mxu0 %vm479_vm1, %v1202_v60 }
  0x6e   :  { %4755 = vmatmul.mubr.msk.bf16.gmra.mxu0 %vm479_vm1, %v1203_v9 }
  0x6f   :  { %4758 = vmatprep.mubr.msk.bf16.mxu0 %vm479_vm1, %v1204_v11 }
  0x76   :  { %4759 = vmatmul.mubr.msk.bf16.gmra.mxu0 %vm479_vm1, %v1205_v20 }
  0x77   :  { %4762 = vmatprep.mubr.msk.bf16.mxu0 %vm479_vm1, %v1206_v26 }
  0x7e   :  { %4763 = vmatmul.mubr.msk.bf16.gmra.mxu0 %vm479_vm1, %v1207_v25 }
  0x7f   :  { %4766 = vmatprep.mubr.msk.bf16.mxu0 %vm479_vm1, %v1208_v30 }
  0x86   :  { %4767 = vmatmul.mubr.msk.bf16.gmra.mxu0 %vm479_vm1, %v1209_v37 }
  0xce   :  { %v4672_v36 = vpop.f32.mrf.mxu0 }
  0xd0   :  { %v566_v39 = vpop.f32.mrf.mxu0 }
  0xd2   :  { %v4673_v40 = vpop.f32.mrf.mxu0 }
  0xd4   :  { %v569_v41 = vpop.f32.mrf.mxu0  ;;  %v4706_v48 = vpop.f32.mrf.mxu1 }
  0xd5   :  { %v787_v15 = vadd.f32 %v4706_v48, %v4672_v36 }
  0xd6   :  { %v5646_v42 = vpop.f32.mrf.mxu0  ;;  %v778_v50 = vpop.f32.mrf.mxu1 }
  0xd7   :  { %v779_v44 = vadd.f32 %v778_v50, %v566_v39 }
  0xd8   :  { %v5653_v49 = vpop.f32.mrf.mxu0  ;;  %v4707_v45 = vpop.f32.mrf.mxu1 }
  0xd9   :  { %v790_v17 = vadd.f32 %v4707_v45, %v4673_v40 }
  0xda   :  { %v5656_v61 = vpop.f32.mrf.mxu0  ;;  %v781_v51 = vpop.f32.mrf.mxu1 }
  0xdb   :  { %v782_v36 = vadd.f32 %v781_v51, %v569_v41 }
  0xdc   :  { %v5658_v46 = vpop.f32.mrf.mxu0  ;;  %v4710_v10 = vpop.f32.mrf.mxu1 }
  0xde   :  { %v5660_v62 = vpop.f32.mrf.mxu0  ;;  %v794_v3 = vpop.f32.mrf.mxu1 }
  0xdf   :  { %v795_v40 = vadd.f32 %v794_v3, %v5653_v49 }
  0xe0   :  { %v5662_v52 = vpop.f32.mrf.mxu0  ;;  %v4711_v24 = vpop.f32.mrf.mxu1 }
  0xe2   :  { %v5664_v13 = vpop.f32.mrf.mxu0  ;;  %v5670_v29 = vpop.f32.mrf.mxu1 }
  0xe4   :  { %v5666_v4 = vpop.f32.mrf.mxu0  ;;  %v5676_v63 = vpop.f32.mrf.mxu1 }
  0xe6   :  { %v5668_v57 = vpop.f32.mrf.mxu0  ;;  %v5682_v5 = vpop.f32.mrf.mxu1 }
  0xe8   :  { %v5672_v58 = vpop.f32.mrf.mxu0  ;;  %v5688_v9 = vpop.f32.mrf.mxu1 }
  0xea   :  { %v5674_v60 = vpop.f32.mrf.mxu0  ;;  %v5694_v11 = vpop.f32.mrf.mxu1 }
  0xec   :  { %v5678_v59 = vpop.f32.mrf.mxu0  ;;  %v5700_v16 = vpop.f32.mrf.mxu1 }
  0xee   :  { %v5680_v0 = vpop.f32.mrf.mxu0  ;;  %v5706_v55 = vpop.f32.mrf.mxu1 }
  0xf0   :  { %v5684_v32 = vpop.f32.mrf.mxu0  ;;  %v5712_v2 = vpop.f32.mrf.mxu1 }
  0xf2   :  { %v5686_v33 = vpop.f32.mrf.mxu0  ;;  %v5718_v27 = vpop.f32.mrf.mxu1 }
  0xf4   :  { %v5690_v35 = vpop.f32.mrf.mxu0  ;;  %v5724_v23 = vpop.f32.mrf.mxu1 }
  0xf6   :  { %v5692_v53 = vpop.f32.mrf.mxu0  ;;  %v5733_v25 = vpop.f32.mrf.mxu1 }
  0xf8   :  { %v5696_v12 = vpop.f32.mrf.mxu0  ;;  %v5736_v1 = vpop.f32.mrf.mxu1 }
  0xfa   :  { %v5698_v14 = vpop.f32.mrf.mxu0  ;;  %v5742_v45 = vpop.f32.mrf.mxu1 }
  0xfc   :  { %v5702_v18 = vpop.f32.mrf.mxu0 }
  0xfe   :  { %v5704_v54 = vpop.f32.mrf.mxu0 }
 0x100   :  { %v5708_v56 = vpop.f32.mrf.mxu0 }
 0x102   :  { %v5710_v20 = vpop.f32.mrf.mxu0 }
 0x104   :  { %v5714_v22 = vpop.f32.mrf.mxu0 }
 0x106   :  { %v5716_v26 = vpop.f32.mrf.mxu0 }
 0x108   :  { %v5720_v6 = vpop.f32.mrf.mxu0 }
 0x109   :  { %6734 = vst [vmem:[#allocation7_spill] sm:$0xff] %v5720_v6 }
 0x10a   :  { %v5722_v28 = vpop.f32.mrf.mxu0 }
 0x10b   :  { %6735 = vst [vmem:[#allocation8_spill] sm:$0xff] %v5722_v28  ;;  %v803_v28 = vadd.f32 %v4710_v10, %v5646_v42 }
 0x10c   :  { %v5726_v34 = vpop.f32.mrf.mxu0 }
 0x10d   :  { %6736 = vst [vmem:[#allocation9_spill] sm:$0xff] %v5726_v34 }
 0x10e   :  { %v4740_v19 = vpop.f32.mrf.mxu0 }
 0x10f   :  { %v1426_v30 = vadd.f32 %v4740_v19, %v787_v15 }
 0x110   :  { %v1297_v47 = vpop.f32.mrf.mxu0 }
 0x111   :  { %v1465_v7 = vadd.f32 %v5731_v21, %v1426_v30  ;;  %v1424_v37 = vadd.f32 %v1297_v47, %v779_v44  ;;  %v806_v30 = vadd.f32 %v4711_v24, %v5656_v61 }
 0x112   :  { %v4741_v38 = vpop.f32.mrf.mxu0 }
 0x113   :  { %v1427_v31 = vadd.f32 %v4741_v38, %v790_v17  ;;  %v1463_v48 = vadd.f32 %v5731_v21, %v1424_v37  ;;  %v1497_v6 = vmax.f32 %v1465_v7, 0.0  ;;  %v5747_v17 = vadd.s32 56, %v5201_v8  ;;  %v5752_v7 = vpop.f32.mrf.mxu1 }
 0x114   :  { %v1300_v34 = vpop.f32.mrf.mxu0 }
 0x115   :  { %v1466_v39 = vadd.f32 %v5731_v21, %v1427_v31  ;;  %v1425_v50 = vadd.f32 %v1300_v34, %v782_v36  ;;  %v1495_v47 = vmax.f32 %v1463_v48, 0.0  ;;  %v1529_v42 = vrot.slane %v1497_v6, 1 }
 0x116   :  { %v4744_v15 = vpop.f32.mrf.mxu0 }
 0x117   :  { %v1498_v19 = vmax.f32 %v1466_v39, 0.0  ;;  %v1430_v44 = vadd.f32 %v4744_v15, %v803_v28  ;;  %v1464_v41 = vadd.f32 %v5731_v21, %v1425_v50  ;;  %v798_v28 = vadd.f32 %v5670_v29, %v5658_v46 }
 0x118   :  { %v1313_v51 = vpop.f32.mrf.mxu0  ;;  %v5757_v38 = vrot.slane %v1495_v47, 1  ;;  %v1694_v50 = vand.u32 63, %v5747_v17  ;;  %v819_v29 = vadd.f32 %v5676_v63, %v5660_v62  ;;  %v814_v63 = vadd.f32 %v5694_v11, %v5666_v4 }
 0x119   :  { %v1530_v10 = vrot.slane %v1498_v19, 1  ;;  %v1469_v31 = vadd.f32 %v5731_v21, %v1430_v44  ;;  %v1428_v34 = vadd.f32 %v1313_v51, %v795_v40  ;;  %v1496_v49 = vmax.f32 %v1464_v41, 0.0 }
 0x11a   :  { %v4745_v3 = vpop.f32.mrf.mxu0  ;;  %v811_v41 = vadd.f32 %v5682_v5, %v5662_v52  ;;  %v822_v52 = vadd.f32 %v5688_v9, %v5664_v13  ;;  %v835_v13 = vadd.f32 %v5700_v16, %v5668_v57  ;;  %v830_v57 = vadd.f32 %v5718_v27, %v5678_v59 }
 0x11b   :  { %v1587_v61 = vsel %vm937_vm5, %v1529_v42, %v1530_v10  ;;  %v1467_v24 = vadd.f32 %v5731_v21, %v1428_v34  ;;  %v1431_v37 = vadd.f32 %v4745_v3, %v806_v30  ;;  %v1528_v48 = vrot.slane %v1496_v49, 1 }
 0x11c   :  { %v1593_v36 = vmax.f32 %v1497_v6, %v1587_v61  ;;  %v1316_v39 = vpop.f32.mrf.mxu0  ;;  %v1501_v15 = vmax.f32 %v1469_v31, 0.0  ;;  %v5773_v31 = vpop.f32.mrf.mxu1 }
 0x11d   :  { %v1499_v40 = vmax.f32 %v1467_v24, 0.0  ;;  %v5761_v44 = vadd.f32 %v5731_v21, %v1431_v37  ;;  %v1429_v46 = vadd.f32 %v1316_v39, %v798_v28  ;;  %v1588_v6 = vsel %vm937_vm5, %v1528_v48, %v1529_v42 }
 0x11e   :  { %1626 = vst.msk [vmem:[#allocation2 + $0x10] sm:$0xff] %vm1623_vm8, %v1593_v36  ;;  %v1589_v30 = vsel %vm937_vm5, %v5757_v38, %v1528_v48  ;;  %v4748_v51 = vpop.f32.mrf.mxu0  ;;  %v1592_v3 = vmax.f32 %v1496_v49, %v1588_v6  ;;  %v1533_v24 = vrot.slane %v1501_v15, 1  ;;  %v827_v48 = vadd.f32 %v5706_v55, %v5672_v58  ;;  %v4727_v39 = vpop.f32.mrf.mxu1 }
 0x11f   :  { %v1591_v34 = vmax.f32 %v1495_v47, %v1589_v30  ;;  %v1531_v28 = vrot.slane %v1499_v40, 1  ;;  %v1502_v62 = vmax.f32 %v5761_v44, 0.0  ;;  %v1468_v5 = vadd.f32 %v5731_v21, %v1429_v46 }
 0x120   :  { %v1434_v42 = vadd.f32 %v4748_v51, %v819_v29  ;;  %v1329_v61 = vpop.f32.mrf.mxu0  ;;  %1625 = vst.msk [vmem:[#allocation2 + $0x8] sm:$0xff] %vm1623_vm8, %v1592_v3  ;;  %v838_v29 = vadd.f32 %v5712_v2, %v5674_v60  ;;  %v851_v51 = vadd.f32 %v5724_v23, %v5680_v0  ;;  %v5808_v60 = vadd.f32 %v5733_v25, %v5684_v32 }
 0x121   :  { %1624 = vst.msk [vmem:[#allocation2] sm:$0xff] %vm1623_vm8, %v1591_v34  ;;  %v1586_v47 = vsel %vm937_vm5, %v1530_v10, %v1531_v28  ;;  %v1534_v49 = vrot.slane %v1502_v62, 1  ;;  %v1432_v37 = vadd.f32 %v1329_v61, %v811_v41  ;;  %v1500_v36 = vmax.f32 %v1468_v5, 0.0 }
 0x122   :  { %v1594_v9 = vmax.f32 %v1498_v19, %v1586_v47  ;;  %v1473_v4 = vadd.f32 %v5731_v21, %v1434_v42  ;;  %v4749_v11 = vpop.f32.mrf.mxu0  ;;  %v5818_v0 = vadd.f32 %v5736_v1, %v5686_v33  ;;  %v5822_v32 = vadd.f32 %v5742_v45, %v5690_v35 }
 0x123   :  { %v1583_v44 = vsel %vm937_vm5, %v1533_v24, %v1534_v49  ;;  %v5793_v46 = vadd.f32 %v5731_v21, %v1432_v37  ;;  %v1435_v10 = vadd.f32 %v4749_v11, %v822_v52  ;;  %v1532_v19 = vrot.slane %v1500_v36, 1 }
 0x124   :  { %1627 = vst.msk [vmem:[#allocation2 + $0x18] sm:$0xff] %vm1623_vm8, %v1594_v9  ;;  %v1597_v16 = vmax.f32 %v1501_v15, %v1583_v44  ;;  %v1332_v41 = vpop.f32.mrf.mxu0  ;;  %v1505_v58 = vmax.f32 %v1473_v4, 0.0  ;;  %v861_v15 = vpop.f32.mrf.mxu1  ;;  %v5831_v33 = vadd.f32 %v5752_v7, %v5692_v53  ;;  %v5836_v47 = vadd.f32 %v5773_v31, %v5696_v12 }
 0x125   :  { %v1503_v55 = vmax.f32 %v5793_v46, 0.0  ;;  %v5802_v6 = vadd.f32 %v5731_v21, %v1435_v10  ;;  %v1433_v30 = vadd.f32 %v1332_v41, %v814_v63  ;;  %v1584_v59 = vsel %vm937_vm5, %v1532_v19, %v1533_v24 }
 0x126   :  { %1630 = vst.msk [vmem:[#allocation2 + $0x30] sm:$0xff] %vm1623_vm8, %v1597_v16  ;;  %v1585_v2 = vsel %vm937_vm5, %v1531_v28, %v1532_v19  ;;  %v4752_v27 = vpop.f32.mrf.mxu0  ;;  %v1596_v3 = vmax.f32 %v1500_v36, %v1584_v59  ;;  %v4730_v37 = vpop.f32.mrf.mxu1  ;;  %v5851_v31 = vadd.f32 %v4727_v39, %v5698_v14  ;;  %v5858_v10 = vadd.f32 %v861_v15, %v5702_v18 }
 0x127   :  { %v1595_v34 = vmax.f32 %v1499_v40, %v1585_v2  ;;  %v1535_v52 = vrot.slane %v1503_v55, 1  ;;  %v1506_v63 = vmax.f32 %v5802_v6, 0.0  ;;  %v1472_v23 = vadd.f32 %v5731_v21, %v1433_v30 }
 0x128   :  { %v1438_v25 = vadd.f32 %v4752_v27, %v835_v13  ;;  %v1345_v5 = vpop.f32.mrf.mxu0  ;;  %1629 = vst.msk [vmem:[#allocation2 + $0x28] sm:$0xff] %vm1623_vm8, %v1596_v3  ;;  %v1537_v40 = vrot.slane %v1505_v58, 1  ;;  %v5843_v36 = vld [vmem:[#allocation2] ss:$2 sm:$0xff]  ;;  %v874_v19 = vpop.f32.mrf.mxu1 }
 0x129   :  { %1628 = vst.msk [vmem:[#allocation2 + $0x20] sm:$0xff] %vm1623_vm8, %v1595_v34  ;;  %v1582_v28 = vsel %vm937_vm5, %v1534_v49, %v1535_v52  ;;  %v1538_v42 = vrot.slane %v1506_v63, 1  ;;  %v1436_v61 = vadd.f32 %v1345_v5, %v827_v48  ;;  %v1504_v1 = vmax.f32 %v1472_v23, 0.0 }
 0x12a   :  { %v1598_v35 = vmax.f32 %v1502_v62, %v1582_v28  ;;  %v1477_v45 = vadd.f32 %v5731_v21, %v1438_v25  ;;  %v4753_v24 = vpop.f32.mrf.mxu0  ;;  %v2122_v5 = vrot.slane %v5843_v36, 1 }
 0x12b   :  { %v1579_v13 = vsel %vm937_vm5, %v1537_v40, %v1538_v42  ;;  %v5841_v49 = vadd.f32 %v5731_v21, %v1436_v61  ;;  %v1439_v9 = vadd.f32 %v4753_v24, %v838_v29  ;;  %v5845_v53 = vld [vmem:[#allocation2 + $0x10] ss:$2 sm:$0xff]  ;;  %v1536_v62 = vrot.slane %v1504_v1, 1 }
 0x12c   :  { %1631 = vst.msk [vmem:[#allocation2 + $0x38] sm:$0xff] %vm1623_vm8, %v1598_v35  ;;  %v1601_v7 = vmax.f32 %v1505_v58, %v1579_v13  ;;  %v1509_v4 = vmax.f32 %v1477_v45, 0.0  ;;  %v1348_v11 = vpop.f32.mrf.mxu0  ;;  %v1857_v12 = vpack.c.bf16 %v5845_v53, %v5843_v36  ;;  %v5861_v29 = vadd.f32 %v4730_v37, %v5704_v54 }
 0x12d   :  { %v1507_v48 = vmax.f32 %v5841_v49, 0.0  ;;  %v5855_v44 = vadd.f32 %v5731_v21, %v1439_v9  ;;  %v1437_v46 = vadd.f32 %v1348_v11, %v830_v57  ;;  %v1580_v16 = vsel %vm937_vm5, %v1536_v62, %v1537_v40  ;;  %v5882_v40 = vpop.f32.mrf.mxu1 }
 0x12e   :  { %1634 = vst.msk [vmem:[#allocation2 + $0x50] sm:$0xff] %vm1623_vm8, %v1601_v7  ;;  %v1581_v14 = vsel %vm937_vm5, %v1535_v52, %v1536_v62  ;;  %v4756_v39 = vpop.f32.mrf.mxu0  ;;  %4772 = vmatprep.mubr.msk.bf16.mxu1 %vm1623_vm8, %v1857_v12  ;;  %v1600_v57 = vmax.f32 %v1504_v1, %v1580_v16  ;;  %v1541_v6 = vrot.slane %v1509_v4, 1  ;;  %v2123_v27 = vrot.slane %v5845_v53, 1 }
 0x12f   :  { %v1599_v41 = vmax.f32 %v1503_v55, %v1581_v14  ;;  %v1539_v58 = vrot.slane %v1507_v48, 1  ;;  %v1510_v18 = vmax.f32 %v5855_v44, 0.0  ;;  %v1476_v54 = vadd.f32 %v5731_v21, %v1437_v46  ;;  %v877_v44 = vpop.f32.mrf.mxu1 }
 0x130   :  { %v1442_v30 = vadd.f32 %v4756_v39, %v851_v51  ;;  %v1361_v59 = vpop.f32.mrf.mxu0  ;;  %v5871_v2 = vld [vmem:[#allocation2 + $0x20] ss:$2 sm:$0xff]  ;;  %1633 = vst.msk [vmem:[#allocation2 + $0x48] sm:$0xff] %vm1623_vm8, %v1600_v57  ;;  %v2152_v37 = vsel %vm937_vm5, %v2122_v5, %v2123_v27  ;;  %v5905_v7 = vadd.f32 %v874_v19, %v5708_v56 }
 0x131   :  { %1632 = vst.msk [vmem:[#allocation2 + $0x40] sm:$0xff] %vm1623_vm8, %v1599_v41  ;;  %v1578_v55 = vsel %vm937_vm5, %v1538_v42, %v1539_v58  ;;  %v1542_v15 = vrot.slane %v1510_v18, 1  ;;  %v1440_v34 = vadd.f32 %v1361_v59, %v5808_v60  ;;  %v2124_v3 = vrot.slane %v5871_v2, 1 }
 0x132   :  { %v1602_v52 = vmax.f32 %v1506_v63, %v1578_v55  ;;  %v1508_v23 = vmax.f32 %v1476_v54, 0.0  ;;  %v1481_v51 = vadd.f32 %v5731_v21, %v1442_v30  ;;  %v4757_v25 = vpop.f32.mrf.mxu0 }
 0x133   :  { %v1575_v28 = vsel %vm937_vm5, %v1541_v6, %v1542_v15  ;;  %v5887_v61 = vadd.f32 %v5731_v21, %v1440_v34  ;;  %v1443_v42 = vadd.f32 %v4757_v25, %v5818_v0  ;;  %v5890_v60 = vld [vmem:[#allocation2 + $0x30] ss:$2 sm:$0xff]  ;;  %v2151_v63 = vsel %vm937_vm5, %v2123_v27, %v2124_v3 }
 0x134   :  { %1635 = vst.msk [vmem:[#allocation2 + $0x58] sm:$0xff] %vm1623_vm8, %v1602_v52  ;;  %v1605_v35 = vmax.f32 %v1509_v4, %v1575_v28  ;;  %v1540_v1 = vrot.slane %v1508_v23, 1  ;;  %v1513_v45 = vmax.f32 %v1481_v51, 0.0  ;;  %v1364_v24 = vpop.f32.mrf.mxu0  ;;  %v2266_v9 = vpack.c.bf16 %v2151_v63, %v2152_v37  ;;  %v5931_v52 = vpop.f32.mrf.mxu1 }
 0x135   :  { %v1511_v13 = vmax.f32 %v5887_v61, 0.0  ;;  %v5901_v0 = vadd.f32 %v5731_v21, %v1443_v42  ;;  %v1441_v49 = vadd.f32 %v1364_v24, %v5822_v32  ;;  %v2125_v11 = vrot.slane %v5890_v60, 1 }
 0x136   :  { %1638 = vst.msk [vmem:[#allocation2 + $0x70] sm:$0xff] %vm1623_vm8, %v1605_v35  ;;  %v1576_v62 = vsel %vm937_vm5, %v1540_v1, %v1541_v6  ;;  %v1577_v4 = vsel %vm937_vm5, %v1539_v58, %v1540_v1  ;;  %v4760_v12 = vpop.f32.mrf.mxu0  ;;  %4808 = vmatprep.mubr.msk.bf16.mxu0 %vm1623_vm8, %v2266_v9  ;;  %v1545_v56 = vrot.slane %v1513_v45, 1  ;;  %v1858_v41 = vpack.c.bf16 %v5890_v60, %v5871_v2 }
 0x137   :  { %v1603_v46 = vmax.f32 %v1507_v48, %v1577_v4  ;;  %v1604_v16 = vmax.f32 %v1508_v23, %v1576_v62  ;;  %v1543_v14 = vrot.slane %v1511_v13, 1  ;;  %v1514_v32 = vmax.f32 %v5901_v0, 0.0 }
 0x138   :  { %v1480_v39 = vadd.f32 %v5731_v21, %v1441_v49  ;;  %v1446_v19 = vadd.f32 %v4760_v12, %v5831_v33  ;;  %v1377_v57 = vpop.f32.mrf.mxu0  ;;  %v5919_v58 = vld [vmem:[#allocation2 + $0x40] ss:$2 sm:$0xff]  ;;  %v2150_v27 = vsel %vm937_vm5, %v2124_v3, %v2125_v11  ;;  %4773 = vmatmul.mubr.msk.bf16.vlgmr.msra.gmra.mxu1 %vm1623_vm8, %v1858_v41 }
 0x139   :  { %1636 = vst.msk [vmem:[#allocation2 + $0x60] sm:$0xff] %vm1623_vm8, %v1603_v46  ;;  %1637 = vst.msk [vmem:[#allocation2 + $0x68] sm:$0xff] %vm1623_vm8, %v1604_v16  ;;  %v1574_v48 = vsel %vm937_vm5, %v1542_v15, %v1543_v14  ;;  %v1546_v6 = vrot.slane %v1514_v32, 1  ;;  %v1444_v54 = vadd.f32 %v1377_v57, %v5836_v47  ;;  %v2126_v30 = vrot.slane %v5919_v58, 1  ;;  %4789 = vmatpush3.bf16.msra.mxu1 %v5651_v43 }
 0x13a   :  { %v1606_v59 = vmax.f32 %v1510_v18, %v1574_v48  ;;  %v1512_v33 = vmax.f32 %v1480_v39, 0.0  ;;  %v1485_v55 = vadd.f32 %v5731_v21, %v1446_v19  ;;  %v4761_v34 = vpop.f32.mrf.mxu0  ;;  %v886_v43 = vadd.f32 %v5882_v40, %v5710_v20 }
 0x13b   :  { %v1571_v15 = vsel %vm937_vm5, %v1545_v56, %v1546_v6  ;;  %v5936_v23 = vadd.f32 %v5731_v21, %v1444_v54  ;;  %v1447_v47 = vadd.f32 %v4761_v34, %v5851_v31  ;;  %v2149_v18 = vsel %vm937_vm5, %v2125_v11, %v2126_v30  ;;  %v5941_v51 = vld [vmem:[#allocation2 + $0x50] ss:$2 sm:$0xff] }
 0x13c   :  { %1639 = vst.msk [vmem:[#allocation2 + $0x78] sm:$0xff] %vm1623_vm8, %v1606_v59  ;;  %v1609_v3 = vmax.f32 %v1513_v45, %v1571_v15  ;;  %v1544_v25 = vrot.slane %v1512_v33, 1  ;;  %v1517_v28 = vmax.f32 %v1485_v55, 0.0  ;;  %v1380_v61 = vpop.f32.mrf.mxu0  ;;  %v2267_v42 = vpack.c.bf16 %v2149_v18, %v2150_v27 }
 0x13d   :  { %v1515_v63 = vmax.f32 %v5936_v23, 0.0  ;;  %v5947_v35 = vadd.f32 %v5731_v21, %v1447_v47  ;;  %v1445_v31 = vadd.f32 %v1380_v61, %v5858_v10  ;;  %v1859_v1 = vpack.c.bf16 %v5941_v51, %v5919_v58  ;;  %v890_v10 = vpop.f32.mrf.mxu1 }
 0x13e   :  { %1642 = vst.msk [vmem:[#allocation2 + $0x90] sm:$0xff] %vm1623_vm8, %v1609_v3  ;;  %v1572_v45 = vsel %vm937_vm5, %v1544_v25, %v1545_v56  ;;  %v1573_v24 = vsel %vm937_vm5, %v1543_v14, %v1544_v25  ;;  %4809 = vmatmul.mubr.msk.bf16.vlgmr.msra.gmra.mxu0 %vm1623_vm8, %v2267_v42  ;;  %v4764_v37 = vpop.f32.mrf.mxu0  ;;  %v2127_v0 = vrot.slane %v5941_v51, 1  ;;  %v878_v20 = vadd.f32 %v877_v44, %v5714_v22  ;;  %v6737_v3 = vld [vmem:[#allocation7_spill] sm:$0xff] }
 0x13f   :  { %v1607_v49 = vmax.f32 %v1511_v13, %v1573_v24  ;;  %v1608_v9 = vmax.f32 %v1512_v33, %v1572_v45  ;;  %v1547_v62 = vrot.slane %v1515_v63, 1  ;;  %v1518_v4 = vmax.f32 %v5947_v35, 0.0  ;;  %4776 = vmatprep.mubr.msk.bf16.mxu1 %vm1623_vm8, %v1859_v1  ;;  %v4735_v57 = vpop.f32.mrf.mxu1 }
 0x140   :  { %v1549_v40 = vrot.slane %v1517_v28, 1  ;;  %v1484_v11 = vadd.f32 %v5731_v21, %v1445_v31  ;;  %v1450_v12 = vadd.f32 %v4764_v37, %v5861_v29  ;;  %v1393_v46 = vpop.f32.mrf.mxu0  ;;  %v5966_v16 = vld [vmem:[#allocation2 + $0x60] ss:$2 sm:$0xff]  ;;  %v2148_v41 = vsel %vm937_vm5, %v2126_v30, %v2127_v0 }
 0x141   :  { %1640 = vst.msk [vmem:[#allocation2 + $0x80] sm:$0xff] %vm1623_vm8, %v1607_v49  ;;  %1641 = vst.msk [vmem:[#allocation2 + $0x88] sm:$0xff] %vm1623_vm8, %v1608_v9  ;;  %v1570_v13 = vsel %vm937_vm5, %v1546_v6, %v1547_v62  ;;  %v1550_v14 = vrot.slane %v1518_v4, 1  ;;  %v1448_v56 = vadd.f32 %v1393_v46, %v5905_v7  ;;  %v2128_v22 = vrot.slane %v5966_v16, 1  ;;  %v893_v35 = vpop.f32.mrf.mxu1 }
 0x142   :  { %v1610_v44 = vmax.f32 %v1514_v32, %v1570_v13  ;;  %v1516_v39 = vmax.f32 %v1484_v11, 0.0  ;;  %v1489_v19 = vadd.f32 %v5731_v21, %v1450_v12  ;;  %v4765_v29 = vpop.f32.mrf.mxu0  ;;  %v899_v18 = vadd.f32 %v5931_v52, %v5716_v26  ;;  %v6738_v26 = vld [vmem:[#allocation8_spill] sm:$0xff] }
 0x143   :  { %v1567_v48 = vsel %vm937_vm5, %v1549_v40, %v1550_v14  ;;  %v5980_v54 = vadd.f32 %v5731_v21, %v1448_v56  ;;  %v1451_v6 = vadd.f32 %v4765_v29, %v886_v43  ;;  %v2147_v7 = vsel %vm937_vm5, %v2127_v0, %v2128_v22  ;;  %v5986_v32 = vld [vmem:[#allocation2 + $0x70] ss:$2 sm:$0xff] }
 0x144   :  { %1643 = vst.msk [vmem:[#allocation2 + $0x98] sm:$0xff] %vm1623_vm8, %v1610_v44  ;;  %v1613_v59 = vmax.f32 %v1517_v28, %v1567_v48  ;;  %v1548_v33 = vrot.slane %v1516_v39, 1  ;;  %v1521_v30 = vmax.f32 %v1489_v19, 0.0  ;;  %v1396_v27 = vpop.f32.mrf.mxu0  ;;  %v2268_v55 = vpack.c.bf16 %v2147_v7, %v2148_v41 }
 0x145   :  { %v1519_v34 = vmax.f32 %v5980_v54, 0.0  ;;  %v5991_v15 = vadd.f32 %v5731_v21, %v1451_v6  ;;  %v1449_v23 = vadd.f32 %v1396_v27, %v878_v20  ;;  %v1860_v47 = vpack.c.bf16 %v5986_v32, %v5966_v16 }
 0x146   :  { %v891_v25 = vadd.f32 %v890_v10, %v6737_v3  ;;  %1646 = vst.msk [vmem:[#allocation2 + $0xb0] sm:$0xff] %vm1623_vm8, %v1613_v59  ;;  %v1568_v28 = vsel %vm937_vm5, %v1548_v33, %v1549_v40  ;;  %v1569_v61 = vsel %vm937_vm5, %v1547_v62, %v1548_v33  ;;  %4812 = vmatprep.mubr.msk.bf16.mxu0 %vm1623_vm8, %v2268_v55  ;;  %v4768_v42 = vpop.f32.mrf.mxu0  ;;  %v2161_v10 = vadd.s32 1, %v1694_v50  ;;  %v6739_v40 = vld [vmem:[#allocation9_spill] sm:$0xff] }
 0x147   :  { %v1611_v31 = vmax.f32 %v1515_v63, %v1569_v61  ;;  %v1612_v1 = vmax.f32 %v1516_v39, %v1568_v28  ;;  %v1551_v43 = vrot.slane %v1519_v34, 1  ;;  %v1522_v45 = vmax.f32 %v5991_v15, 0.0  ;;  %4777 = vmatmul.mubr.msk.bf16.gmra.mxu1 %vm1623_vm8, %v1860_v47 }
 0x148   :  { %v902_v52 = vadd.f32 %v4735_v57, %v6738_v26  ;;  %v1488_v24 = vadd.f32 %v5731_v21, %v1449_v23  ;;  %v1454_v37 = vadd.f32 %v4768_v42, %v899_v18  ;;  %v1409_v0 = vpop.f32.mrf.mxu0  ;;  %v1553_v63 = vrot.slane %v1521_v30, 1  ;;  %v6014_v20 = vld [vmem:[#allocation2 + $0x80] ss:$2 sm:$0xff] }
 0x149   :  { %1644 = vst.msk [vmem:[#allocation2 + $0xa0] sm:$0xff] %vm1623_vm8, %v1611_v31  ;;  %1645 = vst.msk [vmem:[#allocation2 + $0xa8] sm:$0xff] %vm1623_vm8, %v1612_v1  ;;  %v1566_v49 = vsel %vm937_vm5, %v1550_v14, %v1551_v43  ;;  %v1554_v9 = vrot.slane %v1522_v45, 1  ;;  %v1452_v62 = vadd.f32 %v1409_v0, %v891_v25  ;;  %v894_v11 = vadd.f32 %v893_v35, %v6739_v40 }
 0x14a   :  { %v1614_v12 = vmax.f32 %v1518_v4, %v1566_v49  ;;  %v1520_v46 = vmax.f32 %v1488_v24, 0.0  ;;  %v1493_v13 = vadd.f32 %v5731_v21, %v1454_v37  ;;  %v4769_v56 = vpop.f32.mrf.mxu0  ;;  %v2129_v14 = vrot.slane %v5986_v32, 1 }
 0x14b   :  { %v1563_v50 = vsel %vm937_vm5, %v1553_v63, %v1554_v9  ;;  %v1491_v44 = vadd.f32 %v5731_v21, %v1452_v62  ;;  %v1455_v39 = vadd.f32 %v4769_v56, %v902_v52  ;;  %v6021_v19 = vld [vmem:[#allocation2 + $0x90] ss:$2 sm:$0xff]  ;;  %v2130_v48 = vrot.slane %v6014_v20, 1 }
 0x14c   :  { %1647 = vst.msk [vmem:[#allocation2 + $0xb8] sm:$0xff] %vm1623_vm8, %v1614_v12  ;;  %v1617_v29 = vmax.f32 %v1521_v30, %v1563_v50  ;;  %v1552_v41 = vrot.slane %v1520_v46, 1  ;;  %v1525_v57 = vmax.f32 %v1493_v13, 0.0  ;;  %v1412_v4 = vpop.f32.mrf.mxu0  ;;  %v1861_v59 = vpack.c.bf16 %v6021_v19, %v6014_v20 }
 0x14d   :  { %v1523_v54 = vmax.f32 %v1491_v44, 0.0  ;;  %v1494_v6 = vadd.f32 %v5731_v21, %v1455_v39  ;;  %v1453_v7 = vadd.f32 %v1412_v4, %v894_v11  ;;  %v2131_v27 = vrot.slane %v6021_v19, 1 }
 0x14e   :  { %1650 = vst.msk [vmem:[#allocation2 + $0xd0] sm:$0xff] %vm1623_vm8, %v1617_v29  ;;  %v1564_v33 = vsel %vm937_vm5, %v1552_v41, %v1553_v63  ;;  %v1565_v30 = vsel %vm937_vm5, %v1551_v43, %v1552_v41  ;;  %vm2193_vm9 = vcmp.lt.s32.totalorder %v2161_v10, 64  ;;  %4780 = vmatprep.mubr.msk.bf16.mxu1 %vm1623_vm8, %v1861_v59  ;;  %v1557_v18 = vrot.slane %v1525_v57, 1 }
 0x14f   :  { %v1615_v55 = vmax.f32 %v1519_v34, %v1565_v30  ;;  %v1616_v15 = vmax.f32 %v1520_v46, %v1564_v33  ;;  %v1555_v23 = vrot.slane %v1523_v54, 1  ;;  %v1526_v47 = vmax.f32 %v1494_v6, 0.0  ;;  %v6740_v46 = vld [vmem:[#allocation6_spill] sm:$0xff] }
 0x150   :  { %v1492_v3 = vadd.f32 %v5731_v21, %v1453_v7  ;;  %v2145_v25 = vsel %vm937_vm5, %v2129_v14, %v2130_v48  ;;  %v2146_v28 = vsel %vm937_vm5, %v2128_v22, %v2129_v14  ;;  %v6043_v61 = vld [vmem:[#allocation2 + $0xa0] ss:$2 sm:$0xff]  ;;  %v2144_v24 = vsel %vm937_vm5, %v2130_v48, %v2131_v27 }
 0x151   :  { %1648 = vst.msk [vmem:[#allocation2 + $0xc0] sm:$0xff] %vm1623_vm8, %v1615_v55  ;;  %1649 = vst.msk [vmem:[#allocation2 + $0xc8] sm:$0xff] %vm1623_vm8, %v1616_v15  ;;  %v1562_v34 = vsel %vm937_vm5, %v1554_v9, %v1555_v23  ;;  %v1558_v42 = vrot.slane %v1526_v47, 1  ;;  %v2257_v35 = vsel %vm2193_vm9, %v2145_v25, 0.0  ;;  %v2132_v21 = vrot.slane %v6043_v61, 1 }
 0x152   :  { %v1618_v31 = vmax.f32 %v1522_v45, %v1562_v34  ;;  %v1524_v1 = vmax.f32 %v1492_v3, 0.0  ;;  %v2269_v43 = vpack.c.bf16 %v2257_v35, %v2146_v28  ;;  %v1687_v62 = vand.u32 63, %v5201_v8 }
 0x153   :  { %v1559_v26 = vsel %vm937_vm5, %v1557_v18, %v1558_v42  ;;  %v1590_v22 = vsel %vm937_vm5, %v1558_v42, %v5757_v38  ;;  %v2143_v52 = vsel %vm937_vm5, %v2131_v27, %v2132_v21  ;;  %v6059_v37 = vld [vmem:[#allocation2 + $0xb0] ss:$2 sm:$0xff]  ;;  %v1702_v13 = vand.u32 63, %v6740_v46 }
 0x154   :  { %1651 = vst.msk [vmem:[#allocation2 + $0xd8] sm:$0xff] %vm1623_vm8, %v1618_v31  ;;  %v1621_v45 = vmax.f32 %v1525_v57, %v1559_v26  ;;  %v1622_v0 = vmax.f32 %v1526_v47, %v1590_v22  ;;  %v1556_v10 = vrot.slane %v1524_v1, 1  ;;  %4813 = vmatmul.mubr.msk.bf16.gmra.mxu0 %vm1623_vm8, %v2269_v43  ;;  %v2270_v63 = vpack.c.bf16 %v2143_v52, %v2144_v24 }
 0x155   :  { %v1862_v49 = vpack.c.bf16 %v6059_v37, %v6043_v61  ;;  %v2133_v12 = vrot.slane %v6059_v37, 1  ;;  %v1735_v44 = vadd.s32 4294967295, %v1687_v62  ;;  %v2169_v41 = vadd.s32 1, %v1702_v13 }
 0x156   :  { %1654 = vst.msk [vmem:[#allocation2 + $0xf0] sm:$0xff] %vm1623_vm8, %v1621_v45  ;;  %1655 = vst.msk [vmem:[#allocation2 + $0xf8] sm:$0xff] %vm1623_vm8, %v1622_v0  ;;  %v1560_v38 = vsel %vm937_vm5, %v1556_v10, %v1557_v18  ;;  %v1561_v9 = vsel %vm937_vm5, %v1555_v23, %v1556_v10  ;;  %4816 = vmatprep.mubr.msk.bf16.mxu0 %vm1623_vm8, %v2270_v63  ;;  %v1703_v59 = vrot.slane %v5843_v36, 7  ;;  %v1706_v25 = vrot.slane %v5890_v60, 7 }
 0x157   :  { %v1619_v40 = vmax.f32 %v1523_v54, %v1561_v9  ;;  %v1620_v11 = vmax.f32 %v1524_v1, %v1560_v38  ;;  %4781 = vmatmul.mubr.msk.bf16.gmra.mxu1 %vm1623_vm8, %v1862_v49  ;;  %v2142_v14 = vsel %vm937_vm5, %v2132_v21, %v2133_v12  ;;  %v1704_v54 = vrot.slane %v5845_v53, 7 }
 0x158   :  { %v6076_v56 = vld [vmem:[#allocation2 + $0xc0] ss:$2 sm:$0xff]  ;;  %vm1751_vm10 = vcmp.ge.s32.totalorder %v1735_v44, 0  ;;  %vm2201_vm11 = vcmp.lt.s32.totalorder %v2169_v41, 64  ;;  %v99_v28 = vadd.s32 64, %v5201_v8  ;;  %v1708_v42 = vrot.slane %v5941_v51, 7 }
 0x159   :  { %1652 = vst.msk [vmem:[#allocation2 + $0xe0] sm:$0xff] %vm1623_vm8, %v1619_v40  ;;  %1653 = vst.msk [vmem:[#allocation2 + $0xe8] sm:$0xff] %vm1623_vm8, %v1620_v11  ;;  %v2134_v50 = vrot.slane %v6076_v56, 1  ;;  %v1733_v23 = vsel %vm187_vm2, %v1703_v59, %v1704_v54  ;;  %v1705_v35 = vrot.slane %v5871_v2, 7  ;;  %v1707_v31 = vrot.slane %v5919_v58, 7  ;;  %v5010_v41 = vld [vmem:[%s6711_s3 + $0x10] sm:$0xff]  }
 0x15a   :  { %v1695_v43 = vand.u32 63, %v99_v28  ;;  %v1711_v58 = vrot.slane %v6014_v20, 7  ;;  %v1710_v24 = vrot.slane %v5986_v32, 7  ;;  %v1712_v0 = vrot.slane %v6021_v19, 7 }
 0x15b   :  { %v2141_v39 = vsel %vm937_vm5, %v2133_v12, %v2134_v50  ;;  %v6085_v29 = vld [vmem:[#allocation2 + $0xd0] ss:$2 sm:$0xff]  ;;  %v1731_v1 = vsel %vm187_vm2, %v1705_v35, %v1706_v25  ;;  %v1729_v26 = vsel %vm187_vm2, %v1707_v31, %v1708_v42  ;;  %v1732_v2 = vsel %vm187_vm2, %v1704_v54, %v1705_v35 }
 0x15c   :  { %v2271_v57 = vpack.c.bf16 %v2141_v39, %v2142_v14  ;;  %v1863_v4 = vpack.c.bf16 %v6085_v29, %v6076_v56  ;;  %v2135_v33 = vrot.slane %v6085_v29, 1  ;;  %v1848_v51 = vpack.c.bf16 %v1731_v1, %v1732_v2 }
 0x15d   :  { %v6089_v48 = vld [vmem:[#allocation2 + $0xf0] ss:$2 sm:$0xff]  ;;  %v1730_v22 = vsel %vm187_vm2, %v1706_v25, %v1707_v31  ;;  %v1743_v45 = vadd.s32 4294967295, %v1695_v43  ;;  %v1709_v10 = vrot.slane %v5966_v16, 7  ;;  %v1726_v49 = vsel %vm187_vm2, %v1710_v24, %v1711_v58 }
 0x15e   :  { %4817 = vmatmul.mubr.msk.bf16.gmra.mxu0 %vm1623_vm8, %v2271_v57  ;;  %4784 = vmatprep.mubr.msk.bf16.mxu1 %vm1623_vm8, %v1863_v4  ;;  %v1718_v6 = vrot.slane %v6089_v48, 7  ;;  %v2137_v7 = vrot.slane %v6089_v48, 1  ;;  %v1849_v52 = vpack.c.bf16 %v1729_v26, %v1730_v22  ;;  %v1725_v20 = vsel %vm187_vm2, %v1711_v58, %v1712_v0  ;;  %v5011_v57 = vld [vmem:[%s6711_s3 + $0x28] sm:$0xff]   ;;  %v6211_v26 = vld [vmem:[%s6715_s7] ss:$0 sm:$0xff] }
 0x15f   :  { %v1727_v63 = vsel %vm187_vm2, %v1709_v10, %v1710_v24  ;;  %vm1759_vm12 = vcmp.ge.s32.totalorder %v1743_v45, 0  ;;  %v1728_v32 = vsel %vm187_vm2, %v1708_v42, %v1709_v10  ;;  %v1714_v9 = vrot.slane %v6059_v37, 7  ;;  %v6186_v4 = vld [vmem:[%s6711_s3 + $0x8] sm:$0xff]   ;;  %4848 = vmatprep.subr.bf16.mxu0 %v5011_v57 }
 0x160   :  { %v6098_v30 = vld [vmem:[#allocation2 + $0xe0] ss:$2 sm:$0xff]  ;;  %v1734_v53 = vsel %vm187_vm2, %v1718_v6, %v1703_v59  ;;  %v2153_v27 = vsel %vm937_vm5, %v2137_v7, %v2122_v5  ;;  %v2140_v5 = vsel %vm937_vm5, %v2134_v50, %v2135_v33  ;;  %v1850_v19 = vpack.c.bf16 %v1727_v63, %v1728_v32  ;;  %4849 = vmatpush3.bf16.msra.mxu0 %v5011_v57 }
 0x161   :  { %v1864_v55 = vpack.c.bf16 %v6089_v48, %v6098_v30  ;;  %v2136_v15 = vrot.slane %v6098_v30, 1  ;;  %v1831_v47 = vsel %vm1751_vm10, %v1734_v53, 0.0  ;;  %v2265_v3 = vsel %vm2201_vm11, %v2153_v27, 0.0  ;;  %v5013_v48 = vld [vmem:[%s6711_s3 + $0x20] sm:$0xff]  }
 0x162   :  { %v1847_v18 = vpack.c.bf16 %v1733_v23, %v1831_v47  ;;  %v1839_v38 = vsel %vm1759_vm12, %v1726_v49, 0.0  ;;  %v1716_v16 = vrot.slane %v6085_v29, 7  ;;  %v1713_v40 = vrot.slane %v6043_v61, 7  ;;  %v5009_v29 = vld [vmem:[%s6711_s3 + $0x18] sm:$0xff]   ;;  %4850 = vmatprep.subr.bf16.mxu0 %v5013_v48 }
 0x163   :  { %4785 = vmatmul.mubr.msk.bf16.gmra.mxu1 %vm1623_vm8, %v1864_v55  ;;  %v2139_v36 = vsel %vm937_vm5, %v2135_v33, %v2136_v15  ;;  %v2138_v34 = vsel %vm937_vm5, %v2136_v15, %v2137_v7  ;;  %v1851_v62 = vpack.c.bf16 %v1725_v20, %v1839_v38  ;;  %v1715_v11 = vrot.slane %v6076_v56, 7  ;;  %4824 = vmatprep.subr.bf16.mxu1 %v5009_v29 }
 0x164   :  { %4790 = vmatprep.mubr.msk.bf16.mxu1 %vm1623_vm8, %v1847_v18  ;;  %v2272_v60 = vpack.c.bf16 %v2139_v36, %v2140_v5  ;;  %v2273_v21 = vpack.c.bf16 %v2265_v3, %v2138_v34  ;;  %v1723_v12 = vsel %vm187_vm2, %v1713_v40, %v1714_v9  ;;  %v1724_v37 = vsel %vm187_vm2, %v1712_v0, %v1713_v40 }
 0x165   :  { %v1721_v46 = vsel %vm187_vm2, %v1715_v11, %v1716_v16  ;;  %v1852_v13 = vpack.c.bf16 %v1723_v12, %v1724_v37  ;;  %v1722_v50 = vsel %vm187_vm2, %v1714_v9, %v1715_v11  ;;  %v1717_v44 = vrot.slane %v6098_v30, 7  ;;  %4851 = vmatpush3.bf16.msra.mxu0 %v5013_v48 }
 0x166   :  { %4820 = vmatprep.mubr.msk.bf16.mxu0 %vm1623_vm8, %v2272_v60  ;;  %v1853_v39 = vpack.c.bf16 %v1721_v46, %v1722_v50  ;;  %vm3372_vm9 = vcmask 523264  }
 0x167   :  { %4821 = vmatmul.mubr.msk.bf16.gmra.mxu0 %vm1623_vm8, %v2273_v21  ;;  %v1719_v61 = vsel %vm187_vm2, %v1717_v44, %v1718_v6  ;;  %v1720_v56 = vsel %vm187_vm2, %v1716_v16, %v1717_v44 }
 0x168   :  { %v1854_v14 = vpack.c.bf16 %v1719_v61, %v1720_v56 }
 0x16b   :  { %4791 = vmatmul.mubr.msk.bf16.vlgmr.msra.gmra.mxu1 %vm1623_vm8, %v1848_v51 }
 0x16c   :  { %4794 = vmatprep.mubr.msk.bf16.mxu1 %vm1623_vm8, %v1849_v52  ;;  %4825 = vmatpush3.bf16.msra.mxu1 %v5009_v29 }
 0x16d   :  { %4826 = vmatprep.subr.bf16.mxu1 %v5010_v41 }
 0x170   :  { %4827 = vmatpush3.bf16.msra.mxu1 %v5010_v41 }
 0x171   :  { %4836 = vmatprep.subr.bf16.mxu1 %v6186_v4 }
 0x173   :  { %4795 = vmatmul.mubr.msk.bf16.gmra.mxu1 %vm1623_vm8, %v1850_v19 }
 0x174   :  { %4798 = vmatprep.mubr.msk.bf16.mxu1 %vm1623_vm8, %v1851_v62 }
 0x17b   :  { %4799 = vmatmul.mubr.msk.bf16.gmra.mxu1 %vm1623_vm8, %v1852_v13 }
 0x17c   :  { %4802 = vmatprep.mubr.msk.bf16.mxu1 %vm1623_vm8, %v1853_v39 }
 0x183   :  { %4803 = vmatmul.mubr.msk.bf16.gmra.mxu1 %vm1623_vm8, %v1854_v14  ;;  %vm5082_vm8 = vmmov 0  }
 0x1f8   :  { %v4774_v54 = vpop.f32.mrf.mxu1 }
 0x1fa   :  { %v1932_v6 = vpop.f32.mrf.mxu1 }
 0x1fc   :  { %v4775_v7 = vpop.f32.mrf.mxu1 }
 0x1fe   :  { %v1935_v59 = vpop.f32.mrf.mxu1  ;;  %v4810_v27 = vpop.f32.mrf.mxu0 }
 0x200   :  { %v2341_v15 = vpop.f32.mrf.mxu0 }
 0x202   :  { %v4811_v18 = vpop.f32.mrf.mxu0 }
 0x204   :  { %v2344_v25 = vpop.f32.mrf.mxu0 }
 0x207   :  { %v4778_v33 = vpop.f32.mrf.mxu1 }
 0x209   :  { %v1948_v30 = vpop.f32.mrf.mxu1 }
 0x20b   :  { %v4779_v53 = vpop.f32.mrf.mxu1 }
 0x20d   :  { %v1951_v55 = vpop.f32.mrf.mxu1 }
 0x214   :  { %v4814_v28 = vpop.f32.mrf.mxu0 }
 0x216   :  { %v2357_v34 = vpop.f32.mrf.mxu0 }
 0x217   :  { %v6192_v23 = vpop.f32.mrf.mxu1 }
 0x218   :  { %v4815_v60 = vpop.f32.mrf.mxu0 }
 0x219   :  { %v6194_v47 = vpop.f32.mrf.mxu1 }
 0x21a   :  { %v2360_v43 = vpop.f32.mrf.mxu0 }
 0x21b   :  { %v6196_v3 = vpop.f32.mrf.mxu1 }
 0x21d   :  { %v6198_v36 = vpop.f32.mrf.mxu1 }
 0x21e   :  { %v4818_v58 = vpop.f32.mrf.mxu0 }
 0x220   :  { %v2373_v32 = vpop.f32.mrf.mxu0 }
 0x222   :  { %v4819_v13 = vpop.f32.mrf.mxu0 }
 0x223   :  { %v6200_v5 = vpop.f32.mrf.mxu1 }
 0x225   :  { %v6202_v42 = vpop.f32.mrf.mxu1 }
 0x227   :  { %v6204_v35 = vpop.f32.mrf.mxu1 }
 0x229   :  { %v6206_v21 = vpop.f32.mrf.mxu1 }
 0x22b   :  { %v4792_v31 = vpop.f32.mrf.mxu1 }
 0x22c   :  { %v2068_v1 = vadd.f32 %v4792_v31, %v4774_v54 }
 0x22d   :  { %v2059_v2 = vpop.f32.mrf.mxu1 }
 0x22e   :  { %v2406_v51 = vadd.f32 %v4810_v27, %v2068_v1  ;;  %v2060_v22 = vadd.f32 %v2059_v2, %v1932_v6 }
 0x22f   :  { %v4793_v52 = vpop.f32.mrf.mxu1 }
 0x230   :  { %v2429_v24 = vadd.f32 %v6211_v26, %v2406_v51  ;;  %v2404_v45 = vadd.f32 %v2341_v15, %v2060_v22  ;;  %v2071_v0 = vadd.f32 %v4793_v52, %v4775_v7 }
 0x231   :  { %v2062_v10 = vpop.f32.mrf.mxu1 }
 0x232   :  { %v2427_v63 = vadd.f32 %v6211_v26, %v2404_v45  ;;  %v2407_v49 = vadd.f32 %v4811_v18, %v2071_v0  ;;  %v2063_v20 = vadd.f32 %v2062_v10, %v1935_v59  ;;  %v2445_v19 = vmax.f32 %v2429_v24, 0.0 }
 0x233   :  { %v4796_v38 = vpop.f32.mrf.mxu1 }
 0x234   :  { %v2430_v9 = vadd.f32 %v6211_v26, %v2407_v49  ;;  %v2405_v62 = vadd.f32 %v2344_v25, %v2063_v20  ;;  %v2443_v16 = vmax.f32 %v2427_v63, 0.0  ;;  %v2084_v40 = vadd.f32 %v4796_v38, %v4778_v33  ;;  %v2376_v33 = vpop.f32.mrf.mxu0 }
 0x235   :  { %v2075_v11 = vpop.f32.mrf.mxu1  ;;  %v2461_v50 = vrot.slane %v2445_v19, 1 }
 0x236   :  { %v2446_v12 = vmax.f32 %v2430_v9, 0.0  ;;  %v2428_v46 = vadd.f32 %v6211_v26, %v2405_v62  ;;  %v2076_v37 = vadd.f32 %v2075_v11, %v1948_v30  ;;  %v2410_v44 = vadd.f32 %v4814_v28, %v2084_v40  ;;  %v4822_v24 = vpop.f32.mrf.mxu0 }
 0x237   :  { %v4797_v39 = vpop.f32.mrf.mxu1  ;;  %v6217_v41 = vrot.slane %v2443_v16, 1 }
 0x238   :  { %v2462_v61 = vrot.slane %v2446_v12, 1  ;;  %v2444_v56 = vmax.f32 %v2428_v46, 0.0  ;;  %v2408_v14 = vadd.f32 %v2357_v34, %v2076_v37  ;;  %v2087_v29 = vadd.f32 %v4797_v39, %v4779_v53  ;;  %v2389_v11 = vpop.f32.mrf.mxu0 }
 0x239   :  { %v2433_v57 = vadd.f32 %v6211_v26, %v2410_v44  ;;  %v2078_v48 = vpop.f32.mrf.mxu1 }
 0x23a   :  { %v2487_v54 = vsel %vm937_vm5, %v2461_v50, %v2462_v61  ;;  %v2460_v6 = vrot.slane %v2444_v56, 1  ;;  %v2431_v7 = vadd.f32 %v6211_v26, %v2408_v14  ;;  %v2411_v59 = vadd.f32 %v4815_v60, %v2087_v29 }
 0x23b   :  { %v2493_v30 = vmax.f32 %v2445_v19, %v2487_v54  ;;  %v2449_v27 = vmax.f32 %v2433_v57, 0.0  ;;  %v2079_v15 = vadd.f32 %v2078_v48, %v1951_v55  ;;  %v4800_v18 = vpop.f32.mrf.mxu1  ;;  %v4823_v57 = vpop.f32.mrf.mxu0 }
 0x23c   :  { %v2488_v53 = vsel %vm937_vm5, %v2460_v6, %v2461_v50  ;;  %v2489_v25 = vsel %vm937_vm5, %v6217_v41, %v2460_v6  ;;  %v2447_v28 = vmax.f32 %v2431_v7, 0.0  ;;  %v2434_v34 = vadd.f32 %v6211_v26, %v2411_v59 }
 0x23d   :  { %2510 = vst.msk [vmem:[#allocation2 + $0x10] sm:$0xff] %vm2507_vm13, %v2493_v30  ;;  %v2491_v31 = vmax.f32 %v2443_v16, %v2489_v25  ;;  %v2492_v1 = vmax.f32 %v2444_v56, %v2488_v53  ;;  %v2409_v60 = vadd.f32 %v2360_v43, %v2079_v15  ;;  %v2091_v2 = vpop.f32.mrf.mxu1  ;;  %v2100_v55 = vadd.f32 %v4800_v18, %v6192_v23 }
 0x23e   :  { %v2463_v51 = vrot.slane %v2447_v28, 1  ;;  %v2450_v22 = vmax.f32 %v2434_v34, 0.0  ;;  %v2092_v52 = vadd.f32 %v2091_v2, %v6194_v47  ;;  %v2465_v45 = vrot.slane %v2449_v27, 1  ;;  %v2392_v2 = vpop.f32.mrf.mxu0 }
 0x23f   :  { %2508 = vst.msk [vmem:[#allocation2] sm:$0xff] %vm2507_vm13, %v2491_v31  ;;  %2509 = vst.msk [vmem:[#allocation2 + $0x8] sm:$0xff] %vm2507_vm13, %v2492_v1  ;;  %v2432_v0 = vadd.f32 %v6211_v26, %v2409_v60  ;;  %v4801_v10 = vpop.f32.mrf.mxu1  ;;  %v2414_v49 = vadd.f32 %v4818_v58, %v2100_v55  ;;  %v6268_v60 = vadd.s32 24, %v5201_v8 }
 0x240   :  { %v2486_v63 = vsel %vm937_vm5, %v2462_v61, %v2463_v51  ;;  %v2466_v43 = vrot.slane %v2450_v22, 1  ;;  %v2412_v20 = vadd.f32 %v2373_v32, %v2092_v52  ;;  %v2103_v23 = vadd.f32 %v4801_v10, %v6196_v3 }
 0x241   :  { %v2494_v19 = vmax.f32 %v2446_v12, %v2486_v63  ;;  %v2448_v38 = vmax.f32 %v2432_v0, 0.0  ;;  %v2094_v47 = vpop.f32.mrf.mxu1  ;;  %v2437_v62 = vadd.f32 %v6211_v26, %v2414_v49 }
 0x242   :  { %v2483_v9 = vsel %vm937_vm5, %v2465_v45, %v2466_v43  ;;  %v2435_v16 = vadd.f32 %v6211_v26, %v2412_v20  ;;  %v2095_v40 = vadd.f32 %v2094_v47, %v6198_v36  ;;  %v2415_v32 = vadd.f32 %v4819_v13, %v2103_v23 }
 0x243   :  { %2511 = vst.msk [vmem:[#allocation2 + $0x18] sm:$0xff] %vm2507_vm13, %v2494_v19  ;;  %v2497_v46 = vmax.f32 %v2449_v27, %v2483_v9  ;;  %v2464_v58 = vrot.slane %v2448_v38, 1  ;;  %v4804_v12 = vpop.f32.mrf.mxu1  ;;  %v2453_v37 = vmax.f32 %v2437_v62, 0.0  ;;  %v2535_v9 = vand.u32 31, %v6268_v60 }
 0x244   :  { %v2451_v50 = vmax.f32 %v2435_v16, 0.0  ;;  %v2413_v3 = vadd.f32 %v2376_v33, %v2095_v40  ;;  %v2116_v44 = vadd.f32 %v4804_v12, %v6200_v5  ;;  %v6251_v61 = vadd.f32 %v6211_v26, %v2415_v32 }
 0x245   :  { %2514 = vst.msk [vmem:[#allocation2 + $0x30] sm:$0xff] %vm2507_vm13, %v2497_v46  ;;  %v2484_v39 = vsel %vm937_vm5, %v2464_v58, %v2465_v45  ;;  %v2485_v36 = vsel %vm937_vm5, %v2463_v51, %v2464_v58  ;;  %v2107_v56 = vpop.f32.mrf.mxu1  ;;  %v2469_v59 = vrot.slane %v2453_v37, 1 }
 0x246   :  { %v2495_v14 = vmax.f32 %v2447_v28, %v2485_v36  ;;  %v2496_v13 = vmax.f32 %v2448_v38, %v2484_v39  ;;  %v2467_v29 = vrot.slane %v2451_v50, 1  ;;  %v2454_v48 = vmax.f32 %v6251_v61, 0.0  ;;  %v6263_v31 = vld [vmem:[#allocation2] ss:$2 sm:$0xff] }
 0x247   :  { %v2436_v5 = vadd.f32 %v6211_v26, %v2413_v3  ;;  %v2418_v54 = vadd.f32 %v4822_v24, %v2116_v44  ;;  %v2108_v6 = vadd.f32 %v2107_v56, %v6202_v42  ;;  %v4805_v7 = vpop.f32.mrf.mxu1  ;;  %v2807_v47 = vrot.slane %v6263_v31, 1 }
 0x248   :  { %2512 = vst.msk [vmem:[#allocation2 + $0x20] sm:$0xff] %vm2507_vm13, %v2495_v14  ;;  %2513 = vst.msk [vmem:[#allocation2 + $0x28] sm:$0xff] %vm2507_vm13, %v2496_v13  ;;  %v2482_v33 = vsel %vm937_vm5, %v2466_v43, %v2467_v29  ;;  %v2119_v30 = vadd.f32 %v4805_v7, %v6204_v35  ;;  %v2470_v15 = vrot.slane %v2454_v48, 1  ;;  %v2826_v14 = vadd.s32 1, %v2535_v9  ;;  %v5014_v13 = vld [vmem:[%s6711_s3] sm:$0xff]  }
 0x249   :  { %v2498_v27 = vmax.f32 %v2450_v22, %v2482_v33  ;;  %v2452_v18 = vmax.f32 %v2436_v5, 0.0  ;;  %v2441_v53 = vadd.f32 %v6211_v26, %v2418_v54  ;;  %v2110_v25 = vpop.f32.mrf.mxu1  ;;  %v2416_v28 = vadd.f32 %v2389_v11, %v2108_v6 }
 0x24a   :  { %v2419_v34 = vadd.f32 %v4823_v57, %v2119_v30  ;;  %v2111_v42 = vadd.f32 %v2110_v25, %v6206_v21  ;;  %v6265_v1 = vld [vmem:[#allocation2 + $0x10] ss:$2 sm:$0xff]  ;;  %v2479_v35 = vsel %vm937_vm5, %v2469_v59, %v2470_v15  ;;  %v2532_v57 = vand.u32 31, %v5201_v8 }
 0x24b   :  { %2515 = vst.msk [vmem:[#allocation2 + $0x38] sm:$0xff] %vm2507_vm13, %v2498_v27  ;;  %v2468_v51 = vrot.slane %v2452_v18, 1  ;;  %v2457_v22 = vmax.f32 %v2441_v53, 0.0  ;;  %v2620_v55 = vpack.c.bf16 %v6265_v1, %v6263_v31  ;;  %v2501_v52 = vmax.f32 %v2453_v37, %v2479_v35 }
 0x24c   :  { %v2439_v21 = vadd.f32 %v6211_v26, %v2416_v28  ;;  %v2442_v24 = vadd.f32 %v6211_v26, %v2419_v34  ;;  %v2417_v45 = vadd.f32 %v2392_v2, %v2111_v42  ;;  %v2808_v63 = vrot.slane %v6265_v1, 1 }
 0x24d   :  { %v2480_v0 = vsel %vm937_vm5, %v2468_v51, %v2469_v59  ;;  %v2481_v10 = vsel %vm937_vm5, %v2467_v29, %v2468_v51  ;;  %4828 = vmatprep.mubr.msk.bf16.mxu1 %vm2507_vm13, %v2620_v55  ;;  %2518 = vst.msk [vmem:[#allocation2 + $0x50] sm:$0xff] %vm2507_vm13, %v2501_v52  ;;  %v2473_v62 = vrot.slane %v2457_v22, 1  ;;  %v2539_v54 = vand.u32 31, %v5747_v17 }
 0x24e   :  { %v2499_v43 = vmax.f32 %v2451_v50, %v2481_v10  ;;  %v2500_v49 = vmax.f32 %v2452_v18, %v2480_v0  ;;  %v2455_v20 = vmax.f32 %v2439_v21, 0.0  ;;  %v2458_v19 = vmax.f32 %v2442_v24, 0.0 }
 0x24f   :  { %v2440_v38 = vadd.f32 %v6211_v26, %v2417_v45  ;;  %v6285_v23 = vld [vmem:[#allocation2 + $0x20] ss:$2 sm:$0xff]  ;;  %v2821_v26 = vsel %vm937_vm5, %v2807_v47, %v2808_v63  ;;  %v95_v59 = vadd.s32 32, %v5201_v8  ;;  %vm2842_vm14 = vcmp.lt.s32.totalorder %v2826_v14, 32 }
 0x250   :  { %2516 = vst.msk [vmem:[#allocation2 + $0x40] sm:$0xff] %vm2507_vm13, %v2499_v43  ;;  %2517 = vst.msk [vmem:[#allocation2 + $0x48] sm:$0xff] %vm2507_vm13, %v2500_v49  ;;  %v2471_v16 = vrot.slane %v2455_v20, 1  ;;  %v2474_v40 = vrot.slane %v2458_v19, 1  ;;  %v2809_v11 = vrot.slane %v6285_v23, 1  ;;  %v2556_v30 = vadd.s32 4294967295, %v2532_v57 }
 0x251   :  { %v2456_v46 = vmax.f32 %v2440_v38, 0.0  ;;  %v2536_v53 = vand.u32 31, %v95_v59  ;;  %v2540_v35 = vrot.slane %v6263_v31, 7 }
 0x252   :  { %v2478_v58 = vsel %vm937_vm5, %v2470_v15, %v2471_v16  ;;  %v2475_v32 = vsel %vm937_vm5, %v2473_v62, %v2474_v40  ;;  %v2490_v12 = vsel %vm937_vm5, %v2474_v40, %v6217_v41  ;;  %v6303_v37 = vld [vmem:[#allocation2 + $0x30] ss:$2 sm:$0xff]  ;;  %v2820_v50 = vsel %vm937_vm5, %v2808_v63, %v2809_v11 }
 0x253   :  { %v2502_v3 = vmax.f32 %v2454_v48, %v2478_v58  ;;  %v2505_v44 = vmax.f32 %v2457_v22, %v2475_v32  ;;  %v2506_v39 = vmax.f32 %v2458_v19, %v2490_v12  ;;  %v2472_v36 = vrot.slane %v2456_v46, 1 }
 0x254   :  { %v2879_v61 = vpack.c.bf16 %v2820_v50, %v2821_v26  ;;  %v2621_v56 = vpack.c.bf16 %v6303_v37, %v6285_v23  ;;  %v2810_v6 = vrot.slane %v6303_v37, 1  ;;  %v2830_v15 = vadd.s32 1, %v2539_v54 }
 0x255   :  { %2519 = vst.msk [vmem:[#allocation2 + $0x58] sm:$0xff] %vm2507_vm13, %v2502_v3  ;;  %2522 = vst.msk [vmem:[#allocation2 + $0x70] sm:$0xff] %vm2507_vm13, %v2505_v44  ;;  %v2476_v41 = vsel %vm937_vm5, %v2472_v36, %v2473_v62  ;;  %v2477_v29 = vsel %vm937_vm5, %v2471_v16, %v2472_v36  ;;  %vm2564_vm15 = vcmp.ge.s32.totalorder %v2556_v30, 0  ;;  %v2560_v21 = vadd.s32 4294967295, %v2536_v53  ;;  %v5015_v44 = vld [vmem:[%s6712_s4 + $0x18] sm:$0xff]   ;;  %v5017_v36 = vld [vmem:[%s6712_s4 + $0x28] sm:$0xff]  }
 0x256   :  { %2523 = vst.msk [vmem:[#allocation2 + $0x78] sm:$0xff] %vm2507_vm13, %v2506_v39  ;;  %v2503_v48 = vmax.f32 %v2455_v20, %v2477_v29  ;;  %v2504_v5 = vmax.f32 %v2456_v46, %v2476_v41  ;;  %4852 = vmatprep.mubr.msk.bf16.mxu0 %vm2507_vm13, %v2879_v61  ;;  %4829 = vmatmul.mubr.msk.bf16.vlgmr.msra.gmra.mxu1 %vm2507_vm13, %v2621_v56  ;;  %vm2846_vm0 = vcmp.lt.s32.totalorder %v2830_v15, 32  ;;  %v2543_v10 = vrot.slane %v6303_v37, 7  ;;  %v5016_v39 = vld [vmem:[%s6712_s4 + $0x10] sm:$0xff]   ;;  %v6383_v61 = vld [vmem:[%s6712_s4 + $0x8] sm:$0xff]   ;;  %v5019_v56 = vld [vmem:[%s6712_s4 + $0x20] sm:$0xff]  }
 0x257   :  { %4837 = vmatpush3.bf16.msra.mxu1 %v6186_v4  ;;  %v2528_v7 = vld [vmem:[#allocation2 + $0x40] ss:$2 sm:$0xff]  ;;  %v2819_v17 = vsel %vm937_vm5, %v2809_v11, %v2810_v6  ;;  %v2541_v4 = vrot.slane %v6265_v1, 7  ;;  %v2542_v16 = vrot.slane %v6285_v23, 7  ;;  %vm2568_vm1 = vcmp.ge.s32.totalorder %v2560_v21, 0  ;;  %4876 = vmatprep.subr.bf16.mxu0 %v5017_v36 }
 0x258   :  { %2520 = vst.msk [vmem:[#allocation2 + $0x60] sm:$0xff] %vm2507_vm13, %v2503_v48  ;;  %2521 = vst.msk [vmem:[#allocation2 + $0x68] sm:$0xff] %vm2507_vm13, %v2504_v5  ;;  %v2811_v33 = vrot.slane %v2528_v7, 1  ;;  %4838 = vmatprep.subr.bf16.mxu1 %v5014_v13  ;;  %v2544_v63 = vrot.slane %v2528_v7, 7  ;;  %v4390_v15 = vld [vmem:[%s6716_s8] ss:$0 sm:$0xff] }
 0x259   :  { %v2554_v52 = vsel %vm187_vm2, %v2540_v35, %v2541_v4  ;;  %v2553_v23 = vsel %vm187_vm2, %v2541_v4, %v2542_v16 }
 0x25a   :  { %v2818_v27 = vsel %vm937_vm5, %v2810_v6, %v2811_v33  ;;  %v2551_v11 = vsel %vm187_vm2, %v2543_v10, %v2544_v63 }
 0x25b   :  { %v2874_v18 = vsel %vm2842_vm14, %v2818_v27, 0.0  ;;  %4839 = vmatpush3.bf16.msra.mxu1 %v5014_v13  ;;  %v2608_v58 = vsel %vm2568_vm1, %v2551_v11, 0.0  ;;  %vm3654_vm14 = vcmp.lt.s32.totalorder %v5201_v8, 6  ;;  %vm3753_vm1 = vcmp.lt.s32.totalorder %v5201_v8, 5 }
 0x25c   :  { %v2529_v25 = vld [vmem:[#allocation2 + $0x50] ss:$2 sm:$0xff]  ;;  %v2880_v28 = vpack.c.bf16 %v2874_v18, %v2819_v17  ;;  %4860 = vmatprep.subr.bf16.mxu1 %v5015_v44 }
 0x25d   :  { %v2531_v34 = vld [vmem:[#allocation2 + $0x70] ss:$2 sm:$0xff]  ;;  %v2622_v42 = vpack.c.bf16 %v2529_v25, %v2528_v7  ;;  %v2812_v51 = vrot.slane %v2529_v25, 1  ;;  %v2545_v43 = vrot.slane %v2529_v25, 7 }
 0x25e   :  { %v2547_v2 = vrot.slane %v2531_v34, 7  ;;  %4853 = vmatmul.mubr.msk.bf16.vlgmr.msra.gmra.mxu0 %vm2507_vm13, %v2880_v28  ;;  %v2814_v22 = vrot.slane %v2531_v34, 1 }
 0x25f   :  { %4832 = vmatprep.mubr.msk.bf16.mxu1 %vm2507_vm13, %v2622_v42  ;;  %v2530_v55 = vld [vmem:[#allocation2 + $0x60] ss:$2 sm:$0xff]  ;;  %v2817_v38 = vsel %vm937_vm5, %v2811_v33, %v2812_v51  ;;  %v2550_v46 = vsel %vm187_vm2, %v2544_v63, %v2545_v43  ;;  %4877 = vmatpush3.bf16.msra.mxu0 %v5017_v36 }
 0x260   :  { %v2555_v1 = vsel %vm187_vm2, %v2547_v2, %v2540_v35  ;;  %v2623_v24 = vpack.c.bf16 %v2531_v34, %v2530_v55  ;;  %v2813_v45 = vrot.slane %v2530_v55, 1  ;;  %v2822_v20 = vsel %vm937_vm5, %v2814_v22, %v2807_v47  ;;  %4878 = vmatprep.subr.bf16.mxu0 %v5019_v56 }
 0x261   :  { %v2604_v0 = vsel %vm2564_vm15, %v2555_v1, 0.0  ;;  %v2878_v62 = vsel %vm2846_vm0, %v2822_v20, 0.0  ;;  %v2552_v47 = vsel %vm187_vm2, %v2542_v16, %v2543_v10  ;;  %v2546_v32 = vrot.slane %v2530_v55, 7 }
 0x262   :  { %v2612_v49 = vpack.c.bf16 %v2554_v52, %v2604_v0  ;;  %4833 = vmatmul.mubr.msk.bf16.gmra.mxu1 %vm2507_vm13, %v2623_v24  ;;  %v2816_v19 = vsel %vm937_vm5, %v2812_v51, %v2813_v45  ;;  %v2815_v9 = vsel %vm937_vm5, %v2813_v45, %v2814_v22  ;;  %v2613_v26 = vpack.c.bf16 %v2552_v47, %v2553_v23 }
 0x263   :  { %v2881_v31 = vpack.c.bf16 %v2816_v19, %v2817_v38  ;;  %v2882_v40 = vpack.c.bf16 %v2878_v62, %v2815_v9  ;;  %v2614_v12 = vpack.c.bf16 %v2550_v46, %v2608_v58  ;;  %v2548_v37 = vsel %vm187_vm2, %v2546_v32, %v2547_v2  ;;  %4879 = vmatpush3.bf16.msra.mxu0 %v5019_v56 }
 0x264   :  { %4840 = vmatprep.mubr.msk.bf16.mxu1 %vm2507_vm13, %v2612_v49  ;;  %v2549_v50 = vsel %vm187_vm2, %v2545_v43, %v2546_v32 }
 0x265   :  { %4856 = vmatprep.mubr.msk.bf16.mxu0 %vm2507_vm13, %v2881_v31  ;;  %v2615_v3 = vpack.c.bf16 %v2548_v37, %v2549_v50 }
 0x266   :  { %4857 = vmatmul.mubr.msk.bf16.gmra.mxu0 %vm2507_vm13, %v2882_v40 }
 0x26a   :  { %4841 = vmatmul.mubr.msk.bf16.vlgmr.msra.gmra.mxu1 %vm2507_vm13, %v2613_v26 }
 0x26b   :  { %4844 = vmatprep.mubr.msk.bf16.mxu1 %vm2507_vm13, %v2614_v12  ;;  %4861 = vmatpush3.bf16.msra.mxu1 %v5015_v44 }
 0x26c   :  { %4862 = vmatprep.subr.bf16.mxu1 %v5016_v39 }
 0x26f   :  { %4863 = vmatpush3.bf16.msra.mxu1 %v5016_v39 }
 0x270   :  { %4868 = vmatprep.subr.bf16.mxu1 %v6383_v61 }
 0x272   :  { %4845 = vmatmul.mubr.msk.bf16.gmra.mxu1 %vm2507_vm13, %v2615_v3 }
 0x316   :  { %v4830_v14 = vpop.f32.mrf.mxu1 }
 0x318   :  { %v2687_v13 = vpop.f32.mrf.mxu1 }
 0x31a   :  { %v4831_v41 = vpop.f32.mrf.mxu1 }
 0x31c   :  { %v2690_v57 = vpop.f32.mrf.mxu1 }
 0x31e   :  { %v4854_v29 = vpop.f32.mrf.mxu0 }
 0x320   :  { %v2946_v5 = vpop.f32.mrf.mxu0 }
 0x322   :  { %v4834_v48 = vpop.f32.mrf.mxu1  ;;  %v4855_v7 = vpop.f32.mrf.mxu0 }
 0x324   :  { %v2703_v54 = vpop.f32.mrf.mxu1  ;;  %v2949_v30 = vpop.f32.mrf.mxu0 }
 0x326   :  { %v4835_v6 = vpop.f32.mrf.mxu1  ;;  %v4858_v25 = vpop.f32.mrf.mxu0 }
 0x328   :  { %v2706_v59 = vpop.f32.mrf.mxu1  ;;  %v2962_v1 = vpop.f32.mrf.mxu0 }
 0x32a   :  { %v4842_v33 = vpop.f32.mrf.mxu1  ;;  %v4859_v9 = vpop.f32.mrf.mxu0 }
 0x32b   :  { %v2785_v27 = vadd.f32 %v4842_v33, %v4830_v14 }
 0x32c   :  { %v2776_v17 = vpop.f32.mrf.mxu1  ;;  %v2965_v3 = vpop.f32.mrf.mxu0 }
 0x32d   :  { %v2979_v18 = vadd.f32 %v4854_v29, %v2785_v27  ;;  %v2777_v4 = vadd.f32 %v2776_v17, %v2687_v13  ;;  %v6408_v27 = vadd.s32 8, %v5201_v8 }
 0x32e   :  { %v4843_v53 = vpop.f32.mrf.mxu1 }
 0x32f   :  { %v2994_v28 = vadd.f32 %v4390_v15, %v2979_v18  ;;  %v2977_v34 = vadd.f32 %v2946_v5, %v2777_v4  ;;  %v2788_v42 = vadd.f32 %v4843_v53, %v4831_v41  ;;  %v3044_v4 = vand.u32 15, %v5201_v8 }
 0x330   :  { %v2779_v2 = vpop.f32.mrf.mxu1 }
 0x331   :  { %v2992_v35 = vadd.f32 %v4390_v15, %v2977_v34  ;;  %v2980_v51 = vadd.f32 %v4855_v7, %v2788_v42  ;;  %v2780_v22 = vadd.f32 %v2779_v2, %v2690_v57  ;;  %v3002_v55 = vmax.f32 %v2994_v28, 0.0 }
 0x332   :  { %v4846_v52 = vpop.f32.mrf.mxu1  ;;  %v3045_v42 = vand.u32 15, %v6408_v27  ;;  %v93_v2 = vadd.s32 16, %v5201_v8 }
 0x333   :  { %v2995_v21 = vadd.f32 %v4390_v15, %v2980_v51  ;;  %v2978_v24 = vadd.f32 %v2949_v30, %v2780_v22  ;;  %v3000_v45 = vmax.f32 %v2992_v35, 0.0  ;;  %v2801_v0 = vadd.f32 %v4846_v52, %v4834_v48 }
 0x334   :  { %v2792_v10 = vpop.f32.mrf.mxu1  ;;  %v3010_v20 = vrot.slane %v3002_v55, 1  ;;  %v3047_v35 = vand.u32 15, %v6268_v60  ;;  %v3056_v51 = vadd.s32 4294967295, %v3044_v4  ;;  %v3240_v52 = vadd.s32 1, %v3045_v42 }
 0x335   :  { %v3003_v63 = vmax.f32 %v2995_v21, 0.0  ;;  %v2993_v43 = vadd.f32 %v4390_v15, %v2978_v24  ;;  %v2793_v49 = vadd.f32 %v2792_v10, %v2703_v54  ;;  %v2983_v19 = vadd.f32 %v4858_v25, %v2801_v0 }
 0x336   :  { %v4847_v38 = vpop.f32.mrf.mxu1  ;;  %v3008_v47 = vrot.slane %v3000_v45, 1  ;;  %v3242_v24 = vadd.s32 1, %v3047_v35  ;;  %vm3060_vm3 = vcmp.ge.s32.totalorder %v3056_v51, 0  ;;  %vm3248_vm4 = vcmp.lt.s32.totalorder %v3240_v52, 16 }
 0x337   :  { %v3011_v62 = vrot.slane %v3003_v63, 1  ;;  %v3001_v16 = vmax.f32 %v2993_v43, 0.0  ;;  %v2981_v31 = vadd.f32 %v2962_v1, %v2793_v49  ;;  %v2804_v40 = vadd.f32 %v4847_v38, %v4835_v6 }
 0x338   :  { %v2998_v11 = vadd.f32 %v4390_v15, %v2983_v19  ;;  %v2795_v46 = vpop.f32.mrf.mxu1  ;;  %v3046_v1 = vand.u32 15, %v93_v2  ;;  %vm3250_vm6 = vcmp.lt.s32.totalorder %v3242_v24, 16 }
 0x339   :  { %v3020_v23 = vsel %vm937_vm5, %v3010_v20, %v3011_v62  ;;  %v3009_v26 = vrot.slane %v3001_v16, 1  ;;  %v2996_v58 = vadd.f32 %v4390_v15, %v2981_v31  ;;  %v2984_v32 = vadd.f32 %v4859_v9, %v2804_v40  ;;  %v5020_v40 = vld [vmem:[%s6712_s4] sm:$0xff]  }
 0x33a   :  { %v3026_v12 = vmax.f32 %v3002_v55, %v3020_v23  ;;  %v3006_v37 = vmax.f32 %v2998_v11, 0.0  ;;  %v2796_v50 = vadd.f32 %v2795_v46, %v2706_v59  ;;  %v3058_v49 = vadd.s32 4294967295, %v3046_v1 }
 0x33b   :  { %v3021_v44 = vsel %vm937_vm5, %v3009_v26, %v3010_v20  ;;  %v3022_v39 = vsel %vm937_vm5, %v3008_v47, %v3009_v26  ;;  %v3004_v36 = vmax.f32 %v2996_v58, 0.0  ;;  %v2999_v56 = vadd.f32 %v4390_v15, %v2984_v32 }
 0x33c   :  { %3034 = vst.msk [vmem:[#allocation2 + $0x10] sm:$0xff] %vm2507_vm13, %v3026_v12  ;;  %v3024_v14 = vmax.f32 %v3000_v45, %v3022_v39  ;;  %v3025_v13 = vmax.f32 %v3001_v16, %v3021_v44  ;;  %v2982_v41 = vadd.f32 %v2965_v3, %v2796_v50  ;;  %v3014_v5 = vrot.slane %v3006_v37, 1 }
 0x33d   :  { %v3012_v29 = vrot.slane %v3004_v36, 1  ;;  %v3007_v57 = vmax.f32 %v2999_v56, 0.0  ;;  %vm3062_vm7 = vcmp.ge.s32.totalorder %v3058_v49, 0  ;;  %v5023_v56 = vld [vmem:[%s6713_s5 + $0x18] sm:$0xff]  }
 0x33e   :  { %3032 = vst.msk [vmem:[#allocation2] sm:$0xff] %vm2507_vm13, %v3024_v14  ;;  %3033 = vst.msk [vmem:[#allocation2 + $0x8] sm:$0xff] %vm2507_vm13, %v3025_v13  ;;  %v2997_v48 = vadd.f32 %v4390_v15, %v2982_v41  ;;  %v5081_v14 = vmov 0.0   ;;  %v5022_v13 = vld [vmem:[%s6713_s5 + $0x30] sm:$0xff]  }
 0x33f   :  { %v3019_v54 = vsel %vm937_vm5, %v3011_v62, %v3012_v29  ;;  %v3015_v6 = vrot.slane %v3007_v57, 1  ;;  %4896 = vmatprep.subr.bf16.mxu0 %v5081_v14  ;;  %v5025_v41 = vld [vmem:[%s6713_s5 + $0x10] sm:$0xff]  }
 0x340   :  { %v3027_v7 = vmax.f32 %v3003_v63, %v3019_v54  ;;  %v3005_v59 = vmax.f32 %v2997_v48, 0.0  ;;  %v5026_v48 = vld [vmem:[%s6713_s5 + $0x20] sm:$0xff]  }
 0x341   :  { %v3016_v33 = vsel %vm937_vm5, %v3014_v5, %v3015_v6  ;;  %v3023_v30 = vsel %vm937_vm5, %v3015_v6, %v3008_v47 }
 0x342   :  { %3035 = vst.msk [vmem:[#allocation2 + $0x18] sm:$0xff] %vm2507_vm13, %v3027_v7  ;;  %v3030_v17 = vmax.f32 %v3006_v37, %v3016_v33  ;;  %v3031_v15 = vmax.f32 %v3007_v57, %v3023_v30  ;;  %v3013_v18 = vrot.slane %v3005_v59, 1  ;;  %v5027_v57 = vld [vmem:[%s6713_s5 + $0x8] sm:$0xff]  }
 0x344   :  { %3038 = vst.msk [vmem:[#allocation2 + $0x30] sm:$0xff] %vm2507_vm13, %v3030_v17  ;;  %3039 = vst.msk [vmem:[#allocation2 + $0x38] sm:$0xff] %vm2507_vm13, %v3031_v15  ;;  %v3017_v53 = vsel %vm937_vm5, %v3013_v18, %v3014_v5  ;;  %v3018_v25 = vsel %vm937_vm5, %v3012_v29, %v3013_v18  ;;  %v5024_v29 = vld [vmem:[%s6713_s5 + $0x28] sm:$0xff]   ;;  %v5028_v5 = vld [vmem:[%s6713_s5] sm:$0xff]  }
 0x345   :  { %v3028_v28 = vmax.f32 %v3004_v36, %v3018_v25  ;;  %v3029_v34 = vmax.f32 %v3005_v59, %v3017_v53  ;;  %v3040_v22 = vld [vmem:[#allocation2] ss:$2 sm:$0xff]  ;;  %v5021_v36 = vld [vmem:[%s6713_s5 + $0x38] sm:$0xff]  }
 0x346   :  { %v3048_v10 = vrot.slane %v3040_v22, 7  ;;  %v3231_v43 = vrot.slane %v3040_v22, 1  ;;  %v4411_v18 = vld [vmem:[%s6717_s9] ss:$0 sm:$0xff] }
 0x347   :  { %3036 = vst.msk [vmem:[#allocation2 + $0x20] sm:$0xff] %vm2507_vm13, %v3028_v28  ;;  %3037 = vst.msk [vmem:[#allocation2 + $0x28] sm:$0xff] %vm2507_vm13, %v3029_v34 }
 0x349   :  { %v3041_v55 = vld [vmem:[#allocation2 + $0x10] ss:$2 sm:$0xff] }
 0x34a   :  { %v3090_v21 = vpack.c.bf16 %v3041_v55, %v3040_v22  ;;  %v3049_v0 = vrot.slane %v3041_v55, 7  ;;  %v3232_v38 = vrot.slane %v3041_v55, 1 }
 0x34b   :  { %v3043_v45 = vld [vmem:[#allocation2 + $0x30] ss:$2 sm:$0xff] }
 0x34c   :  { %4864 = vmatprep.mubr.msk.bf16.mxu1 %vm2507_vm13, %v3090_v21  ;;  %v3051_v63 = vrot.slane %v3043_v45, 7  ;;  %v3234_v60 = vrot.slane %v3043_v45, 1  ;;  %v3054_v16 = vsel %vm187_vm2, %v3048_v10, %v3049_v0  ;;  %v3237_v32 = vsel %vm937_vm5, %v3231_v43, %v3232_v38 }
 0x34e   :  { %v3042_v20 = vld [vmem:[#allocation2 + $0x20] ss:$2 sm:$0xff]  ;;  %v3055_v19 = vsel %vm187_vm2, %v3051_v63, %v3048_v10  ;;  %v3238_v9 = vsel %vm937_vm5, %v3234_v60, %v3231_v43 }
 0x34f   :  { %v3091_v62 = vpack.c.bf16 %v3043_v45, %v3042_v20  ;;  %v3080_v31 = vsel %vm3060_vm3, %v3055_v19, 0.0  ;;  %v3233_v47 = vrot.slane %v3042_v20, 1  ;;  %v3050_v46 = vrot.slane %v3042_v20, 7 }
 0x350   :  { %v3084_v11 = vpack.c.bf16 %v3054_v16, %v3080_v31  ;;  %v3266_v58 = vsel %vm3250_vm6, %v3238_v9, 0.0 }
 0x351   :  { %4865 = vmatmul.mubr.msk.bf16.vlgmr.msra.gmra.mxu1 %vm2507_vm13, %v3091_v62  ;;  %v3236_v23 = vsel %vm937_vm5, %v3232_v38, %v3233_v47  ;;  %v3235_v26 = vsel %vm937_vm5, %v3233_v47, %v3234_v60  ;;  %v3053_v37 = vsel %vm187_vm2, %v3049_v0, %v3050_v46  ;;  %v3052_v44 = vsel %vm187_vm2, %v3050_v46, %v3051_v63 }
 0x352   :  { %4869 = vmatpush3.bf16.msra.mxu1 %v6383_v61  ;;  %4872 = vmatprep.mubr.msk.bf16.mxu1 %vm2507_vm13, %v3084_v11  ;;  %v3264_v12 = vsel %vm3248_vm4, %v3236_v23, 0.0  ;;  %v3268_v3 = vpack.c.bf16 %v3266_v58, %v3235_v26  ;;  %v3082_v39 = vsel %vm3062_vm7, %v3053_v37, 0.0  ;;  %v6502_v46 = vand.u32 7, %v6408_v27  ;;  %v5029_v27 = vld [vmem:[%s6713_s5 + $0x58] sm:$0xff]  }
 0x353   :  { %4870 = vmatprep.subr.bf16.mxu1 %v5020_v40  ;;  %v3267_v50 = vpack.c.bf16 %v3264_v12, %v3237_v32  ;;  %v3085_v61 = vpack.c.bf16 %v3052_v44, %v3082_v39  ;;  %v6507_v23 = vand.u32 7, %v5201_v8  ;;  %v5050_v8 = vld [vmem:[%s6719_s11 + $0x50] sm:$0xff]  }
 0x354   :  { %v3386_v26 = vadd.s32 4294967295, %v6502_v46 }
 0x355   :  { %4880 = vmatprep.mubr.msk.bf16.mxu0 %vm2507_vm13, %v3267_v50  ;;  %v3385_v58 = vadd.s32 4294967295, %v6507_v23 }
 0x356   :  { %4871 = vmatpush3.bf16.msra.mxu1 %v5020_v40  ;;  %4881 = vmatmul.mubr.msk.bf16.vlgmr.msra.gmra.mxu0 %vm2507_vm13, %v3268_v3  ;;  %vm3388_vm10 = vcmp.ge.s32.totalorder %v3386_v26, 0 }
 0x357   :  { %4884 = vmatprep.subr.bf16.mxu1 %v5081_v14  ;;  %4897 = vmatpush3.bf16.msra.mxu0 %v5023_v56  ;;  %vm3387_vm11 = vcmp.ge.s32.totalorder %v3385_v58, 0  ;;  %v5030_v56 = vld [vmem:[%s6713_s5 + $0x50] sm:$0xff]  }
 0x358   :  { %4898 = vmatprep.subr.bf16.mxu0 %v5081_v14  ;;  %4904 = vmatprep.mubr.msk.bf16.mxu0 %vm5082_vm8, %v5081_v14 }
 0x359   :  { %4873 = vmatmul.mubr.msk.bf16.vlgmr.msra.gmra.mxu1 %vm2507_vm13, %v3085_v61 }
 0x35a   :  { %4885 = vmatpush3.bf16.msra.mxu1 %v5021_v36  ;;  %4892 = vmatprep.mubr.msk.bf16.mxu1 %vm5082_vm8, %v5081_v14 }
 0x35b   :  { %4886 = vmatprep.subr.bf16.mxu1 %v5081_v14  ;;  %4899 = vmatpush3.bf16.msra.mxu0 %v5025_v41 }
 0x35c   :  { %4900 = vmatprep.subr.bf16.mxu0 %v5081_v14 }
 0x35e   :  { %4887 = vmatpush3.bf16.msra.mxu1 %v5022_v13  ;;  %v5031_v13 = vld [vmem:[%s6713_s5 + $0x78] sm:$0xff]  }
 0x35f   :  { %4888 = vmatprep.subr.bf16.mxu1 %v5081_v14  ;;  %4901 = vmatpush3.bf16.msra.mxu0 %v5027_v57  ;;  %v3559_v57 = vadd.s32 1, %v6502_v46 }
 0x360   :  { %4902 = vmatprep.subr.bf16.mxu0 %v5081_v14 }
 0x361   :  { %vm3563_vm12 = vcmp.lt.s32.totalorder %v3559_v57, 8 }
 0x362   :  { %4889 = vmatpush3.bf16.msra.mxu1 %v5024_v29  ;;  %v3558_v29 = vadd.s32 1, %v6507_v23 }
 0x363   :  { %4890 = vmatprep.subr.bf16.mxu1 %v5081_v14  ;;  %4903 = vmatpush3.bf16.msra.mxu0 %v5028_v5  ;;  %v5032_v5 = vld [vmem:[%s6713_s5 + $0x48] sm:$0xff]  }
 0x364   :  { %4920 = vmatprep.subr.bf16.mxu0 %v5081_v14 }
 0x366   :  { %4891 = vmatpush3.bf16.msra.mxu1 %v5026_v48 }
 0x367   :  { %4908 = vmatprep.subr.bf16.mxu1 %v5081_v14 }
 0x411   :  { %v4866_v54 = vpop.f32.mrf.mxu1 }
 0x413   :  { %v3149_v6 = vpop.f32.mrf.mxu1 }
 0x415   :  { %v4867_v7 = vpop.f32.mrf.mxu1 }
 0x416   :  { %v4882_v59 = vpop.f32.mrf.mxu0 }
 0x417   :  { %v3152_v33 = vpop.f32.mrf.mxu1 }
 0x418   :  { %v3326_v30 = vpop.f32.mrf.mxu0 }
 0x419   :  { %v4874_v17 = vpop.f32.mrf.mxu1 }
 0x41a   :  { %v3225_v15 = vadd.f32 %v4874_v17, %v4866_v54  ;;  %v4883_v28 = vpop.f32.mrf.mxu0  ;;  %v5033_v54 = vld [vmem:[%s6713_s5 + $0x70] sm:$0xff]   ;;  %v3658_v17 = vadd.s32 2, %v6502_v46 }
 0x41b   :  { %v3216_v4 = vpop.f32.mrf.mxu1 }
 0x41c   :  { %v3343_v53 = vadd.f32 %v4882_v59, %v3225_v15  ;;  %v3217_v25 = vadd.f32 %v3216_v4, %v3149_v6  ;;  %v3329_v1 = vpop.f32.mrf.mxu0  ;;  %v5034_v15 = vld [vmem:[%s6713_s5 + $0x40] sm:$0xff]   ;;  %vm3662_vm0 = vcmp.lt.s32.totalorder %v3658_v17, 8 }
 0x41d   :  { %v4875_v34 = vpop.f32.mrf.mxu1 }
 0x41e   :  { %v3354_v42 = vadd.f32 %v4411_v18, %v3343_v53  ;;  %v3341_v2 = vadd.f32 %v3326_v30, %v3217_v25  ;;  %v3228_v35 = vadd.f32 %v4875_v34, %v4867_v7  ;;  %v3657_v7 = vadd.s32 2, %v6507_v23 }
 0x41f   :  { %v3219_v51 = vpop.f32.mrf.mxu1 }
 0x420   :  { %v3352_v22 = vadd.f32 %v4411_v18, %v3341_v2  ;;  %v3344_v55 = vadd.f32 %v4883_v28, %v3228_v35  ;;  %v3220_v52 = vadd.f32 %v3219_v51, %v3152_v33  ;;  %v3358_v21 = vmax.f32 %v3354_v42, 0.0  ;;  %v5036_v42 = vld [vmem:[%s6713_s5 + $0x60] sm:$0xff]   ;;  %v5037_v2 = vld [vmem:[%s6713_s5 + $0x98] sm:$0xff]  }
 0x421   :  { %vm3661_vm15 = vcmp.lt.s32.totalorder %v3657_v7, 8 }
 0x422   :  { %v3356_v24 = vmax.f32 %v3352_v22, 0.0  ;;  %v3355_v45 = vadd.f32 %v4411_v18, %v3344_v55  ;;  %v3342_v0 = vadd.f32 %v3329_v1, %v3220_v52  ;;  %v3362_v43 = vrot.slane %v3358_v21, 1  ;;  %v5038_v55 = vld [vmem:[%s6713_s5 + $0x90] sm:$0xff]  }
 0x424   :  { %v3359_v10 = vmax.f32 %v3355_v45, 0.0  ;;  %v3353_v63 = vadd.f32 %v4411_v18, %v3342_v0  ;;  %v3360_v60 = vrot.slane %v3356_v24, 1  ;;  %v5035_v18 = vld [vmem:[%s6713_s5 + $0x68] sm:$0xff]  }
 0x425   :  { %v5039_v45 = vld [vmem:[%s6713_s5 + $0x88] sm:$0xff]  }
 0x426   :  { %v3363_v49 = vrot.slane %v3359_v10, 1  ;;  %v3357_v20 = vmax.f32 %v3353_v63, 0.0 }
 0x428   :  { %v3364_v19 = vsel %vm937_vm5, %v3362_v43, %v3363_v49  ;;  %v3367_v38 = vsel %vm937_vm5, %v3363_v49, %v3360_v60  ;;  %v3361_v9 = vrot.slane %v3357_v20, 1 }
 0x429   :  { %v3370_v62 = vmax.f32 %v3358_v21, %v3364_v19  ;;  %v3371_v16 = vmax.f32 %v3359_v10, %v3367_v38  ;;  %v3756_v21 = vadd.s32 3, %v6507_v23  ;;  %v5041_v19 = vld [vmem:[%s6719_s11 + $0x38] sm:$0xff]  }
 0x42a   :  { %v3365_v31 = vsel %vm937_vm5, %v3361_v9, %v3362_v43  ;;  %v3366_v40 = vsel %vm937_vm5, %v3360_v60, %v3361_v9  ;;  %v5040_v43 = vld [vmem:[%s6713_s5 + $0x80] sm:$0xff]   ;;  %v5042_v38 = vld [vmem:[%s6719_s11 + $0x18] sm:$0xff]   ;;  %v5043_v9 = vld [vmem:[%s6719_s11 + $0x30] sm:$0xff]  }
 0x42b   :  { %3375 = vst.msk [vmem:[#allocation2 + $0x10] sm:$0xff] %vm3372_vm9, %v3370_v62  ;;  %3376 = vst.msk [vmem:[#allocation2 + $0x18] sm:$0xff] %vm3372_vm9, %v3371_v16  ;;  %v3368_v47 = vmax.f32 %v3356_v24, %v3366_v40  ;;  %v3369_v11 = vmax.f32 %v3357_v20, %v3365_v31  ;;  %v3757_v24 = vadd.s32 3, %v6502_v46  ;;  %vm3760_vm3 = vcmp.lt.s32.totalorder %v3756_v21, 8  ;;  %v5044_v62 = vld [vmem:[%s6719_s11 + $0x10] sm:$0xff]   ;;  %v5045_v16 = vld [vmem:[%s6719_s11 + $0x28] sm:$0xff]  }
 0x42c   :  { %v5046_v31 = vld [vmem:[%s6719_s11 + $0x8] sm:$0xff]   ;;  %v5047_v40 = vld [vmem:[%s6719_s11 + $0x20] sm:$0xff]  }
 0x42d   :  { %3373 = vst.msk [vmem:[#allocation2] sm:$0xff] %vm3372_vm9, %v3368_v47  ;;  %3374 = vst.msk [vmem:[#allocation2 + $0x8] sm:$0xff] %vm3372_vm9, %v3369_v11  ;;  %vm3761_vm4 = vcmp.lt.s32.totalorder %v3757_v24, 8  ;;  %v5048_v47 = vld [vmem:[%s6719_s11] sm:$0xff]   ;;  %v5051_v21 = vld [vmem:[%s6719_s11 + $0x48] sm:$0xff]  }
 0x42e   :  { %v5052_v24 = vld [vmem:[%s6719_s11 + $0x40] sm:$0xff]  }
 0x432   :  { %v6511_v32 = vld [vmem:[#allocation2 + $0x10] ss:$2 sm:$0xff] }
 0x433   :  { %v3382_v3 = vrot.slane %v6511_v32, 7  ;;  %v3555_v6 = vrot.slane %v6511_v32, 1  ;;  %v3653_v4 = vrot.slane %v6511_v32, 2  ;;  %v3752_v0 = vrot.slane %v6511_v32, 3 }
 0x434   :  { %v6513_v12 = vld [vmem:[#allocation2] ss:$2 sm:$0xff] }
 0x435   :  { %v3408_v37 = vpack.c.bf16 %v6511_v32, %v6513_v12  ;;  %v3381_v50 = vrot.slane %v6513_v12, 7  ;;  %v3554_v48 = vrot.slane %v6513_v12, 1  ;;  %v3652_v30 = vrot.slane %v6513_v12, 2 }
 0x436   :  { %v3751_v1 = vrot.slane %v6513_v12, 3 }
 0x437   :  { %4893 = vmatmul.mubr.msk.bf16.vlgmr.msra.gmra.mxu1 %vm3372_vm9, %v3408_v37  ;;  %v3383_v44 = vsel %vm187_vm2, %v3381_v50, %v3382_v3  ;;  %v3384_v39 = vsel %vm187_vm2, %v3382_v3, %v3381_v50  ;;  %vm3562_vm2 = vcmp.lt.s32.totalorder %v3558_v29, 8  ;;  %v3556_v59 = vsel %vm937_vm5, %v3554_v48, %v3555_v6 }
 0x438   :  { %4909 = vmatpush3.bf16.msra.mxu1 %v5029_v27  ;;  %v3397_v61 = vsel %vm3387_vm11, %v3384_v39, 0.0  ;;  %v3398_v36 = vsel %vm3388_vm10, %v3383_v44, 0.0  ;;  %4916 = vmatprep.mubr.msk.bf16.mxu1 %vm5082_vm8, %v5081_v14  ;;  %v3557_v33 = vsel %vm937_vm5, %v3555_v6, %v3554_v48  ;;  %v3570_v53 = vsel %vm3562_vm2, %v3556_v59, 0.0 }
 0x439   :  { %4910 = vmatprep.subr.bf16.mxu1 %v5081_v14  ;;  %v3399_v41 = vpack.c.bf16 %v3398_v36, %v3397_v61  ;;  %v3571_v25 = vsel %vm3563_vm12, %v3557_v33, 0.0  ;;  %v3655_v28 = vsel %vm3654_vm14, %v3652_v30, %v3653_v4  ;;  %v3656_v34 = vsel %vm3654_vm14, %v3653_v4, %v3652_v30 }
 0x43a   :  { %v3572_v35 = vpack.c.bf16 %v3571_v25, %v3570_v53  ;;  %v3669_v51 = vsel %vm3661_vm15, %v3655_v28, 0.0  ;;  %v3670_v22 = vsel %vm3662_vm0, %v3656_v34, 0.0  ;;  %v3754_v10 = vsel %vm3753_vm1, %v3751_v1, %v3752_v0 }
 0x43b   :  { %4905 = vmatmul.mubr.msk.bf16.vlgmr.msra.gmra.mxu0 %vm3372_vm9, %v3399_v41  ;;  %v3671_v52 = vpack.c.bf16 %v3670_v22, %v3669_v51  ;;  %v3755_v63 = vsel %vm3753_vm1, %v3752_v0, %v3751_v1  ;;  %v3768_v60 = vsel %vm3760_vm3, %v3754_v10, 0.0  ;;  %v5049_v51 = vld [vmem:[%s6719_s11 + $0x58] sm:$0xff]  }
 0x43c   :  { %4911 = vmatpush3.bf16.msra.mxu1 %v5030_v56  ;;  %4921 = vmatpush3.bf16.msra.mxu0 %v5031_v13  ;;  %v3769_v49 = vsel %vm3761_vm4, %v3755_v63, 0.0  ;;  %v5053_v10 = vld [vmem:[%s6721_s13 + $0x18] sm:$0xff]   ;;  %v5054_v63 = vld [vmem:[%s6721_s13 + $0x10] sm:$0xff]  }
 0x43d   :  { %4912 = vmatprep.subr.bf16.mxu1 %v5081_v14  ;;  %4922 = vmatprep.subr.bf16.mxu0 %v5081_v14  ;;  %v3770_v20 = vpack.c.bf16 %v3769_v49, %v3768_v60  ;;  %v5056_v60 = vld [vmem:[%s6721_s13] sm:$0xff]  }
 0x43e   :  { %4928 = vmatprep.mubr.msk.bf16.mxu0 %vm5082_vm8, %v5081_v14 }
 0x440   :  { %4913 = vmatpush3.bf16.msra.mxu1 %v5032_v5  ;;  %4923 = vmatpush3.bf16.msra.mxu0 %v5033_v54  ;;  %v4469_v5 = vld [vmem:[%s6718_s10] ss:$0 sm:$0xff] }
 0x441   :  { %4914 = vmatprep.subr.bf16.mxu1 %v5081_v14  ;;  %4924 = vmatprep.subr.bf16.mxu0 %v5081_v14 }
 0x444   :  { %4915 = vmatpush3.bf16.msra.mxu1 %v5034_v15  ;;  %4925 = vmatpush3.bf16.msra.mxu0 %v5035_v18 }
 0x445   :  { %4926 = vmatprep.subr.bf16.mxu0 %v5081_v14  ;;  %4932 = vmatprep.subr.bf16.mxu1 %v5081_v14 }
 0x447   :  { %4917 = vmatmul.mubr.msk.bf16.vlgmr.msra.gmra.mxu1 %vm3372_vm9, %v3572_v35 }
 0x448   :  { %4927 = vmatpush3.bf16.msra.mxu0 %v5036_v42  ;;  %4933 = vmatpush3.bf16.msra.mxu1 %v5037_v2 }
 0x449   :  { %4934 = vmatprep.subr.bf16.mxu1 %v5081_v14  ;;  %4940 = vmatprep.mubr.msk.bf16.mxu1 %vm5082_vm8, %v5081_v14 }
 0x44a   :  { %4944 = vmatprep.subr.bf16.mxu0 %v5081_v14 }
 0x44b   :  { %4929 = vmatmul.mubr.msk.bf16.vlgmr.msra.gmra.mxu0 %vm3372_vm9, %v3671_v52 }
 0x44c   :  { %4935 = vmatpush3.bf16.msra.mxu1 %v5038_v55  ;;  %4952 = vmatprep.mubr.msk.bf16.mxu0 %vm5082_vm8, %v5081_v14 }
 0x44d   :  { %4936 = vmatprep.subr.bf16.mxu1 %v5081_v14  ;;  %4945 = vmatpush3.bf16.msra.mxu0 %v5041_v19 }
 0x44e   :  { %4946 = vmatprep.subr.bf16.mxu0 %v5081_v14 }
 0x450   :  { %4937 = vmatpush3.bf16.msra.mxu1 %v5039_v45 }
 0x451   :  { %4938 = vmatprep.subr.bf16.mxu1 %v5081_v14  ;;  %4947 = vmatpush3.bf16.msra.mxu0 %v5043_v9 }
 0x452   :  { %4948 = vmatprep.subr.bf16.mxu0 %v5081_v14 }
 0x454   :  { %4939 = vmatpush3.bf16.msra.mxu1 %v5040_v43  ;;  %v5055_v43 = vld [vmem:[%s6721_s13 + $0x8] sm:$0xff]  }
 0x455   :  { %4956 = vmatprep.subr.bf16.mxu1 %v5081_v14  ;;  %4949 = vmatpush3.bf16.msra.mxu0 %v5045_v16 }
 0x456   :  { %4950 = vmatprep.subr.bf16.mxu0 %v5081_v14 }
 0x457   :  { %4941 = vmatmul.mubr.msk.bf16.vlgmr.msra.gmra.mxu1 %vm3372_vm9, %v3770_v20 }
 0x458   :  { %4964 = vmatprep.mubr.msk.bf16.mxu1 %vm5082_vm8, %v5081_v14  ;;  %4957 = vmatpush3.bf16.msra.mxu1 %v5042_v38 }
 0x459   :  { %4958 = vmatprep.subr.bf16.mxu1 %v5081_v14  ;;  %4951 = vmatpush3.bf16.msra.mxu0 %v5047_v40 }
 0x45a   :  { %4968 = vmatprep.subr.bf16.mxu0 %v5081_v14 }
 0x45c   :  { %4959 = vmatpush3.bf16.msra.mxu1 %v5044_v62 }
 0x45d   :  { %4960 = vmatprep.subr.bf16.mxu1 %v5081_v14 }
 0x460   :  { %4961 = vmatpush3.bf16.msra.mxu1 %v5046_v31 }
 0x461   :  { %4962 = vmatprep.subr.bf16.mxu1 %v5081_v14 }
 0x464   :  { %4963 = vmatpush3.bf16.msra.mxu1 %v5048_v47 }
 0x465   :  { %4980 = vmatprep.subr.bf16.mxu1 %v5081_v14 }
 0x4f7   :  { %v3479_v11 = vpop.f32.mrf.mxu1 }
 0x4f9   :  { %v4894_v46 = vpop.f32.mrf.mxu1 }
 0x4fb   :  { %v3482_v23 = vpop.f32.mrf.mxu1  ;;  %v3547_v26 = vpop.f32.mrf.mxu0 }
 0x4fc   :  { %v3548_v13 = vadd.f32 %v3547_v26, %v3479_v11  ;;  %v4501_v11 = vld [vmem:[%s6720_s12] ss:$0 sm:$0xff] }
 0x4fd   :  { %v4895_v58 = vpop.f32.mrf.mxu1  ;;  %v4906_v32 = vpop.f32.mrf.mxu0 }
 0x4ff   :  { %v3550_v12 = vpop.f32.mrf.mxu0 }
 0x500   :  { %v3551_v29 = vadd.f32 %v3550_v12, %v3482_v23 }
 0x501   :  { %v4907_v27 = vpop.f32.mrf.mxu0 }
 0x507   :  { %v3643_v37 = vpop.f32.mrf.mxu1 }
 0x508   :  { %v3650_v41 = vadd.f32 %v3643_v37, %v3548_v13  ;;  %v5057_v37 = vld [vmem:[%s6723_s15 + $0x8] sm:$0xff]  }
 0x509   :  { %v4918_v50 = vpop.f32.mrf.mxu1 }
 0x50a   :  { %v5058_v50 = vld [vmem:[%s6723_s15] sm:$0xff]   ;;  %s5083_s15 = smov [#allocation3]  }
 0x50b   :  { %v3646_v3 = vpop.f32.mrf.mxu1  ;;  %v3742_v44 = vpop.f32.mrf.mxu0  ;;  %s4273_s19 = sshll.u32 %s5083_s15, 4  ;;  %s4274_s19 = int_to_ptr.vmem [resolvable:$true] %s4273_s19 }
 0x50c   :  { %v3749_v57 = vadd.f32 %v3742_v44, %v3650_v41  ;;  %v3651_v54 = vadd.f32 %v3646_v3, %v3551_v29  ;;  %v4502_v3 = vld [vmem:[%s6722_s14] ss:$0 sm:$0xff]  ;;  %s5059_s14 = scalar_lea.vmem %s4274_s19, 32  ;;  %p5064_p1 = scmp.lt.s32.totalorder %s4274_s19, %s4274_s19 }
 0x50d   :  { %v4919_v39 = vpop.f32.mrf.mxu1  ;;  %v4930_v61 = vpop.f32.mrf.mxu0  ;;  %v4508_v29 = vld [vmem:[%s6724_s16] ss:$0 sm:$0xff]  ;;  %p5060_p0 = scmp.ne.s32.totalorder %s4274_s19, %s5059_s14  ;;  %p5065_p2 = scmp.lt.s32.totalorder %s5059_s14, %s5059_s14 }
 0x50f   :  { %v3745_v36 = vpop.f32.mrf.mxu0  ;;  %p5066_p3 = por %p5065_p2, %p5064_p1 }
 0x510   :  { %v3750_v59 = vadd.f32 %v3745_v36, %v3651_v54 }
 0x511   :  { %v4931_v56 = vpop.f32.mrf.mxu0  ;;  %p5067_p4 = pnand %p5066_p3, %p5060_p0 }
 0x517   :  { %v3841_v48 = vpop.f32.mrf.mxu1 }
 0x518   :  { %v3848_v6 = vadd.f32 %v3841_v48, %v3749_v57 }
 0x519   :  { %v4942_v7 = vpop.f32.mrf.mxu1 }
 0x51a   :  { %v3857_v33 = vadd.f32 %v4469_v5, %v3848_v6 }
 0x51b   :  { %v3844_v30 = vpop.f32.mrf.mxu1 }
 0x51c   :  { %v3849_v17 = vadd.f32 %v3844_v30, %v3750_v59  ;;  %v3859_v18 = vmax.f32 %v3857_v33, 0.0 }
 0x51d   :  { %v4943_v15 = vpop.f32.mrf.mxu1 }
 0x51e   :  { %v3858_v4 = vadd.f32 %v4469_v5, %v3849_v17  ;;  %v3861_v25 = vrot.slane %v3859_v18, 1 }
 0x520   :  { %v3860_v53 = vmax.f32 %v3858_v4, 0.0 }
 0x522   :  { %v3862_v28 = vrot.slane %v3860_v53, 1 }
 0x524   :  { %v3863_v34 = vsel %vm937_vm5, %v3861_v25, %v3862_v28  ;;  %v3864_v42 = vsel %vm937_vm5, %v3862_v28, %v3861_v25  ;;  %vm4265_vm5 = vcmask 74752  }
 0x525   :  { %v3865_v2 = vmax.f32 %v3859_v18, %v3863_v34  ;;  %v3866_v35 = vmax.f32 %v3860_v53, %v3864_v42 }
 0x527   :  { %3867 = vst.msk [vmem:[#allocation2] sm:$0xff] %vm3372_vm9, %v3865_v2  ;;  %3868 = vst.msk [vmem:[#allocation2 + $0x8] sm:$0xff] %vm3372_vm9, %v3866_v35 }
 0x52e   :  { %v3880_v22 = vld [vmem:[#allocation2 + $0x2] ss:$8 sm:$0x3]  ;;  %v3869_v55 = vld [vmem:[#allocation2] ss:$8 sm:$0x3] }
 0x52f   :  { %v3881_v52 = vpack.c.bf16 %v3880_v22, %v3880_v22  ;;  %v3870_v1 = vpack.c.bf16 %v3869_v55, %v3869_v55  ;;  %v4026_v45 = vld [vmem:[#allocation2 + $0x4] ss:$8 sm:$0x3] }
 0x530   :  { %v4027_v0 = vpack.c.bf16 %v4026_v45, %v4026_v45 }
 0x531   :  { %4953 = vmatmul.mubr.msk.bf16.vlgmr.msra.gmra.mxu0 %vm3372_vm9, %v3881_v52  ;;  %4965 = vmatmul.mubr.msk.bf16.vlgmr.msra.gmra.mxu1 %vm3372_vm9, %v3870_v1 }
 0x532   :  { %4969 = vmatpush3.bf16.msra.mxu0 %v5049_v51  ;;  %4976 = vmatprep.mubr.msk.bf16.mxu0 %vm5082_vm8, %v5081_v14 }
 0x533   :  { %4970 = vmatprep.subr.bf16.mxu0 %v5081_v14  ;;  %4988 = vmatprep.mubr.msk.bf16.mxu1 %vm5082_vm8, %v5081_v14 }
 0x534   :  { %4981 = vmatpush3.bf16.msra.mxu1 %v5053_v10 }
 0x535   :  { %4982 = vmatprep.subr.bf16.mxu1 %v5081_v14 }
 0x536   :  { %4971 = vmatpush3.bf16.msra.mxu0 %v5050_v8 }
 0x537   :  { %4972 = vmatprep.subr.bf16.mxu0 %v5081_v14 }
 0x538   :  { %4983 = vmatpush3.bf16.msra.mxu1 %v5054_v63 }
 0x539   :  { %4984 = vmatprep.subr.bf16.mxu1 %v5081_v14 }
 0x53a   :  { %4973 = vmatpush3.bf16.msra.mxu0 %v5051_v21 }
 0x53b   :  { %4974 = vmatprep.subr.bf16.mxu0 %v5081_v14 }
 0x53c   :  { %4985 = vmatpush3.bf16.msra.mxu1 %v5055_v43 }
 0x53d   :  { %4986 = vmatprep.subr.bf16.mxu1 %v5081_v14 }
 0x53e   :  { %4975 = vmatpush3.bf16.msra.mxu0 %v5052_v24 }
 0x53f   :  { %4992 = vmatprep.subr.bf16.mxu0 %v5081_v14 }
 0x540   :  { %4987 = vmatpush3.bf16.msra.mxu1 %v5056_v60 }
 0x541   :  { %4977 = vmatmul.mubr.msk.bf16.vlgmr.msra.gmra.mxu0 %vm3372_vm9, %v4027_v0 }
 0x542   :  { %4996 = vmatprep.mubr.msk.bf16.mxu0 %vm5082_vm8, %v5081_v14  ;;  %4993 = vmatpush3.bf16.msra.mxu0 %v5057_v37 }
 0x543   :  { %4994 = vmatprep.subr.bf16.mxu0 %v5081_v14 }
 0x546   :  { %4995 = vmatpush3.bf16.msra.mxu0 %v5058_v50 }
 0x5f1   :  { %v3952_v49 = vpop.f32.mrf.mxu0  ;;  %v4019_v20 = vpop.f32.mrf.mxu1 }
 0x5f2   :  { %v4020_v40 = vadd.f32 %v4019_v20, %v3952_v49 }
 0x5f3   :  { %v4954_v19 = vpop.f32.mrf.mxu0  ;;  %v4966_v38 = vpop.f32.mrf.mxu1 }
 0x5f5   :  { %v3955_v9 = vpop.f32.mrf.mxu0  ;;  %v4022_v62 = vpop.f32.mrf.mxu1 }
 0x5f7   :  { %v4955_v16 = vpop.f32.mrf.mxu0  ;;  %v4967_v31 = vpop.f32.mrf.mxu1 }
 0x601   :  { %v4098_v47 = vpop.f32.mrf.mxu0 }
 0x602   :  { %v4104_v46 = vadd.f32 %v4098_v47, %v4020_v40 }
 0x603   :  { %v4978_v23 = vpop.f32.mrf.mxu0 }
 0x604   :  { %v4112_v26 = vadd.f32 %v4501_v11, %v4104_v46 }
 0x605   :  { %v4101_v58 = vpop.f32.mrf.mxu0 }
 0x606   :  { %v4113_v32 = vmax.f32 %v4112_v26, 0.0 }
 0x607   :  { %v4979_v12 = vpop.f32.mrf.mxu0 }
 0x608   :  { %v4114_v27 = vpack.c.bf16 %v4113_v32, %v4113_v32 }
 0x60a   :  { %4989 = vmatmul.mubr.msk.bf16.vlgmr.msra.gmra.mxu1 %vm3372_vm9, %v4114_v27 }
 0x6ca   :  { %v4191_v44 = vpop.f32.mrf.mxu1 }
 0x6cb   :  { %v4192_v39 = vadd.f32 %v4502_v3, %v4191_v44 }
 0x6cc   :  { %v4990_v61 = vpop.f32.mrf.mxu1 }
 0x6cd   :  { %v4197_v36 = vmax.f32 %v4192_v39, 0.0 }
 0x6ce   :  { %v4194_v56 = vpop.f32.mrf.mxu1 }
 0x6cf   :  { %v4198_v13 = vpack.c.bf16 %v4197_v36, %v4197_v36 }
 0x6d0   :  { %v4991_v41 = vpop.f32.mrf.mxu1 }
 0x6d1   :  { %4997 = vmatmul.mubr.msk.bf16.vlgmr.msra.gmra.mxu0 %vm2507_vm13, %v4198_v13 }
 0x791   :  { %v4259_v14 = vpop.f32.mrf.mxu0 }
 0x792   :  { %v4260_v57 = vadd.f32 %v4508_v29, %v4259_v14 }
 0x793   :  { %v4998_v48 = vpop.f32.mrf.mxu0 }
 0x794   :  { %4266 = vst.msk [vmem:[#allocation3] sm:$0x3] %vm4265_vm5, %v4260_v57 }
 0x795   :  { %v4262_v5 = vpop.f32.mrf.mxu0 }
 0x796   :  { %5070 = shalt.err (!%p5067_p4)
}
 0x797   :  { %4276 = dma.vmem_to_hbm [thread:$0]  %s4274_s19, 32, %s6725_s17, [#allocation4]   ;;  %v4999_v54 = vpop.f32.mrf.mxu0 }
 0x798   :  { %5079 = dma.done.wait [#allocation4], 32  }
 0x799   :  { %5080 = vsyncadd [#allocation4], 4294967264 }
 0x79a   :  { %4280 = vsyncpa [#allocation4], 1 }

</bundles_post_ra>
